<compile_context>
chip_gen: v7x
topology: tpu7x:2x2x1
jax: 0.10.0
libtpu: 0.0.40
codegen_flags: <defaults>
</compile_context>

<pallas_src>
import math

import jax
import jax.numpy as jnp
from jax.experimental import pallas as pl
from jax.experimental.pallas import tpu as pltpu

TM_PREF = 1024           # preferred M tile (im2col rows)
TN_PREF = 512            # preferred N tile (output channels) -> lane-dense stores
TK_PREF = 512            # preferred K (reduction) tile
FULL_K_MAX = 1024        # below this, fall back to a single full-K reduction step
SMALL_M_THRESHOLD = 256  # below this, bypass Pallas (plain XLA dot + epilogue)
BN_EPS = 1e-5
LEAKY_SLOPE = 0.01       # nn.LeakyReLU(0.01) as in the reference module
VMEM_LIMIT = 48 * 1024 * 1024   # explicit scoped-VMEM budget (fits v7x's 64 MiB)


def _round_up(x, m):
    return (x + m - 1) // m * m


def _pick_tile(dim_padded, pref):
    """Largest multiple of 128 <= pref that divides dim_padded (a 128-multiple)."""
    t = min(pref, dim_padded)
    t -= t % 128
    t = max(t, 128)
    while dim_padded % t:
        t -= 128
    return t


def _pick_k_tile(kp):
    """K tile: >=256-deep divisor of kp, or a single full-K step for short K."""
    t = _pick_tile(kp, TK_PREF)
    if t < 256 and kp <= FULL_K_MAX:
        t = kp          # one reduction step covering all of K (kp is a 128-multiple)
    return t


# ----------------------------------------------------------------------------
# Fused matmul + bias + activation (+ residual add) Pallas kernel
#   bf16 operands -> f32 MXU accumulation -> f32 epilogue -> bf16 store
# ----------------------------------------------------------------------------
def _make_kernel(act, has_residual):
    def kernel(*refs):
        if has_residual:
            x_ref, w_ref, b_ref, r_ref, o_ref, acc_ref = refs
        else:
            x_ref, w_ref, b_ref, o_ref, acc_ref = refs
            r_ref = None
        k = pl.program_id(2)

        @pl.when(k == 0)
        def _():
            acc_ref[...] = jnp.zeros_like(acc_ref)

        acc_ref[...] += jnp.dot(x_ref[...], w_ref[...],
                                preferred_element_type=jnp.float32)

        @pl.when(k == pl.num_programs(2) - 1)
        def _():
            y = acc_ref[...] + b_ref[...]
            if act == "leaky":
                y = jnp.where(y > 0, y, LEAKY_SLOPE * y)
            elif act == "relu":
                y = jnp.maximum(y, 0.0)
            if r_ref is not None:
                y = y + r_ref[...].astype(jnp.float32)
            o_ref[...] = y.astype(o_ref.dtype)

    return kernel


def fused_matmul(x, w_p, bias_p, n_out, act="leaky", residual=None,
                 out_dtype=jnp.bfloat16):
    """y[:, :n_out] = act((x @ w_p) + bias_p) (+ residual).

    x:        (M, Kp) bf16, K already padded (zero columns) to match w_p
    w_p:      (Kp, Np) bf16, BN scale folded in, pre-padded to 128-multiples
    bias_p:   (1, Np) f32, pre-padded
    residual: (M, n_out) or None (cast to bf16, padded here; small tensor)
    """
    M, Kp = x.shape
    Kp2, Np = w_p.shape
    assert Kp == Kp2 and n_out <= Np

    Mp = _round_up(M, 128)
    tm = _pick_tile(Mp, TM_PREF)
    tn = _pick_tile(Np, TN_PREF)
    tk = _pick_k_tile(Kp)
    # Make sure the parallel grid has >=2 blocks so both v7x TensorCores work.
    if Mp // tm == 1 and Np // tn == 1 and Mp >= 256:
        tm = _pick_tile(Mp, max(Mp // 2, 128))

    xp = x if Mp == M else jnp.pad(x, ((0, Mp - M), (0, 0)))

    inputs = [xp, w_p, bias_p]
    in_specs = [
        pl.BlockSpec((tm, tk), lambda i, j, k: (i, k)),
        pl.BlockSpec((tk, tn), lambda i, j, k: (k, j)),
        pl.BlockSpec((1, tn), lambda i, j, k: (0, j)),
    ]
    if residual is not None:
        rp = residual.astype(jnp.bfloat16)
        rM, rN = rp.shape
        if (Mp, Np) != (rM, rN):
            rp = jnp.pad(rp, ((0, Mp - rM), (0, Np - rN)))
        inputs.append(rp)
        in_specs.append(pl.BlockSpec((tm, tn), lambda i, j, k: (i, j)))

    out = pl.pallas_call(
        _make_kernel(act, residual is not None),
        out_shape=jax.ShapeDtypeStruct((Mp, Np), out_dtype),
        grid_spec=pltpu.PrefetchScalarGridSpec(
            num_scalar_prefetch=0,
            grid=(Mp // tm, Np // tn, Kp // tk),
            in_specs=in_specs,
            out_specs=pl.BlockSpec((tm, tn), lambda i, j, k: (i, j)),
            scratch_shapes=[pltpu.VMEM((tm, tn), jnp.float32)],
        ),
        compiler_params=pltpu.CompilerParams(
            dimension_semantics=("parallel", "parallel", "arbitrary"),
            vmem_limit_bytes=VMEM_LIMIT),
    )(*inputs)
    return out[:M, :n_out]


def _matmul_fallback(x, w_p, bias_p, n_out, act, residual):
    """Tiny-M path: plain XLA dot + identical epilogue (no Pallas padding waste)."""
    y = jnp.dot(x, w_p[:, :n_out], preferred_element_type=jnp.float32)
    y = y + bias_p[0, :n_out]
    if act == "leaky":
        y = jnp.where(y > 0, y, LEAKY_SLOPE * y)
    elif act == "relu":
        y = jnp.maximum(y, 0.0)
    if residual is not None:
        y = y + residual.astype(jnp.float32)
    return y.astype(jnp.bfloat16)


# ----------------------------------------------------------------------------
# Conv = im2col (glue, bf16, K-pad folded into the concat) + fused Pallas matmul
# ----------------------------------------------------------------------------
def _im2col(x, k, s, p, k_pad):
    # x: (N, H, W, C) -> (N*Ho*Wo, k_pad), patch element order (dy, dx, c) + zero pad
    if p:
        x = jnp.pad(x, ((0, 0), (p, p), (p, p), (0, 0)))
    N, H, W, C = x.shape
    Ho = (H - k) // s + 1
    Wo = (W - k) // s + 1
    cols = []
    for dy in range(k):
        for dx in range(k):
            cols.append(x[:, dy:dy + (Ho - 1) * s + 1:s,
                           dx:dx + (Wo - 1) * s + 1:s, :])
    kk_c = k * k * C
    if k_pad > kk_c:
        cols.append(jnp.zeros((N, Ho, Wo, k_pad - kk_c), x.dtype))
    patches = cols[0] if len(cols) == 1 else jnp.concatenate(cols, axis=-1)
    return patches.reshape(N * Ho * Wo, k_pad), (N, Ho, Wo)


def conv_bn_act(x, p, k, s, act="leaky", residual=None):
    x = x.astype(jnp.bfloat16)
    kp = p["w"].shape[0]
    cols, (N, Ho, Wo) = _im2col(x, k, s, k // 2, kp)   # auto_pad(k) = k // 2
    M = N * Ho * Wo
    res2d = None
    if residual is not None:
        res2d = residual.reshape(M, residual.shape[-1])
    if M < SMALL_M_THRESHOLD:
        y = _matmul_fallback(cols, p["w"], p["bias"], p["c2"], act, res2d)
    else:
        y = fused_matmul(cols, p["w"], p["bias"], p["c2"], act=act, residual=res2d)
    return y.reshape(N, Ho, Wo, p["c2"])


# ----------------------------------------------------------------------------
# DarkNet53 (standard DarkNet residual block: 1x1 c->c/2, 3x3 c/2->c, +x)
# ----------------------------------------------------------------------------
def _darknet53_cfg():
    cfg = [("conv", 3, 32, 3, 1)]
    plan = [(32, 64, 1), (64, 128, 2), (128, 256, 8), (256, 512, 8), (512, 1024, 4)]
    for c_in, c_out, n_blocks in plan:
        cfg.append(("conv", c_in, c_out, 3, 2))
        for _ in range(n_blocks):
            cfg.append(("block", c_out))
    return cfg


def _conv_params(key, c1, c2, ksz):
    fan_in = c1 * ksz * ksz
    k_elems = ksz * ksz * c1
    w = jax.random.normal(key, (k_elems, c2), jnp.float32) * math.sqrt(2.0 / fan_in)
    # Eval-mode BN folded into the conv: scale = gamma/sqrt(var+eps) = 1/sqrt(1+eps),
    # bias = beta - mean*scale = 0 with freshly initialized statistics.
    w = w * (1.0 / math.sqrt(1.0 + BN_EPS))
    kp = _round_up(k_elems, 128)
    np_ = _round_up(c2, 128)
    # Pre-pad + pre-cast once; padded rows/cols are zero so results are exact.
    w_p = jnp.pad(w, ((0, kp - k_elems), (0, np_ - c2))).astype(jnp.bfloat16)
    bias = jnp.zeros((1, np_), jnp.float32)
    return {"w": w_p, "bias": bias, "c2": c2}


def init_params(key, num_classes=6):
    cfg = _darknet53_cfg()
    params = []
    for layer in cfg:
        if layer[0] == "conv":
            _, c1, c2, ksz, _s = layer
            key, sub = jax.random.split(key)
            params.append(_conv_params(sub, c1, c2, ksz))
        else:
            c = layer[1]
            key, k1, k2 = jax.random.split(key, 3)
            params.append({"a": _conv_params(k1, c, c // 2, 1),
                           "b": _conv_params(k2, c // 2, c, 3)})

    key, k1, k2, k3 = jax.random.split(key, 4)
    head = {
        "fc_w": jax.random.normal(k1, (1024, 100), jnp.float32) * 0.01,
        "fc_b": jnp.zeros((100,), jnp.float32),
        "fc_p_w": jax.random.normal(k2, (100, 3), jnp.float32) * 0.01,
        "fc_p_b": jnp.zeros((3,), jnp.float32),
        "fc_c_w": jax.random.normal(k3, (100, num_classes), jnp.float32) * 0.01,
        "fc_c_b": jnp.zeros((num_classes,), jnp.float32),
    }
    return cfg, params, head


def darknet53_forward(x_nchw, cfg, params, head):
    # NCHW in (PyTorch convention) -> NHWC bf16 internally
    h = jnp.transpose(x_nchw, (0, 2, 3, 1)).astype(jnp.bfloat16)
    for layer, p in zip(cfg, params):
        if layer[0] == "conv":
            _, _c1, _c2, ksz, s = layer
            h = conv_bn_act(h, p, ksz, s, act="leaky")
        else:
            t = conv_bn_act(h, p["a"], 1, 1, act="leaky")
            h = conv_bn_act(t, p["b"], 3, 1, act="leaky", residual=h)

    # GlobalAvgPool2d: mean over spatial dims -> (N, 1024), done in f32.
    N, H, W, C = h.shape
    feat = jnp.mean(h.reshape(N, H * W, C).astype(jnp.float32), axis=1)

    # Tiny head FCs stay outside Pallas (padding 2x100 / 100x3 tiles would be
    # pure overhead on the MXU).
    z = jnp.maximum(feat @ head["fc_w"] + head["fc_b"], 0.0)   # F.relu(self.fc(x))
    pos = z @ head["fc_p_w"] + head["fc_p_b"]                  # self.fc_p(x)
    cls = z @ head["fc_c_w"] + head["fc_c_b"]                  # self.fc_c(x)
    return pos, cls


if __name__ == "__main__":
    key = jax.random.PRNGKey(0)
    kp, kx = jax.random.split(key)
    cfg, params, head = init_params(kp, num_classes=6)

    # Small but structurally valid input: 3 channels required by the first conv,
    # 32x32 spatial so the 5 stride-2 convs reach 1x1 before global pooling.
    x = jax.random.normal(kx, (2, 3, 32, 32), jnp.float32)

    fwd = jax.jit(lambda inp: darknet53_forward(inp, cfg, params, head))
    pos, cls = fwd(x)
    jax.block_until_ready((pos, cls))

    assert pos.shape == (2, 3), pos.shape
    assert cls.shape == (2, 6), cls.shape
    assert jnp.all(jnp.isfinite(pos)) and jnp.all(jnp.isfinite(cls))
    print("KERNEL_OK")
</pallas_src>

<mosaic_0001>
module attributes {stable_mosaic.version = 11 : i64} {
  func.func @kernel(%arg0: i32, %arg1: i32, %arg2: i32, %arg3: memref<1024x128xbf16, #tpu.memory_space<vmem>>, %arg4: memref<128x128xbf16, #tpu.memory_space<vmem>>, %arg5: memref<1x128xf32, #tpu.memory_space<vmem>>, %arg6: memref<1024x128xbf16, #tpu.memory_space<vmem>>, %arg7: memref<1024x128xf32, #tpu.memory_space<vmem>>) attributes {dimension_semantics = [#tpu.dimension_semantics<parallel>, #tpu.dimension_semantics<parallel>, #tpu.dimension_semantics<arbitrary>], iteration_bounds = array<i64: 2, 1, 1>, scalar_prefetch = 0 : i64, scratch_operands = 1 : i64, tpu.core_type = #tpu.core_type<tc>, window_params = [{transform_indices = @transform_0, window_bounds = array<i64: 1024, 128>}, {transform_indices = @transform_1, window_bounds = array<i64: 128, 128>}, {transform_indices = @transform_2, window_bounds = array<i64: 1, 128>}, {transform_indices = @transform_3, window_bounds = array<i64: 1024, 128>}]} {
    %c0_i32 = arith.constant 0 : i32
    %0 = arith.cmpi eq, %arg2, %c0_i32 : i32
    %1 = arith.extui %0 : i1 to i32
    %c0_i32_0 = arith.constant 0 : i32
    %2 = arith.cmpi ne, %1, %c0_i32_0 : i32
    scf.if %2 {
      %cst_10 = arith.constant 0.000000e+00 : f32
      %12 = vector.broadcast %cst_10 : f32 to vector<1024x128xf32>
      %c0_11 = arith.constant 0 : index
      %c0_12 = arith.constant 0 : index
      %13 = vector.load %arg7[%c0_11, %c0_12] : memref<1024x128xf32, #tpu.memory_space<vmem>>, vector<1024x128xf32>
      tpu.vector_store %arg7[%c0_11, %c0_12], %12 {strides = array<i32>} : memref<1024x128xf32, #tpu.memory_space<vmem>>, vector<1024x128xf32>,
    } else {
    }
    %c0 = arith.constant 0 : index
    %c0_1 = arith.constant 0 : index
    %3 = vector.load %arg7[%c0, %c0_1] : memref<1024x128xf32, #tpu.memory_space<vmem>>, vector<1024x128xf32>
    %c0_2 = arith.constant 0 : index
    %c0_3 = arith.constant 0 : index
    %4 = vector.load %arg3[%c0_2, %c0_3] : memref<1024x128xbf16, #tpu.memory_space<vmem>>, vector<1024x128xbf16>
    %c0_4 = arith.constant 0 : index
    %c0_5 = arith.constant 0 : index
    %5 = vector.load %arg4[%c0_4, %c0_5] : memref<128x128xbf16, #tpu.memory_space<vmem>>, vector<128x128xbf16>
    %cst = arith.constant dense<0.000000e+00> : vector<1024x128xf32>
    %6 = tpu.matmul %4, %5, %cst {dimension_numbers = #tpu.dot_dimension_numbers<[1], [0], [0], [1], [0, 0, 1, 1], [], []>} : vector<1024x128xbf16>, vector<128x128xbf16>, vector<1024x128xf32> -> vector<1024x128xf32>
    %7 = arith.addf %3, %6 : vector<1024x128xf32>
    %c0_6 = arith.constant 0 : index
    %c0_7 = arith.constant 0 : index
    %8 = vector.load %arg7[%c0_6, %c0_7] : memref<1024x128xf32, #tpu.memory_space<vmem>>, vector<1024x128xf32>
    tpu.vector_store %arg7[%c0_6, %c0_7], %7 {strides = array<i32>} : memref<1024x128xf32, #tpu.memory_space<vmem>>, vector<1024x128xf32>,
    %c0_i32_8 = arith.constant 0 : i32
    %9 = arith.cmpi eq, %arg2, %c0_i32_8 : i32
    %10 = arith.extui %9 : i1 to i32
    %c0_i32_9 = arith.constant 0 : i32
    %11 = arith.cmpi ne, %10, %c0_i32_9 : i32
    scf.if %11 {
      %c0_10 = arith.constant 0 : index
      %c0_11 = arith.constant 0 : index
      %12 = vector.load %arg7[%c0_10, %c0_11] : memref<1024x128xf32, #tpu.memory_space<vmem>>, vector<1024x128xf32>
      %c0_12 = arith.constant 0 : index
      %c0_13 = arith.constant 0 : index
      %13 = vector.load %arg5[%c0_12, %c0_13] : memref<1x128xf32, #tpu.memory_space<vmem>>, vector<1x128xf32>
      %14 = vector.broadcast %13 : vector<1x128xf32> to vector<1024x128xf32>
      %15 = arith.addf %12, %14 : vector<1024x128xf32>
      %cst_14 = arith.constant 0.000000e+00 : f32
      %16 = vector.broadcast %cst_14 : f32 to vector<1024x128xf32>
      %17 = arith.cmpf ogt, %15, %16 : vector<1024x128xf32>
      %cst_15 = arith.constant 0.00999999977 : f32
      %18 = vector.broadcast %cst_15 : f32 to vector<1024x128xf32>
      %19 = arith.mulf %18, %15 : vector<1024x128xf32>
      %20 = arith.select %17, %15, %19 : vector<1024x128xi1>, vector<1024x128xf32>
      %21 = arith.truncf %20 : vector<1024x128xf32> to vector<1024x128xbf16>
      %c0_16 = arith.constant 0 : index
      %c0_17 = arith.constant 0 : index
      %22 = vector.load %arg6[%c0_16, %c0_17] : memref<1024x128xbf16, #tpu.memory_space<vmem>>, vector<1024x128xbf16>
      tpu.vector_store %arg6[%c0_16, %c0_17], %21 {strides = array<i32>} : memref<1024x128xbf16, #tpu.memory_space<vmem>>, vector<1024x128xbf16>,
    } else {
    }
    return
  }
  func.func @transform_0(%arg0: i32, %arg1: i32, %arg2: i32) -> (i32, i32) {
    %c0_i32 = arith.constant 0 : i32
    return %arg0, %arg2 : i32, i32
  }
  func.func @transform_1(%arg0: i32, %arg1: i32, %arg2: i32) -> (i32, i32) {
    %c0_i32 = arith.constant 0 : i32
    return %arg2, %arg1 : i32, i32
  }
  func.func @transform_2(%arg0: i32, %arg1: i32, %arg2: i32) -> (i32, i32) {
    %c0_i32 = arith.constant 0 : i32
    %c0_i32_0 = arith.constant 0 : i32
    return %c0_i32, %arg1 : i32, i32
  }
  func.func @transform_3(%arg0: i32, %arg1: i32, %arg2: i32) -> (i32, i32) {
    %c0_i32 = arith.constant 0 : i32
    return %arg0, %arg1 : i32, i32
  }
}

module attributes {stable_mosaic.version = 11 : i64} {
  func.func @kernel(%arg0: i32, %arg1: i32, %arg2: i32, %arg3: memref<256x384xbf16, #tpu.memory_space<vmem>>, %arg4: memref<384x128xbf16, #tpu.memory_space<vmem>>, %arg5: memref<1x128xf32, #tpu.memory_space<vmem>>, %arg6: memref<256x128xbf16, #tpu.memory_space<vmem>>, %arg7: memref<256x128xf32, #tpu.memory_space<vmem>>) attributes {dimension_semantics = [#tpu.dimension_semantics<parallel>, #tpu.dimension_semantics<parallel>, #tpu.dimension_semantics<arbitrary>], iteration_bounds = array<i64: 2, 1, 1>, scalar_prefetch = 0 : i64, scratch_operands = 1 : i64, tpu.core_type = #tpu.core_type<tc>, window_params = [{transform_indices = @transform_0, window_bounds = array<i64: 256, 384>}, {transform_indices = @transform_1, window_bounds = array<i64: 384, 128>}, {transform_indices = @transform_2, window_bounds = array<i64: 1, 128>}, {transform_indices = @transform_3, window_bounds = array<i64: 256, 128>}]} {
    %c0_i32 = arith.constant 0 : i32
    %0 = arith.cmpi eq, %arg2, %c0_i32 : i32
    %1 = arith.extui %0 : i1 to i32
    %c0_i32_0 = arith.constant 0 : i32
    %2 = arith.cmpi ne, %1, %c0_i32_0 : i32
    scf.if %2 {
      %cst_10 = arith.constant 0.000000e+00 : f32
      %12 = vector.broadcast %cst_10 : f32 to vector<256x128xf32>
      %c0_11 = arith.constant 0 : index
      %c0_12 = arith.constant 0 : index
      %13 = vector.load %arg7[%c0_11, %c0_12] : memref<256x128xf32, #tpu.memory_space<vmem>>, vector<256x128xf32>
      tpu.vector_store %arg7[%c0_11, %c0_12], %12 {strides = array<i32>} : memref<256x128xf32, #tpu.memory_space<vmem>>, vector<256x128xf32>,
    } else {
    }
    %c0 = arith.constant 0 : index
    %c0_1 = arith.constant 0 : index
    %3 = vector.load %arg7[%c0, %c0_1] : memref<256x128xf32, #tpu.memory_space<vmem>>, vector<256x128xf32>
    %c0_2 = arith.constant 0 : index
    %c0_3 = arith.constant 0 : index
    %4 = vector.load %arg3[%c0_2, %c0_3] : memref<256x384xbf16, #tpu.memory_space<vmem>>, vector<256x384xbf16>
    %c0_4 = arith.constant 0 : index
    %c0_5 = arith.constant 0 : index
    %5 = vector.load %arg4[%c0_4, %c0_5] : memref<384x128xbf16, #tpu.memory_space<vmem>>, vector<384x128xbf16>
    %cst = arith.constant dense<0.000000e+00> : vector<256x128xf32>
    %6 = tpu.matmul %4, %5, %cst {dimension_numbers = #tpu.dot_dimension_numbers<[1], [0], [0], [1], [0, 0, 1, 1], [], []>} : vector<256x384xbf16>, vector<384x128xbf16>, vector<256x128xf32> -> vector<256x128xf32>
    %7 = arith.addf %3, %6 : vector<256x128xf32>
    %c0_6 = arith.constant 0 : index
    %c0_7 = arith.constant 0 : index
    %8 = vector.load %arg7[%c0_6, %c0_7] : memref<256x128xf32, #tpu.memory_space<vmem>>, vector<256x128xf32>
    tpu.vector_store %arg7[%c0_6, %c0_7], %7 {strides = array<i32>} : memref<256x128xf32, #tpu.memory_space<vmem>>, vector<256x128xf32>,
    %c0_i32_8 = arith.constant 0 : i32
    %9 = arith.cmpi eq, %arg2, %c0_i32_8 : i32
    %10 = arith.extui %9 : i1 to i32
    %c0_i32_9 = arith.constant 0 : i32
    %11 = arith.cmpi ne, %10, %c0_i32_9 : i32
    scf.if %11 {
      %c0_10 = arith.constant 0 : index
      %c0_11 = arith.constant 0 : index
      %12 = vector.load %arg7[%c0_10, %c0_11] : memref<256x128xf32, #tpu.memory_space<vmem>>, vector<256x128xf32>
      %c0_12 = arith.constant 0 : index
      %c0_13 = arith.constant 0 : index
      %13 = vector.load %arg5[%c0_12, %c0_13] : memref<1x128xf32, #tpu.memory_space<vmem>>, vector<1x128xf32>
      %14 = vector.broadcast %13 : vector<1x128xf32> to vector<256x128xf32>
      %15 = arith.addf %12, %14 : vector<256x128xf32>
      %cst_14 = arith.constant 0.000000e+00 : f32
      %16 = vector.broadcast %cst_14 : f32 to vector<256x128xf32>
      %17 = arith.cmpf ogt, %15, %16 : vector<256x128xf32>
      %cst_15 = arith.constant 0.00999999977 : f32
      %18 = vector.broadcast %cst_15 : f32 to vector<256x128xf32>
      %19 = arith.mulf %18, %15 : vector<256x128xf32>
      %20 = arith.select %17, %15, %19 : vector<256x128xi1>, vector<256x128xf32>
      %21 = arith.truncf %20 : vector<256x128xf32> to vector<256x128xbf16>
      %c0_16 = arith.constant 0 : index
      %c0_17 = arith.constant 0 : index
      %22 = vector.load %arg6[%c0_16, %c0_17] : memref<256x128xbf16, #tpu.memory_space<vmem>>, vector<256x128xbf16>
      tpu.vector_store %arg6[%c0_16, %c0_17], %21 {strides = array<i32>} : memref<256x128xbf16, #tpu.memory_space<vmem>>, vector<256x128xbf16>,
    } else {
    }
    return
  }
  func.func @transform_0(%arg0: i32, %arg1: i32, %arg2: i32) -> (i32, i32) {
    %c0_i32 = arith.constant 0 : i32
    return %arg0, %arg2 : i32, i32
  }
  func.func @transform_1(%arg0: i32, %arg1: i32, %arg2: i32) -> (i32, i32) {
    %c0_i32 = arith.constant 0 : i32
    return %arg2, %arg1 : i32, i32
  }
  func.func @transform_2(%arg0: i32, %arg1: i32, %arg2: i32) -> (i32, i32) {
    %c0_i32 = arith.constant 0 : i32
    %c0_i32_0 = arith.constant 0 : i32
    return %c0_i32, %arg1 : i32, i32
  }
  func.func @transform_3(%arg0: i32, %arg1: i32, %arg2: i32) -> (i32, i32) {
    %c0_i32 = arith.constant 0 : i32
    return %arg0, %arg1 : i32, i32
  }
}

module attributes {stable_mosaic.version = 11 : i64} {
  func.func @kernel(%arg0: i32, %arg1: i32, %arg2: i32, %arg3: memref<256x128xbf16, #tpu.memory_space<vmem>>, %arg4: memref<128x128xbf16, #tpu.memory_space<vmem>>, %arg5: memref<1x128xf32, #tpu.memory_space<vmem>>, %arg6: memref<256x128xbf16, #tpu.memory_space<vmem>>, %arg7: memref<256x128xf32, #tpu.memory_space<vmem>>) attributes {dimension_semantics = [#tpu.dimension_semantics<parallel>, #tpu.dimension_semantics<parallel>, #tpu.dimension_semantics<arbitrary>], iteration_bounds = array<i64: 2, 1, 1>, scalar_prefetch = 0 : i64, scratch_operands = 1 : i64, tpu.core_type = #tpu.core_type<tc>, window_params = [{transform_indices = @transform_0, window_bounds = array<i64: 256, 128>}, {transform_indices = @transform_1, window_bounds = array<i64: 128, 128>}, {transform_indices = @transform_2, window_bounds = array<i64: 1, 128>}, {transform_indices = @transform_3, window_bounds = array<i64: 256, 128>}]} {
    %c0_i32 = arith.constant 0 : i32
    %0 = arith.cmpi eq, %arg2, %c0_i32 : i32
    %1 = arith.extui %0 : i1 to i32
    %c0_i32_0 = arith.constant 0 : i32
    %2 = arith.cmpi ne, %1, %c0_i32_0 : i32
    scf.if %2 {
      %cst_10 = arith.constant 0.000000e+00 : f32
      %12 = vector.broadcast %cst_10 : f32 to vector<256x128xf32>
      %c0_11 = arith.constant 0 : index
      %c0_12 = arith.constant 0 : index
      %13 = vector.load %arg7[%c0_11, %c0_12] : memref<256x128xf32, #tpu.memory_space<vmem>>, vector<256x128xf32>
      tpu.vector_store %arg7[%c0_11, %c0_12], %12 {strides = array<i32>} : memref<256x128xf32, #tpu.memory_space<vmem>>, vector<256x128xf32>,
    } else {
    }
    %c0 = arith.constant 0 : index
    %c0_1 = arith.constant 0 : index
    %3 = vector.load %arg7[%c0, %c0_1] : memref<256x128xf32, #tpu.memory_space<vmem>>, vector<256x128xf32>
    %c0_2 = arith.constant 0 : index
    %c0_3 = arith.constant 0 : index
    %4 = vector.load %arg3[%c0_2, %c0_3] : memref<256x128xbf16, #tpu.memory_space<vmem>>, vector<256x128xbf16>
    %c0_4 = arith.constant 0 : index
    %c0_5 = arith.constant 0 : index
    %5 = vector.load %arg4[%c0_4, %c0_5] : memref<128x128xbf16, #tpu.memory_space<vmem>>, vector<128x128xbf16>
    %cst = arith.constant dense<0.000000e+00> : vector<256x128xf32>
    %6 = tpu.matmul %4, %5, %cst {dimension_numbers = #tpu.dot_dimension_numbers<[1], [0], [0], [1], [0, 0, 1, 1], [], []>} : vector<256x128xbf16>, vector<128x128xbf16>, vector<256x128xf32> -> vector<256x128xf32>
    %7 = arith.addf %3, %6 : vector<256x128xf32>
    %c0_6 = arith.constant 0 : index
    %c0_7 = arith.constant 0 : index
    %8 = vector.load %arg7[%c0_6, %c0_7] : memref<256x128xf32, #tpu.memory_space<vmem>>, vector<256x128xf32>
    tpu.vector_store %arg7[%c0_6, %c0_7], %7 {strides = array<i32>} : memref<256x128xf32, #tpu.memory_space<vmem>>, vector<256x128xf32>,
    %c0_i32_8 = arith.constant 0 : i32
    %9 = arith.cmpi eq, %arg2, %c0_i32_8 : i32
    %10 = arith.extui %9 : i1 to i32
    %c0_i32_9 = arith.constant 0 : i32
    %11 = arith.cmpi ne, %10, %c0_i32_9 : i32
    scf.if %11 {
      %c0_10 = arith.constant 0 : index
      %c0_11 = arith.constant 0 : index
      %12 = vector.load %arg7[%c0_10, %c0_11] : memref<256x128xf32, #tpu.memory_space<vmem>>, vector<256x128xf32>
      %c0_12 = arith.constant 0 : index
      %c0_13 = arith.constant 0 : index
      %13 = vector.load %arg5[%c0_12, %c0_13] : memref<1x128xf32, #tpu.memory_space<vmem>>, vector<1x128xf32>
      %14 = vector.broadcast %13 : vector<1x128xf32> to vector<256x128xf32>
      %15 = arith.addf %12, %14 : vector<256x128xf32>
      %cst_14 = arith.constant 0.000000e+00 : f32
      %16 = vector.broadcast %cst_14 : f32 to vector<256x128xf32>
      %17 = arith.cmpf ogt, %15, %16 : vector<256x128xf32>
      %cst_15 = arith.constant 0.00999999977 : f32
      %18 = vector.broadcast %cst_15 : f32 to vector<256x128xf32>
      %19 = arith.mulf %18, %15 : vector<256x128xf32>
      %20 = arith.select %17, %15, %19 : vector<256x128xi1>, vector<256x128xf32>
      %21 = arith.truncf %20 : vector<256x128xf32> to vector<256x128xbf16>
      %c0_16 = arith.constant 0 : index
      %c0_17 = arith.constant 0 : index
      %22 = vector.load %arg6[%c0_16, %c0_17] : memref<256x128xbf16, #tpu.memory_space<vmem>>, vector<256x128xbf16>
      tpu.vector_store %arg6[%c0_16, %c0_17], %21 {strides = array<i32>} : memref<256x128xbf16, #tpu.memory_space<vmem>>, vector<256x128xbf16>,
    } else {
    }
    return
  }
  func.func @transform_0(%arg0: i32, %arg1: i32, %arg2: i32) -> (i32, i32) {
    %c0_i32 = arith.constant 0 : i32
    return %arg0, %arg2 : i32, i32
  }
  func.func @transform_1(%arg0: i32, %arg1: i32, %arg2: i32) -> (i32, i32) {
    %c0_i32 = arith.constant 0 : i32
    return %arg2, %arg1 : i32, i32
  }
  func.func @transform_2(%arg0: i32, %arg1: i32, %arg2: i32) -> (i32, i32) {
    %c0_i32 = arith.constant 0 : i32
    %c0_i32_0 = arith.constant 0 : i32
    return %c0_i32, %arg1 : i32, i32
  }
  func.func @transform_3(%arg0: i32, %arg1: i32, %arg2: i32) -> (i32, i32) {
    %c0_i32 = arith.constant 0 : i32
    return %arg0, %arg1 : i32, i32
  }
}

module attributes {stable_mosaic.version = 11 : i64} {
  func.func @kernel(%arg0: i32, %arg1: i32, %arg2: i32, %arg3: memref<256x384xbf16, #tpu.memory_space<vmem>>, %arg4: memref<384x128xbf16, #tpu.memory_space<vmem>>, %arg5: memref<1x128xf32, #tpu.memory_space<vmem>>, %arg6: memref<256x128xbf16, #tpu.memory_space<vmem>>, %arg7: memref<256x128xbf16, #tpu.memory_space<vmem>>, %arg8: memref<256x128xf32, #tpu.memory_space<vmem>>) attributes {dimension_semantics = [#tpu.dimension_semantics<parallel>, #tpu.dimension_semantics<parallel>, #tpu.dimension_semantics<arbitrary>], iteration_bounds = array<i64: 2, 1, 1>, scalar_prefetch = 0 : i64, scratch_operands = 1 : i64, tpu.core_type = #tpu.core_type<tc>, window_params = [{transform_indices = @transform_0, window_bounds = array<i64: 256, 384>}, {transform_indices = @transform_1, window_bounds = array<i64: 384, 128>}, {transform_indices = @transform_2, window_bounds = array<i64: 1, 128>}, {transform_indices = @transform_3, window_bounds = array<i64: 256, 128>}, {transform_indices = @transform_4, window_bounds = array<i64: 256, 128>}]} {
    %c0_i32 = arith.constant 0 : i32
    %0 = arith.cmpi eq, %arg2, %c0_i32 : i32
    %1 = arith.extui %0 : i1 to i32
    %c0_i32_0 = arith.constant 0 : i32
    %2 = arith.cmpi ne, %1, %c0_i32_0 : i32
    scf.if %2 {
      %cst_10 = arith.constant 0.000000e+00 : f32
      %12 = vector.broadcast %cst_10 : f32 to vector<256x128xf32>
      %c0_11 = arith.constant 0 : index
      %c0_12 = arith.constant 0 : index
      %13 = vector.load %arg8[%c0_11, %c0_12] : memref<256x128xf32, #tpu.memory_space<vmem>>, vector<256x128xf32>
      tpu.vector_store %arg8[%c0_11, %c0_12], %12 {strides = array<i32>} : memref<256x128xf32, #tpu.memory_space<vmem>>, vector<256x128xf32>,
    } else {
    }
    %c0 = arith.constant 0 : index
    %c0_1 = arith.constant 0 : index
    %3 = vector.load %arg8[%c0, %c0_1] : memref<256x128xf32, #tpu.memory_space<vmem>>, vector<256x128xf32>
    %c0_2 = arith.constant 0 : index
    %c0_3 = arith.constant 0 : index
    %4 = vector.load %arg3[%c0_2, %c0_3] : memref<256x384xbf16, #tpu.memory_space<vmem>>, vector<256x384xbf16>
    %c0_4 = arith.constant 0 : index
    %c0_5 = arith.constant 0 : index
    %5 = vector.load %arg4[%c0_4, %c0_5] : memref<384x128xbf16, #tpu.memory_space<vmem>>, vector<384x128xbf16>
    %cst = arith.constant dense<0.000000e+00> : vector<256x128xf32>
    %6 = tpu.matmul %4, %5, %cst {dimension_numbers = #tpu.dot_dimension_numbers<[1], [0], [0], [1], [0, 0, 1, 1], [], []>} : vector<256x384xbf16>, vector<384x128xbf16>, vector<256x128xf32> -> vector<256x128xf32>
    %7 = arith.addf %3, %6 : vector<256x128xf32>
    %c0_6 = arith.constant 0 : index
    %c0_7 = arith.constant 0 : index
    %8 = vector.load %arg8[%c0_6, %c0_7] : memref<256x128xf32, #tpu.memory_space<vmem>>, vector<256x128xf32>
    tpu.vector_store %arg8[%c0_6, %c0_7], %7 {strides = array<i32>} : memref<256x128xf32, #tpu.memory_space<vmem>>, vector<256x128xf32>,
    %c0_i32_8 = arith.constant 0 : i32
    %9 = arith.cmpi eq, %arg2, %c0_i32_8 : i32
    %10 = arith.extui %9 : i1 to i32
    %c0_i32_9 = arith.constant 0 : i32
    %11 = arith.cmpi ne, %10, %c0_i32_9 : i32
    scf.if %11 {
      %c0_10 = arith.constant 0 : index
      %c0_11 = arith.constant 0 : index
      %12 = vector.load %arg8[%c0_10, %c0_11] : memref<256x128xf32, #tpu.memory_space<vmem>>, vector<256x128xf32>
      %c0_12 = arith.constant 0 : index
      %c0_13 = arith.constant 0 : index
      %13 = vector.load %arg5[%c0_12, %c0_13] : memref<1x128xf32, #tpu.memory_space<vmem>>, vector<1x128xf32>
      %14 = vector.broadcast %13 : vector<1x128xf32> to vector<256x128xf32>
      %15 = arith.addf %12, %14 : vector<256x128xf32>
      %cst_14 = arith.constant 0.000000e+00 : f32
      %16 = vector.broadcast %cst_14 : f32 to vector<256x128xf32>
      %17 = arith.cmpf ogt, %15, %16 : vector<256x128xf32>
      %cst_15 = arith.constant 0.00999999977 : f32
      %18 = vector.broadcast %cst_15 : f32 to vector<256x128xf32>
      %19 = arith.mulf %18, %15 : vector<256x128xf32>
      %20 = arith.select %17, %15, %19 : vector<256x128xi1>, vector<256x128xf32>
      %c0_16 = arith.constant 0 : index
      %c0_17 = arith.constant 0 : index
      %21 = vector.load %arg6[%c0_16, %c0_17] : memref<256x128xbf16, #tpu.memory_space<vmem>>, vector<256x128xbf16>
      %22 = arith.extf %21 : vector<256x128xbf16> to vector<256x128xf32>
      %23 = arith.addf %20, %22 : vector<256x128xf32>
      %24 = arith.truncf %23 : vector<256x128xf32> to vector<256x128xbf16>
      %c0_18 = arith.constant 0 : index
      %c0_19 = arith.constant 0 : index
      %25 = vector.load %arg7[%c0_18, %c0_19] : memref<256x128xbf16, #tpu.memory_space<vmem>>, vector<256x128xbf16>
      tpu.vector_store %arg7[%c0_18, %c0_19], %24 {strides = array<i32>} : memref<256x128xbf16, #tpu.memory_space<vmem>>, vector<256x128xbf16>,
    } else {
    }
    return
  }
  func.func @transform_0(%arg0: i32, %arg1: i32, %arg2: i32) -> (i32, i32) {
    %c0_i32 = arith.constant 0 : i32
    return %arg0, %arg2 : i32, i32
  }
  func.func @transform_1(%arg0: i32, %arg1: i32, %arg2: i32) -> (i32, i32) {
    %c0_i32 = arith.constant 0 : i32
    return %arg2, %arg1 : i32, i32
  }
  func.func @transform_2(%arg0: i32, %arg1: i32, %arg2: i32) -> (i32, i32) {
    %c0_i32 = arith.constant 0 : i32
    %c0_i32_0 = arith.constant 0 : i32
    return %c0_i32, %arg1 : i32, i32
  }
  func.func @transform_3(%arg0: i32, %arg1: i32, %arg2: i32) -> (i32, i32) {
    %c0_i32 = arith.constant 0 : i32
    return %arg0, %arg1 : i32, i32
  }
  func.func @transform_4(%arg0: i32, %arg1: i32, %arg2: i32) -> (i32, i32) {
    %c0_i32 = arith.constant 0 : i32
    return %arg0, %arg1 : i32, i32
  }
}

</mosaic_0001>

<bundles_post_ra>
// kernel: _lambda_.4
= control target key start
LH: loop header
LB: loop body
LE: loop exit
PB: predicated region body
PF: predicated region fallthrough
CT: control target
= control target key end

     0   :  { %s4396_s12 = smov 0   ;;  %s4398_s13 = smov 0   ;;  %s4865_s0 = inlined_call_operand.vmem [shape: bf16[2048,128], index: 0, kind: input, shape index: {}]   ;;  %s4866_s1 = inlined_call_operand.vmem [shape: bf16[128,128], index: 1, kind: input, shape index: {}]   ;;  %s4867_s2 = inlined_call_operand.vmem [shape: f32[1,128], index: 2, kind: input, shape index: {}]   ;;  %s4868_s3 = inlined_call_operand.vmem [shape: bf16[2048,128], index: 3, kind: output, shape index: {}]  }
   0x1   :  { %s4400_s14 = smov 0  }
   0x2 LB: > { %s32_s15 = sadd.s32 1, %s4370_s13  ;;  %p3304_p0 = scmp.ge.s32.totalorder %s4374_s14, 1  ;;  %s4374_s14 = sphi %s4400_s14, %s13_s14   ;;  %s4370_s13 = sphi %s4398_s13, %s4870_s13   ;;  %s4366_s12 = sphi %s4396_s12, %s4869_s12  }
   0x3   : > { %p34_p1 = scmp.ge.s32.totalorder %s32_s15, 2  ;;  %p188_p2 = scmp.lt.s32.totalorder %s4374_s14, 3 }
   0x5   : > { %s4872_s15 = smov (%p34_p1, %s32_s15), 0  ;;  %p189_p3 = pnand %p3304_p0, %p188_p2 }
   0x6   : > { %v4279_v0 = vld [vmem:[%s4866_s1] sm:$0xff] (!%p189_p3)   ;;  %s3305_s18 = sshll.u32 (!%p189_p3), %s4366_s12, 7  ;;  %v4280_v1 = vld [vmem:[%s4866_s1 + $0x8] sm:$0xff] (!%p189_p3)   ;;  %v4281_v2 = vld [vmem:[%s4866_s1 + $0x10] sm:$0xff] (!%p189_p3)  }
   0x7   : > { %192 = sbr.rel (%p189_p3) target bundleno = 400 (0x190), region = 32  ;;  %p230_p4 = scmp.lt.s32.totalorder (!%p189_p3), %s3305_s18, 255  ;;  %4095 = vmatprep.subr.bf16.mxu0 (!%p189_p3), %v4279_v0  ;;  %4239 = vmatprep.subr.bf16.mxu1 (!%p189_p3), %v4279_v0  ;;  %v4282_v3 = vld [vmem:[%s4866_s1 + $0x18] sm:$0xff] (!%p189_p3)   ;;  %v4283_v6 = vld [vmem:[%s4866_s1 + $0x20] sm:$0xff] (!%p189_p3)   ;;  %v4284_v7 = vld [vmem:[%s4866_s1 + $0x28] sm:$0xff] (!%p189_p3)  }
   0x8   : > { %4096 = vmatpush3.bf16.msra.mxu0 (!%p189_p3), %v4279_v0  ;;  %4247 = vmatpush3.bf16.msra.mxu1 (!%p189_p3), %v4279_v0  ;;  %v4285_v8 = vld [vmem:[%s4866_s1 + $0x30] sm:$0xff] (!%p189_p3)   ;;  %v4286_v9 = vld [vmem:[%s4866_s1 + $0x38] sm:$0xff] (!%p189_p3)  }
   0x9   : > { %4097 = vmatprep.subr.bf16.mxu0 (!%p189_p3), %v4280_v1  ;;  %4240 = vmatprep.subr.bf16.mxu1 (!%p189_p3), %v4280_v1 }
   0xc   : > { %4098 = vmatpush3.bf16.msra.mxu0 (!%p189_p3), %v4280_v1  ;;  %4248 = vmatpush3.bf16.msra.mxu1 (!%p189_p3), %v4280_v1 }
   0xd   : > { %4099 = vmatprep.subr.bf16.mxu0 (!%p189_p3), %v4281_v2  ;;  %4241 = vmatprep.subr.bf16.mxu1 (!%p189_p3), %v4281_v2 }
   0xe   : > { %s4874_s18 = smov (!%p230_p4, %s3305_s18), 255 }
   0xf   : > { %s3306_s23 = sshll.u32 %s4874_s18, 2 }
  0x10   : > { %s4431_s26 = scalar_lea.vmem %s4865_s0, %s3306_s23  ;;  %4100 = vmatpush3.bf16.msra.mxu0 %v4281_v2  ;;  %4249 = vmatpush3.bf16.msra.mxu1 %v4281_v2  ;;  %s4532_s17 = scalar_lea.vmem %s4868_s3, %s3306_s23 }
  0x11   : > { %v4287_v4 = vld [vmem:[%s4431_s26] sm:$0xff]   ;;  %4101 = vmatprep.subr.bf16.mxu0 %v4282_v3  ;;  %4242 = vmatprep.subr.bf16.mxu1 %v4282_v3  ;;  %v4289_v10 = vld [vmem:[%s4431_s26 + $0x8] sm:$0xff]   ;;  %v4291_v12 = vld [vmem:[%s4431_s26 + $0x10] sm:$0xff]  }
  0x12   : > { %v4288_v5 = vld [vmem:[%s4431_s26 + $0x100] sm:$0xff]   ;;  %4111 = vmatprep.mubr.bf16.mxu0 %v4287_v4  ;;  %v4290_v11 = vld [vmem:[%s4431_s26 + $0x108] sm:$0xff]   ;;  %v4292_v13 = vld [vmem:[%s4431_s26 + $0x110] sm:$0xff]  }
  0x13   : > { %4175 = vmatprep.mubr.bf16.mxu1 %v4288_v5  ;;  %v4293_v14 = vld [vmem:[%s4431_s26 + $0x18] sm:$0xff]   ;;  %v4295_v16 = vld [vmem:[%s4431_s26 + $0x20] sm:$0xff]   ;;  %v4297_v18 = vld [vmem:[%s4431_s26 + $0x28] sm:$0xff]  }
  0x14   : > { %4102 = vmatpush3.bf16.msra.mxu0 %v4282_v3  ;;  %4250 = vmatpush3.bf16.msra.mxu1 %v4282_v3  ;;  %v4294_v15 = vld [vmem:[%s4431_s26 + $0x118] sm:$0xff]   ;;  %v4296_v17 = vld [vmem:[%s4431_s26 + $0x120] sm:$0xff]   ;;  %v4298_v19 = vld [vmem:[%s4431_s26 + $0x128] sm:$0xff]  }
  0x15   : > { %4103 = vmatprep.subr.bf16.mxu0 %v4283_v6  ;;  %4243 = vmatprep.subr.bf16.mxu1 %v4283_v6  ;;  %v4299_v20 = vld [vmem:[%s4431_s26 + $0x30] sm:$0xff]   ;;  %v4301_v22 = vld [vmem:[%s4431_s26 + $0x38] sm:$0xff]   ;;  %v4303_v24 = vld [vmem:[%s4431_s26 + $0x40] sm:$0xff]  }
  0x16   : > { %v4300_v21 = vld [vmem:[%s4431_s26 + $0x130] sm:$0xff]   ;;  %v4302_v23 = vld [vmem:[%s4431_s26 + $0x138] sm:$0xff]   ;;  %v4304_v25 = vld [vmem:[%s4431_s26 + $0x140] sm:$0xff]  }
  0x17   : > { %v4305_v26 = vld [vmem:[%s4431_s26 + $0x48] sm:$0xff]   ;;  %v4307_v28 = vld [vmem:[%s4431_s26 + $0x50] sm:$0xff]   ;;  %v4309_v30 = vld [vmem:[%s4431_s26 + $0x58] sm:$0xff]  }
  0x18   : > { %4104 = vmatpush3.bf16.msra.mxu0 %v4283_v6  ;;  %4251 = vmatpush3.bf16.msra.mxu1 %v4283_v6  ;;  %v4306_v27 = vld [vmem:[%s4431_s26 + $0x148] sm:$0xff]   ;;  %v4308_v29 = vld [vmem:[%s4431_s26 + $0x150] sm:$0xff]   ;;  %v4310_v31 = vld [vmem:[%s4431_s26 + $0x158] sm:$0xff]  }
  0x19   : > { %4105 = vmatprep.subr.bf16.mxu0 %v4284_v7  ;;  %4244 = vmatprep.subr.bf16.mxu1 %v4284_v7  ;;  %v4311_v32 = vld [vmem:[%s4431_s26 + $0x60] sm:$0xff]   ;;  %v4313_v34 = vld [vmem:[%s4431_s26 + $0x68] sm:$0xff]   ;;  %v4315_v36 = vld [vmem:[%s4431_s26 + $0x70] sm:$0xff]  }
  0x1a   : > { %v4312_v33 = vld [vmem:[%s4431_s26 + $0x160] sm:$0xff]   ;;  %v4314_v35 = vld [vmem:[%s4431_s26 + $0x168] sm:$0xff]   ;;  %v4316_v37 = vld [vmem:[%s4431_s26 + $0x170] sm:$0xff]  }
  0x1b   : > { %v4317_v38 = vld [vmem:[%s4431_s26 + $0x78] sm:$0xff]   ;;  %v4319_v40 = vld [vmem:[%s4431_s26 + $0x80] sm:$0xff]   ;;  %v4321_v42 = vld [vmem:[%s4431_s26 + $0x88] sm:$0xff]  }
  0x1c   : > { %4106 = vmatpush3.bf16.msra.mxu0 %v4284_v7  ;;  %4252 = vmatpush3.bf16.msra.mxu1 %v4284_v7  ;;  %v4318_v39 = vld [vmem:[%s4431_s26 + $0x178] sm:$0xff]   ;;  %v4320_v41 = vld [vmem:[%s4431_s26 + $0x180] sm:$0xff]   ;;  %v4322_v43 = vld [vmem:[%s4431_s26 + $0x188] sm:$0xff]  }
  0x1d   : > { %4107 = vmatprep.subr.bf16.mxu0 %v4285_v8  ;;  %4245 = vmatprep.subr.bf16.mxu1 %v4285_v8  ;;  %v4323_v44 = vld [vmem:[%s4431_s26 + $0x90] sm:$0xff]   ;;  %v4325_v46 = vld [vmem:[%s4431_s26 + $0x98] sm:$0xff]   ;;  %v4327_v48 = vld [vmem:[%s4431_s26 + $0xa0] sm:$0xff]  }
  0x1e   : > { %v4324_v45 = vld [vmem:[%s4431_s26 + $0x190] sm:$0xff]   ;;  %v4326_v47 = vld [vmem:[%s4431_s26 + $0x198] sm:$0xff]   ;;  %v4328_v49 = vld [vmem:[%s4431_s26 + $0x1a0] sm:$0xff]  }
  0x1f   : > { %v4329_v50 = vld [vmem:[%s4431_s26 + $0xa8] sm:$0xff]   ;;  %v4331_v52 = vld [vmem:[%s4431_s26 + $0xb0] sm:$0xff]   ;;  %v4333_v54 = vld [vmem:[%s4431_s26 + $0xb8] sm:$0xff]  }
  0x20   : > { %4108 = vmatpush3.bf16.msra.mxu0 %v4285_v8  ;;  %4253 = vmatpush3.bf16.msra.mxu1 %v4285_v8  ;;  %v4330_v51 = vld [vmem:[%s4431_s26 + $0x1a8] sm:$0xff]   ;;  %v4332_v53 = vld [vmem:[%s4431_s26 + $0x1b0] sm:$0xff]   ;;  %v4334_v55 = vld [vmem:[%s4431_s26 + $0x1b8] sm:$0xff]  }
  0x21   : > { %4109 = vmatprep.subr.bf16.mxu0 %v4286_v9  ;;  %4246 = vmatprep.subr.bf16.mxu1 %v4286_v9  ;;  %v4335_v56 = vld [vmem:[%s4431_s26 + $0xc0] sm:$0xff]   ;;  %v4337_v58 = vld [vmem:[%s4431_s26 + $0xc8] sm:$0xff]   ;;  %v4339_v60 = vld [vmem:[%s4431_s26 + $0xd0] sm:$0xff]  }
  0x22   : > { %v4336_v57 = vld [vmem:[%s4431_s26 + $0x1c0] sm:$0xff]   ;;  %v4338_v59 = vld [vmem:[%s4431_s26 + $0x1c8] sm:$0xff]   ;;  %v4340_v61 = vld [vmem:[%s4431_s26 + $0x1d0] sm:$0xff]  }
  0x23   : > { %v4341_v62 = vld [vmem:[%s4431_s26 + $0xd8] sm:$0xff]   ;;  %v4343_v0 = vld [vmem:[%s4431_s26 + $0xe0] sm:$0xff]   ;;  %v4345_v2 = vld [vmem:[%s4431_s26 + $0xe8] sm:$0xff]  }
  0x24   : > { %4110 = vmatpush3.bf16.msra.mxu0 %v4286_v9  ;;  %4254 = vmatpush3.bf16.msra.mxu1 %v4286_v9  ;;  %v4342_v63 = vld [vmem:[%s4431_s26 + $0x1d8] sm:$0xff]   ;;  %v4344_v1 = vld [vmem:[%s4431_s26 + $0x1e0] sm:$0xff]   ;;  %v4346_v3 = vld [vmem:[%s4431_s26 + $0x1e8] sm:$0xff]  }
  0x25   : > { %v4347_v4 = vld [vmem:[%s4431_s26 + $0xf0] sm:$0xff]   ;;  %v4349_v6 = vld [vmem:[%s4431_s26 + $0xf8] sm:$0xff]   ;;  %v4515_v8 = vld [vmem:[%s4867_s2] ss:$0 sm:$0xff] }
  0x26   : > { %v4348_v5 = vld [vmem:[%s4431_s26 + $0x1f0] sm:$0xff]   ;;  %v4350_v7 = vld [vmem:[%s4431_s26 + $0x1f8] sm:$0xff]  }
  0x27   : > { %4112 = vmatmul.mubr.bf16.vlgmr.msra.gmra.mrb[0].mxu0 %v4289_v10  ;;  %4176 = vmatmul.mubr.bf16.vlgmr.msra.gmra.mrb[0].mxu1 %v4290_v11 }
  0x28   : > { %4115 = vmatprep.mubr.bf16.mxu0 %v4291_v12  ;;  %4179 = vmatprep.mubr.bf16.mxu1 %v4292_v13 }
  0x2f   : > { %4116 = vmatmul.mubr.bf16.gmra.mrb[4].mxu0 %v4293_v14  ;;  %4180 = vmatmul.mubr.bf16.gmra.mrb[4].mxu1 %v4294_v15 }
  0x30   : > { %4119 = vmatprep.mubr.bf16.mxu0 %v4295_v16  ;;  %4183 = vmatprep.mubr.bf16.mxu1 %v4296_v17 }
  0x37   : > { %4120 = vmatmul.mubr.bf16.gmra.mrb[8].mxu0 %v4297_v18  ;;  %4184 = vmatmul.mubr.bf16.gmra.mrb[8].mxu1 %v4298_v19 }
  0x38   : > { %4123 = vmatprep.mubr.bf16.mxu0 %v4299_v20  ;;  %4187 = vmatprep.mubr.bf16.mxu1 %v4300_v21 }
  0x3f   : > { %4124 = vmatmul.mubr.bf16.gmra.mrb[12].mxu0 %v4301_v22  ;;  %4188 = vmatmul.mubr.bf16.gmra.mrb[12].mxu1 %v4302_v23 }
  0x40   : > { %4127 = vmatprep.mubr.bf16.mxu0 %v4303_v24  ;;  %4191 = vmatprep.mubr.bf16.mxu1 %v4304_v25 }
  0x47   : > { %4128 = vmatmul.mubr.bf16.gmra.mrb[16].mxu0 %v4305_v26  ;;  %4192 = vmatmul.mubr.bf16.gmra.mrb[16].mxu1 %v4306_v27 }
  0x48   : > { %4131 = vmatprep.mubr.bf16.mxu0 %v4307_v28  ;;  %4195 = vmatprep.mubr.bf16.mxu1 %v4308_v29 }
  0x4f   : > { %4132 = vmatmul.mubr.bf16.gmra.mrb[20].mxu0 %v4309_v30  ;;  %4196 = vmatmul.mubr.bf16.gmra.mrb[20].mxu1 %v4310_v31 }
  0x50   : > { %4135 = vmatprep.mubr.bf16.mxu0 %v4311_v32  ;;  %4199 = vmatprep.mubr.bf16.mxu1 %v4312_v33 }
  0x57   : > { %4136 = vmatmul.mubr.bf16.gmra.mrb[24].mxu0 %v4313_v34  ;;  %4200 = vmatmul.mubr.bf16.gmra.mrb[24].mxu1 %v4314_v35 }
  0x58   : > { %4139 = vmatprep.mubr.bf16.mxu0 %v4315_v36  ;;  %4203 = vmatprep.mubr.bf16.mxu1 %v4316_v37 }
  0x5f   : > { %4140 = vmatmul.mubr.bf16.gmra.mrb[28].mxu0 %v4317_v38  ;;  %4204 = vmatmul.mubr.bf16.gmra.mrb[28].mxu1 %v4318_v39 }
  0x60   : > { %4143 = vmatprep.mubr.bf16.mxu0 %v4319_v40  ;;  %4207 = vmatprep.mubr.bf16.mxu1 %v4320_v41 }
  0x67   : > { %4144 = vmatmul.mubr.bf16.gmra.mrb[32].mxu0 %v4321_v42  ;;  %4208 = vmatmul.mubr.bf16.gmra.mrb[32].mxu1 %v4322_v43 }
  0x68   : > { %4147 = vmatprep.mubr.bf16.mxu0 %v4323_v44  ;;  %4211 = vmatprep.mubr.bf16.mxu1 %v4324_v45 }
  0x6f   : > { %4148 = vmatmul.mubr.bf16.gmra.mrb[36].mxu0 %v4325_v46  ;;  %4212 = vmatmul.mubr.bf16.gmra.mrb[36].mxu1 %v4326_v47 }
  0x70   : > { %4151 = vmatprep.mubr.bf16.mxu0 %v4327_v48  ;;  %4215 = vmatprep.mubr.bf16.mxu1 %v4328_v49 }
  0x77   : > { %4152 = vmatmul.mubr.bf16.gmra.mrb[40].mxu0 %v4329_v50  ;;  %4216 = vmatmul.mubr.bf16.gmra.mrb[40].mxu1 %v4330_v51 }
  0x78   : > { %4155 = vmatprep.mubr.bf16.mxu0 %v4331_v52  ;;  %4219 = vmatprep.mubr.bf16.mxu1 %v4332_v53 }
  0x7f   : > { %4156 = vmatmul.mubr.bf16.gmra.mrb[44].mxu0 %v4333_v54  ;;  %4220 = vmatmul.mubr.bf16.gmra.mrb[44].mxu1 %v4334_v55 }
  0x80   : > { %4159 = vmatprep.mubr.bf16.mxu0 %v4335_v56  ;;  %4223 = vmatprep.mubr.bf16.mxu1 %v4336_v57 }
  0x87   : > { %4160 = vmatmul.mubr.bf16.gmra.mrb[48].mxu0 %v4337_v58  ;;  %4224 = vmatmul.mubr.bf16.gmra.mrb[48].mxu1 %v4338_v59 }
  0x88   : > { %4163 = vmatprep.mubr.bf16.mxu0 %v4339_v60  ;;  %4227 = vmatprep.mubr.bf16.mxu1 %v4340_v61 }
  0x8f   : > { %4164 = vmatmul.mubr.bf16.gmra.mrb[52].mxu0 %v4341_v62  ;;  %4228 = vmatmul.mubr.bf16.gmra.mrb[52].mxu1 %v4342_v63 }
  0x90   : > { %4167 = vmatprep.mubr.bf16.mxu0 %v4343_v0  ;;  %4231 = vmatprep.mubr.bf16.mxu1 %v4344_v1 }
  0x97   : > { %4168 = vmatmul.mubr.bf16.gmra.mrb[56].mxu0 %v4345_v2  ;;  %4232 = vmatmul.mubr.bf16.gmra.mrb[56].mxu1 %v4346_v3 }
  0x98   : > { %4171 = vmatprep.mubr.bf16.mxu0 %v4347_v4  ;;  %4235 = vmatprep.mubr.bf16.mxu1 %v4348_v5 }
  0x9f   : > { %4172 = vmatmul.mubr.bf16.gmra.mrb[60].mxu0 %v4349_v6  ;;  %4236 = vmatmul.mubr.bf16.gmra.mrb[60].mxu1 %v4350_v7 }
  0xfa   : > { %v4113_v9 = vpop.f32.mrb[0].mxu0  ;;  %v4177_v10 = vpop.f32.mrb[0].mxu1 }
  0xfb   : > { %v2037_v11 = vadd.f32 %v4113_v9, %v4515_v8  ;;  %v2101_v12 = vadd.f32 %v4177_v10, %v4515_v8  ;;  %v1130_v13 = vpop.f32.mrb[1].mxu0  ;;  %v1386_v14 = vpop.f32.mrb[1].mxu1 }
  0xfc   : > { %v2035_v15 = vadd.f32 %v4515_v8, %v1130_v13  ;;  %v2099_v16 = vadd.f32 %v4515_v8, %v1386_v14  ;;  %v4114_v17 = vpop.f32.mrb[2].mxu0  ;;  %v4178_v18 = vpop.f32.mrb[2].mxu1 }
  0xfd   : > { %vm2165_vm0 = vcmp.gt.f32.partialorder %v2037_v11, 0.0  ;;  %v2293_v19 = vmul.f32 0.01, %v2037_v11  ;;  %vm2229_vm1 = vcmp.gt.f32.partialorder %v2101_v12, 0.0  ;;  %v2357_v20 = vmul.f32 0.01, %v2101_v12 }
  0xfe   : > { %vm2163_vm2 = vcmp.gt.f32.partialorder %v2035_v15, 0.0  ;;  %v2291_v21 = vmul.f32 0.01, %v2035_v15  ;;  %vm2227_vm3 = vcmp.gt.f32.partialorder %v2099_v16, 0.0  ;;  %v2355_v22 = vmul.f32 0.01, %v2099_v16 }
  0xff   : > { %v2038_v23 = vadd.f32 %v4114_v17, %v4515_v8  ;;  %v2102_v24 = vadd.f32 %v4178_v18, %v4515_v8  ;;  %v1133_v25 = vpop.f32.mrb[3].mxu0  ;;  %v1389_v26 = vpop.f32.mrb[3].mxu1  ;;  %v2421_v27 = vsel %vm2165_vm0, %v2037_v11, %v2293_v19  ;;  %v2485_v28 = vsel %vm2229_vm1, %v2101_v12, %v2357_v20 }
 0x100   : > { %v2036_v29 = vadd.f32 %v4515_v8, %v1133_v25  ;;  %v2100_v30 = vadd.f32 %v4515_v8, %v1389_v26  ;;  %v2419_v35 = vsel %vm2163_vm2, %v2035_v15, %v2291_v21  ;;  %v2483_v36 = vsel %vm2227_vm3, %v2099_v16, %v2355_v22 }
 0x101   : > { %vm2166_vm4 = vcmp.gt.f32.partialorder %v2038_v23, 0.0  ;;  %v2294_v31 = vmul.f32 0.01, %v2038_v23  ;;  %vm2230_vm5 = vcmp.gt.f32.partialorder %v2102_v24, 0.0  ;;  %v2358_v32 = vmul.f32 0.01, %v2102_v24 }
 0x102   : > { %vm2164_vm6 = vcmp.gt.f32.partialorder %v2036_v29, 0.0  ;;  %v2292_v33 = vmul.f32 0.01, %v2036_v29  ;;  %vm2228_vm7 = vcmp.gt.f32.partialorder %v2100_v30, 0.0  ;;  %v2356_v34 = vmul.f32 0.01, %v2100_v30 }
 0x103   : > { %v2422_v37 = vsel %vm2166_vm4, %v2038_v23, %v2294_v31  ;;  %v2486_v38 = vsel %vm2230_vm5, %v2102_v24, %v2358_v32  ;;  %v4117_v39 = vpop.f32.mrb[4].mxu0  ;;  %v4181_v40 = vpop.f32.mrb[4].mxu1 }
 0x104   : > { %v3648_v41 = vpack.c.bf16 %v2422_v37, %v2421_v27  ;;  %v3808_v42 = vpack.c.bf16 %v2486_v38, %v2485_v28  ;;  %v2420_v43 = vsel %vm2164_vm6, %v2036_v29, %v2292_v33  ;;  %v2484_v44 = vsel %vm2228_vm7, %v2100_v30, %v2356_v34  ;;  %v1146_v45 = vpop.f32.mrb[5].mxu0  ;;  %v1402_v46 = vpop.f32.mrb[5].mxu1 }
 0x105   : > { %v3643_v47 = vpack.c.bf16 %v2420_v43, %v2419_v35  ;;  %v3803_v48 = vpack.c.bf16 %v2484_v44, %v2483_v36  ;;  %v2041_v49 = vadd.f32 %v4117_v39, %v4515_v8  ;;  %v2105_v50 = vadd.f32 %v4181_v40, %v4515_v8  ;;  %v4118_v51 = vpop.f32.mrb[6].mxu0  ;;  %v4182_v52 = vpop.f32.mrb[6].mxu1 }
 0x106   : > { %3960 = vst [vmem:[%s4532_s17 + $0x8] sm:$0xff] %v3648_v41   ;;  %3992 = vst [vmem:[%s4532_s17 + $0x108] sm:$0xff] %v3808_v42   ;;  %v2039_v53 = vadd.f32 %v4515_v8, %v1146_v45  ;;  %v2103_v54 = vadd.f32 %v4515_v8, %v1402_v46  ;;  %v2042_v55 = vadd.f32 %v4118_v51, %v4515_v8  ;;  %v1149_v57 = vpop.f32.mrb[7].mxu0  ;;  %v1405_v58 = vpop.f32.mrb[7].mxu1 }
 0x107   : > { %v2106_v56 = vadd.f32 %v4182_v52, %v4515_v8  ;;  %3644 = vst [vmem:[%s4532_s17] sm:$0xff] %v3643_v47   ;;  %3991 = vst [vmem:[%s4532_s17 + $0x100] sm:$0xff] %v3803_v48   ;;  %vm2169_vm8 = vcmp.gt.f32.partialorder %v2041_v49, 0.0  ;;  %v2297_v59 = vmul.f32 0.01, %v2041_v49  ;;  %vm2233_vm9 = vcmp.gt.f32.partialorder %v2105_v50, 0.0 }
 0x108   : > { %v2361_v60 = vmul.f32 0.01, %v2105_v50  ;;  %vm2167_vm10 = vcmp.gt.f32.partialorder %v2039_v53, 0.0  ;;  %v2295_v61 = vmul.f32 0.01, %v2039_v53  ;;  %vm2231_vm11 = vcmp.gt.f32.partialorder %v2103_v54, 0.0 }
 0x109   : > { %v2359_v62 = vmul.f32 0.01, %v2103_v54  ;;  %v2425_v63 = vsel %vm2169_vm8, %v2041_v49, %v2297_v59  ;;  %vm2170_vm12 = vcmp.gt.f32.partialorder %v2042_v55, 0.0  ;;  %v2298_v1 = vmul.f32 0.01, %v2042_v55 }
 0x10a   : > { %v2489_v0 = vsel %vm2233_vm9, %v2105_v50, %v2361_v60  ;;  %v2423_v2 = vsel %vm2167_vm10, %v2039_v53, %v2295_v61  ;;  %vm2234_vm13 = vcmp.gt.f32.partialorder %v2106_v56, 0.0  ;;  %v2362_v4 = vmul.f32 0.01, %v2106_v56  ;;  %v4121_v5 = vpop.f32.mrb[8].mxu0  ;;  %v4185_v6 = vpop.f32.mrb[8].mxu1 }
 0x10b   : > { %v2487_v3 = vsel %vm2231_vm11, %v2103_v54, %v2359_v62  ;;  %v2426_v7 = vsel %vm2170_vm12, %v2042_v55, %v2298_v1  ;;  %v2040_v9 = vadd.f32 %v4515_v8, %v1149_v57  ;;  %v2104_v10 = vadd.f32 %v4515_v8, %v1405_v58  ;;  %v1162_v12 = vpop.f32.mrb[9].mxu0  ;;  %v1418_v13 = vpop.f32.mrb[9].mxu1 }
 0x10c   : > { %v2045_v11 = vadd.f32 %v4121_v5, %v4515_v8  ;;  %v3658_v14 = vpack.c.bf16 %v2426_v7, %v2425_v63  ;;  %v2490_v15 = vsel %vm2234_vm13, %v2106_v56, %v2362_v4  ;;  %v2109_v16 = vadd.f32 %v4185_v6, %v4515_v8  ;;  %v4122_v18 = vpop.f32.mrb[10].mxu0  ;;  %v4186_v19 = vpop.f32.mrb[10].mxu1 }
 0x10d   : > { %v2043_v17 = vadd.f32 %v4515_v8, %v1162_v12  ;;  %v3818_v20 = vpack.c.bf16 %v2490_v15, %v2489_v0  ;;  %vm2168_vm14 = vcmp.gt.f32.partialorder %v2040_v9, 0.0  ;;  %v2296_v21 = vmul.f32 0.01, %v2040_v9  ;;  %v1165_v22 = vpop.f32.mrb[11].mxu0  ;;  %v1421_v23 = vpop.f32.mrb[11].mxu1 }
 0x10e   : > { %vm2232_vm15 = vcmp.gt.f32.partialorder %v2104_v10, 0.0  ;;  %3962 = vst [vmem:[%s4532_s17 + $0x18] sm:$0xff] %v3658_v14   ;;  %v2360_v24 = vmul.f32 0.01, %v2104_v10  ;;  %vm2173_vm0 = vcmp.gt.f32.partialorder %v2045_v11, 0.0  ;;  %vm2237_vm1 = vcmp.gt.f32.partialorder %v2109_v16, 0.0 }
 0x10f   : > { %v2301_v25 = vmul.f32 0.01, %v2045_v11  ;;  %3994 = vst [vmem:[%s4532_s17 + $0x118] sm:$0xff] %v3818_v20   ;;  %v2424_v26 = vsel %vm2168_vm14, %v2040_v9, %v2296_v21  ;;  %v2365_v27 = vmul.f32 0.01, %v2109_v16  ;;  %vm2171_vm2 = vcmp.gt.f32.partialorder %v2043_v17, 0.0 }
 0x110   : > { %v2299_v28 = vmul.f32 0.01, %v2043_v17  ;;  %v3653_v29 = vpack.c.bf16 %v2424_v26, %v2423_v2  ;;  %v2488_v30 = vsel %vm2232_vm15, %v2104_v10, %v2360_v24  ;;  %v2107_v32 = vadd.f32 %v4515_v8, %v1418_v13 }
 0x111   : > { %v2429_v31 = vsel %vm2173_vm0, %v2045_v11, %v2301_v25  ;;  %v3813_v33 = vpack.c.bf16 %v2488_v30, %v2487_v3  ;;  %v2493_v34 = vsel %vm2237_vm1, %v2109_v16, %v2365_v27  ;;  %v2046_v36 = vadd.f32 %v4122_v18, %v4515_v8 }
 0x112   : > { %v2427_v35 = vsel %vm2171_vm2, %v2043_v17, %v2299_v28  ;;  %3961 = vst [vmem:[%s4532_s17 + $0x10] sm:$0xff] %v3653_v29   ;;  %vm2235_vm3 = vcmp.gt.f32.partialorder %v2107_v32, 0.0  ;;  %v2363_v37 = vmul.f32 0.01, %v2107_v32  ;;  %v2110_v38 = vadd.f32 %v4186_v19, %v4515_v8  ;;  %v4125_v40 = vpop.f32.mrb[12].mxu0  ;;  %v4189_v41 = vpop.f32.mrb[12].mxu1 }
 0x113   : > { %v2044_v39 = vadd.f32 %v4515_v8, %v1165_v22  ;;  %3993 = vst [vmem:[%s4532_s17 + $0x110] sm:$0xff] %v3813_v33   ;;  %vm2174_vm4 = vcmp.gt.f32.partialorder %v2046_v36, 0.0  ;;  %v2302_v42 = vmul.f32 0.01, %v2046_v36  ;;  %v2108_v43 = vadd.f32 %v4515_v8, %v1421_v23  ;;  %v1178_v45 = vpop.f32.mrb[13].mxu0  ;;  %v1434_v46 = vpop.f32.mrb[13].mxu1 }
 0x114   : > { %v2049_v44 = vadd.f32 %v4125_v40, %v4515_v8  ;;  %v2491_v47 = vsel %vm2235_vm3, %v2107_v32, %v2363_v37  ;;  %vm2238_vm5 = vcmp.gt.f32.partialorder %v2110_v38, 0.0  ;;  %v2366_v48 = vmul.f32 0.01, %v2110_v38  ;;  %v4126_v49 = vpop.f32.mrb[14].mxu0  ;;  %v4190_v50 = vpop.f32.mrb[14].mxu1 }
 0x115   : > { %vm2172_vm6 = vcmp.gt.f32.partialorder %v2044_v39, 0.0  ;;  %v2430_v51 = vsel %vm2174_vm4, %v2046_v36, %v2302_v42  ;;  %v2300_v52 = vmul.f32 0.01, %v2044_v39  ;;  %vm2236_vm7 = vcmp.gt.f32.partialorder %v2108_v43, 0.0  ;;  %v1181_v54 = vpop.f32.mrb[15].mxu0  ;;  %v1437_v58 = vpop.f32.mrb[15].mxu1 }
 0x116   : > { %v2364_v53 = vmul.f32 0.01, %v2108_v43  ;;  %v3668_v55 = vpack.c.bf16 %v2430_v51, %v2429_v31  ;;  %v2494_v56 = vsel %vm2238_vm5, %v2110_v38, %v2366_v48  ;;  %vm2177_vm8 = vcmp.gt.f32.partialorder %v2049_v44, 0.0 }
 0x117   : > { %v2305_v57 = vmul.f32 0.01, %v2049_v44  ;;  %v3828_v59 = vpack.c.bf16 %v2494_v56, %v2493_v34  ;;  %v2428_v60 = vsel %vm2172_vm6, %v2044_v39, %v2300_v52  ;;  %v2113_v62 = vadd.f32 %v4189_v41, %v4515_v8 }
 0x118   : > { %v2492_v61 = vsel %vm2236_vm7, %v2108_v43, %v2364_v53  ;;  %3964 = vst [vmem:[%s4532_s17 + $0x28] sm:$0xff] %v3668_v55   ;;  %v3663_v63 = vpack.c.bf16 %v2428_v60, %v2427_v35  ;;  %v2047_v2 = vadd.f32 %v4515_v8, %v1178_v45  ;;  %v2111_v4 = vadd.f32 %v4515_v8, %v1434_v46 }
 0x119   : > { %v3823_v0 = vpack.c.bf16 %v2492_v61, %v2491_v47  ;;  %v2433_v1 = vsel %vm2177_vm8, %v2049_v44, %v2305_v57  ;;  %3996 = vst [vmem:[%s4532_s17 + $0x128] sm:$0xff] %v3828_v59   ;;  %vm2241_vm9 = vcmp.gt.f32.partialorder %v2113_v62, 0.0  ;;  %v2369_v3 = vmul.f32 0.01, %v2113_v62 }
 0x11a   : > { %v2050_v5 = vadd.f32 %v4126_v49, %v4515_v8  ;;  %3963 = vst [vmem:[%s4532_s17 + $0x20] sm:$0xff] %v3663_v63   ;;  %vm2175_vm10 = vcmp.gt.f32.partialorder %v2047_v2, 0.0  ;;  %v2303_v6 = vmul.f32 0.01, %v2047_v2  ;;  %v2114_v7 = vadd.f32 %v4190_v50, %v4515_v8  ;;  %v4129_v10 = vpop.f32.mrb[16].mxu0  ;;  %v4193_v11 = vpop.f32.mrb[16].mxu1 }
 0x11b   : > { %3995 = vst [vmem:[%s4532_s17 + $0x120] sm:$0xff] %v3823_v0   ;;  %v2048_v9 = vadd.f32 %v4515_v8, %v1181_v54  ;;  %v2497_v12 = vsel %vm2241_vm9, %v2113_v62, %v2369_v3  ;;  %vm2239_vm11 = vcmp.gt.f32.partialorder %v2111_v4, 0.0  ;;  %v2367_v13 = vmul.f32 0.01, %v2111_v4  ;;  %v1194_v14 = vpop.f32.mrb[17].mxu0  ;;  %v1450_v15 = vpop.f32.mrb[17].mxu1 }
 0x11c   : > { %vm2178_vm12 = vcmp.gt.f32.partialorder %v2050_v5, 0.0  ;;  %v2431_v16 = vsel %vm2175_vm10, %v2047_v2, %v2303_v6  ;;  %v2306_v17 = vmul.f32 0.01, %v2050_v5  ;;  %vm2242_vm13 = vcmp.gt.f32.partialorder %v2114_v7, 0.0  ;;  %v4130_v19 = vpop.f32.mrb[18].mxu0  ;;  %v4194_v23 = vpop.f32.mrb[18].mxu1 }
 0x11d   : > { %v2370_v18 = vmul.f32 0.01, %v2114_v7  ;;  %v2495_v20 = vsel %vm2239_vm11, %v2111_v4, %v2367_v13  ;;  %vm2176_vm14 = vcmp.gt.f32.partialorder %v2048_v9, 0.0  ;;  %v2304_v21 = vmul.f32 0.01, %v2048_v9  ;;  %v1197_v24 = vpop.f32.mrb[19].mxu0 }
 0x11e   : > { %v2112_v22 = vadd.f32 %v4515_v8, %v1437_v58  ;;  %v2434_v25 = vsel %vm2178_vm12, %v2050_v5, %v2306_v17  ;;  %v2053_v27 = vadd.f32 %v4129_v10, %v4515_v8  ;;  %v2117_v28 = vadd.f32 %v4193_v11, %v4515_v8  ;;  %v1453_v29 = vpop.f32.mrb[19].mxu1 }
 0x11f   : > { %v2498_v26 = vsel %vm2242_vm13, %v2114_v7, %v2370_v18  ;;  %v3678_v30 = vpack.c.bf16 %v2434_v25, %v2433_v1  ;;  %v2432_v32 = vsel %vm2176_vm14, %v2048_v9, %v2304_v21  ;;  %v2051_v37 = vadd.f32 %v4515_v8, %v1194_v14 }
 0x120   : > { %v3838_v31 = vpack.c.bf16 %v2498_v26, %v2497_v12  ;;  %vm2240_vm15 = vcmp.gt.f32.partialorder %v2112_v22, 0.0  ;;  %v3673_v33 = vpack.c.bf16 %v2432_v32, %v2431_v16  ;;  %v2368_v34 = vmul.f32 0.01, %v2112_v22 }
 0x121   : > { %vm2181_vm0 = vcmp.gt.f32.partialorder %v2053_v27, 0.0  ;;  %v2309_v35 = vmul.f32 0.01, %v2053_v27  ;;  %3966 = vst [vmem:[%s4532_s17 + $0x38] sm:$0xff] %v3678_v30   ;;  %vm2245_vm1 = vcmp.gt.f32.partialorder %v2117_v28, 0.0  ;;  %v2115_v38 = vadd.f32 %v4515_v8, %v1450_v15 }
 0x122   : > { %3998 = vst [vmem:[%s4532_s17 + $0x138] sm:$0xff] %v3838_v31   ;;  %v2373_v36 = vmul.f32 0.01, %v2117_v28  ;;  %3965 = vst [vmem:[%s4532_s17 + $0x30] sm:$0xff] %v3673_v33   ;;  %v2496_v39 = vsel %vm2240_vm15, %v2112_v22, %v2368_v34  ;;  %v2054_v41 = vadd.f32 %v4130_v19, %v4515_v8  ;;  %v2118_v42 = vadd.f32 %v4194_v23, %v4515_v8  ;;  %v4133_v43 = vpop.f32.mrb[20].mxu0  ;;  %v4197_v44 = vpop.f32.mrb[20].mxu1 }
 0x123   : > { %v2437_v40 = vsel %vm2181_vm0, %v2053_v27, %v2309_v35  ;;  %v3833_v45 = vpack.c.bf16 %v2496_v39, %v2495_v20  ;;  %vm2179_vm2 = vcmp.gt.f32.partialorder %v2051_v37, 0.0  ;;  %v2307_v47 = vmul.f32 0.01, %v2051_v37  ;;  %v1210_v48 = vpop.f32.mrb[21].mxu0  ;;  %v1466_v49 = vpop.f32.mrb[21].mxu1 }
 0x124   : > { %v2501_v46 = vsel %vm2245_vm1, %v2117_v28, %v2373_v36  ;;  %vm2243_vm3 = vcmp.gt.f32.partialorder %v2115_v38, 0.0  ;;  %v2371_v50 = vmul.f32 0.01, %v2115_v38  ;;  %vm2182_vm4 = vcmp.gt.f32.partialorder %v2054_v41, 0.0  ;;  %v4134_v55 = vpop.f32.mrb[22].mxu0  ;;  %v4198_v56 = vpop.f32.mrb[22].mxu1 }
 0x125   : > { %v2310_v51 = vmul.f32 0.01, %v2054_v41  ;;  %3997 = vst [vmem:[%s4532_s17 + $0x130] sm:$0xff] %v3833_v45   ;;  %v2435_v52 = vsel %vm2179_vm2, %v2051_v37, %v2307_v47  ;;  %vm2246_vm5 = vcmp.gt.f32.partialorder %v2118_v42, 0.0  ;;  %v2374_v53 = vmul.f32 0.01, %v2118_v42 }
 0x126   : > { %v2052_v54 = vadd.f32 %v4515_v8, %v1197_v24  ;;  %v2499_v57 = vsel %vm2243_vm3, %v2115_v38, %v2371_v50  ;;  %v2116_v59 = vadd.f32 %v4515_v8, %v1453_v29  ;;  %v2057_v60 = vadd.f32 %v4133_v43, %v4515_v8  ;;  %v1213_v61 = vpop.f32.mrb[23].mxu0  ;;  %v1469_v62 = vpop.f32.mrb[23].mxu1 }
 0x127   : > { %v2438_v58 = vsel %vm2182_vm4, %v2054_v41, %v2310_v51  ;;  %v2502_v0 = vsel %vm2246_vm5, %v2118_v42, %v2374_v53  ;;  %v2121_v6 = vadd.f32 %v4197_v44, %v4515_v8  ;;  %v2055_v7 = vadd.f32 %v4515_v8, %v1210_v48 }
 0x128   : > { %v3688_v63 = vpack.c.bf16 %v2438_v58, %v2437_v40  ;;  %vm2180_vm6 = vcmp.gt.f32.partialorder %v2052_v54, 0.0  ;;  %v2308_v1 = vmul.f32 0.01, %v2052_v54  ;;  %v3848_v2 = vpack.c.bf16 %v2502_v0, %v2501_v46 }
 0x129   : > { %vm2244_vm7 = vcmp.gt.f32.partialorder %v2116_v59, 0.0  ;;  %v2372_v3 = vmul.f32 0.01, %v2116_v59  ;;  %vm2185_vm8 = vcmp.gt.f32.partialorder %v2057_v60, 0.0  ;;  %v2313_v5 = vmul.f32 0.01, %v2057_v60 }
 0x12a   : > { %3968 = vst [vmem:[%s4532_s17 + $0x48] sm:$0xff] %v3688_v63   ;;  %v2436_v4 = vsel %vm2180_vm6, %v2052_v54, %v2308_v1  ;;  %4000 = vst [vmem:[%s4532_s17 + $0x148] sm:$0xff] %v3848_v2   ;;  %v2119_v11 = vadd.f32 %v4515_v8, %v1466_v49  ;;  %v2058_v12 = vadd.f32 %v4134_v55, %v4515_v8  ;;  %v4137_v13 = vpop.f32.mrb[24].mxu0  ;;  %v4201_v14 = vpop.f32.mrb[24].mxu1  ;;  %vm2249_vm9 = vcmp.gt.f32.partialorder %v2121_v6, 0.0 }
 0x12b   : > { %v3683_v9 = vpack.c.bf16 %v2436_v4, %v2435_v52  ;;  %v2500_v10 = vsel %vm2244_vm7, %v2116_v59, %v2372_v3  ;;  %v2441_v16 = vsel %vm2185_vm8, %v2057_v60, %v2313_v5  ;;  %v2377_v17 = vmul.f32 0.01, %v2121_v6  ;;  %v1226_v18 = vpop.f32.mrb[25].mxu0  ;;  %v1482_v19 = vpop.f32.mrb[25].mxu1 }
 0x12c   : > { %v3843_v15 = vpack.c.bf16 %v2500_v10, %v2499_v57  ;;  %vm2183_vm10 = vcmp.gt.f32.partialorder %v2055_v7, 0.0  ;;  %v2311_v20 = vmul.f32 0.01, %v2055_v7  ;;  %vm2247_vm11 = vcmp.gt.f32.partialorder %v2119_v11, 0.0  ;;  %v4138_v25 = vpop.f32.mrb[26].mxu0  ;;  %v4202_v26 = vpop.f32.mrb[26].mxu1 }
 0x12d   : > { %3967 = vst [vmem:[%s4532_s17 + $0x40] sm:$0xff] %v3683_v9   ;;  %v2375_v21 = vmul.f32 0.01, %v2119_v11  ;;  %v2505_v22 = vsel %vm2249_vm9, %v2121_v6, %v2377_v17  ;;  %vm2186_vm12 = vcmp.gt.f32.partialorder %v2058_v12, 0.0  ;;  %v2314_v23 = vmul.f32 0.01, %v2058_v12 }
 0x12e   : > { %3999 = vst [vmem:[%s4532_s17 + $0x140] sm:$0xff] %v3843_v15   ;;  %v2122_v24 = vadd.f32 %v4198_v56, %v4515_v8  ;;  %v2439_v27 = vsel %vm2183_vm10, %v2055_v7, %v2311_v20  ;;  %v2056_v29 = vadd.f32 %v4515_v8, %v1213_v61  ;;  %v2120_v30 = vadd.f32 %v4515_v8, %v1469_v62  ;;  %v1229_v31 = vpop.f32.mrb[27].mxu0  ;;  %v1485_v32 = vpop.f32.mrb[27].mxu1 }
 0x12f   : > { %v2503_v28 = vsel %vm2247_vm11, %v2119_v11, %v2375_v21  ;;  %v2442_v33 = vsel %vm2186_vm12, %v2058_v12, %v2314_v23  ;;  %v2061_v35 = vadd.f32 %v4137_v13, %v4515_v8  ;;  %v2125_v43 = vadd.f32 %v4201_v14, %v4515_v8 }
 0x130   : > { %vm2250_vm13 = vcmp.gt.f32.partialorder %v2122_v24, 0.0  ;;  %v2378_v34 = vmul.f32 0.01, %v2122_v24  ;;  %v3698_v36 = vpack.c.bf16 %v2442_v33, %v2441_v16  ;;  %vm2184_vm14 = vcmp.gt.f32.partialorder %v2056_v29, 0.0 }
 0x131   : > { %v2312_v37 = vmul.f32 0.01, %v2056_v29  ;;  %vm2248_vm15 = vcmp.gt.f32.partialorder %v2120_v30, 0.0  ;;  %v2376_v39 = vmul.f32 0.01, %v2120_v30  ;;  %vm2189_vm0 = vcmp.gt.f32.partialorder %v2061_v35, 0.0 }
 0x132   : > { %v2506_v38 = vsel %vm2250_vm13, %v2122_v24, %v2378_v34  ;;  %v2317_v40 = vmul.f32 0.01, %v2061_v35  ;;  %3970 = vst [vmem:[%s4532_s17 + $0x58] sm:$0xff] %v3698_v36   ;;  %v2059_v44 = vadd.f32 %v4515_v8, %v1226_v18  ;;  %v4141_v45 = vpop.f32.mrb[28].mxu0  ;;  %v4205_v46 = vpop.f32.mrb[28].mxu1  ;;  %v2123_v50 = vadd.f32 %v4515_v8, %v1482_v19 }
 0x133   : > { %v3858_v41 = vpack.c.bf16 %v2506_v38, %v2505_v22  ;;  %v2440_v42 = vsel %vm2184_vm14, %v2056_v29, %v2312_v37  ;;  %v2504_v48 = vsel %vm2248_vm15, %v2120_v30, %v2376_v39  ;;  %v1242_v51 = vpop.f32.mrb[29].mxu0  ;;  %v1498_v52 = vpop.f32.mrb[29].mxu1  ;;  %vm2253_vm1 = vcmp.gt.f32.partialorder %v2125_v43, 0.0 }
 0x134   : > { %v3693_v47 = vpack.c.bf16 %v2440_v42, %v2439_v27  ;;  %v2445_v49 = vsel %vm2189_vm0, %v2061_v35, %v2317_v40  ;;  %v3853_v53 = vpack.c.bf16 %v2504_v48, %v2503_v28  ;;  %v2381_v54 = vmul.f32 0.01, %v2125_v43  ;;  %v4142_v55 = vpop.f32.mrb[30].mxu0  ;;  %v4206_v56 = vpop.f32.mrb[30].mxu1 }
 0x135   : > { %4002 = vst [vmem:[%s4532_s17 + $0x158] sm:$0xff] %v3858_v41   ;;  %vm2187_vm2 = vcmp.gt.f32.partialorder %v2059_v44, 0.0  ;;  %v2315_v57 = vmul.f32 0.01, %v2059_v44  ;;  %vm2251_vm3 = vcmp.gt.f32.partialorder %v2123_v50, 0.0  ;;  %v2062_v59 = vadd.f32 %v4138_v25, %v4515_v8  ;;  %v1245_v60 = vpop.f32.mrb[31].mxu0 }
 0x136   : > { %3969 = vst [vmem:[%s4532_s17 + $0x50] sm:$0xff] %v3693_v47   ;;  %v2379_v58 = vmul.f32 0.01, %v2123_v50  ;;  %4001 = vst [vmem:[%s4532_s17 + $0x150] sm:$0xff] %v3853_v53   ;;  %v2509_v61 = vsel %vm2253_vm1, %v2125_v43, %v2381_v54  ;;  %v2126_v62 = vadd.f32 %v4202_v26, %v4515_v8  ;;  %v2060_v63 = vadd.f32 %v4515_v8, %v1229_v31  ;;  %v1501_v1 = vpop.f32.mrb[31].mxu1 }
 0x137   : > { %v2124_v0 = vadd.f32 %v4515_v8, %v1485_v32  ;;  %v2443_v2 = vsel %vm2187_vm2, %v2059_v44, %v2315_v57  ;;  %vm2190_vm4 = vcmp.gt.f32.partialorder %v2062_v59, 0.0  ;;  %v2318_v4 = vmul.f32 0.01, %v2062_v59 }
 0x138   : > { %v2507_v3 = vsel %vm2251_vm3, %v2123_v50, %v2379_v58  ;;  %vm2254_vm5 = vcmp.gt.f32.partialorder %v2126_v62, 0.0  ;;  %v2382_v5 = vmul.f32 0.01, %v2126_v62  ;;  %vm2188_vm6 = vcmp.gt.f32.partialorder %v2060_v63, 0.0 }
 0x139   : > { %v2316_v6 = vmul.f32 0.01, %v2060_v63  ;;  %v2446_v7 = vsel %vm2190_vm4, %v2062_v59, %v2318_v4  ;;  %vm2252_vm7 = vcmp.gt.f32.partialorder %v2124_v0, 0.0  ;;  %v2380_v9 = vmul.f32 0.01, %v2124_v0 }
 0x13a   : > { %v2065_v10 = vadd.f32 %v4141_v45, %v4515_v8  ;;  %v3708_v11 = vpack.c.bf16 %v2446_v7, %v2445_v49  ;;  %v2510_v12 = vsel %vm2254_vm5, %v2126_v62, %v2382_v5  ;;  %v2129_v14 = vadd.f32 %v4205_v46, %v4515_v8  ;;  %v4145_v15 = vpop.f32.mrb[32].mxu0  ;;  %v4209_v16 = vpop.f32.mrb[32].mxu1 }
 0x13b   : > { %v2444_v13 = vsel %vm2188_vm6, %v2060_v63, %v2316_v6  ;;  %v3868_v17 = vpack.c.bf16 %v2510_v12, %v2509_v61  ;;  %v2508_v19 = vsel %vm2252_vm7, %v2124_v0, %v2380_v9  ;;  %v1258_v20 = vpop.f32.mrb[33].mxu0  ;;  %v1514_v21 = vpop.f32.mrb[33].mxu1  ;;  %v2063_v26 = vadd.f32 %v4515_v8, %v1242_v51 }
 0x13c   : > { %v3703_v18 = vpack.c.bf16 %v2444_v13, %v2443_v2  ;;  %vm2193_vm8 = vcmp.gt.f32.partialorder %v2065_v10, 0.0  ;;  %3972 = vst [vmem:[%s4532_s17 + $0x68] sm:$0xff] %v3708_v11   ;;  %v3863_v22 = vpack.c.bf16 %v2508_v19, %v2507_v3  ;;  %v2321_v23 = vmul.f32 0.01, %v2065_v10  ;;  %v4146_v25 = vpop.f32.mrb[34].mxu0  ;;  %v4210_v30 = vpop.f32.mrb[34].mxu1 }
 0x13d   : > { %vm2257_vm9 = vcmp.gt.f32.partialorder %v2129_v14, 0.0  ;;  %v2385_v24 = vmul.f32 0.01, %v2129_v14  ;;  %4004 = vst [vmem:[%s4532_s17 + $0x168] sm:$0xff] %v3868_v17   ;;  %v2127_v27 = vadd.f32 %v4515_v8, %v1498_v52  ;;  %v2066_v28 = vadd.f32 %v4142_v55, %v4515_v8  ;;  %v1261_v31 = vpop.f32.mrb[35].mxu0  ;;  %v1517_v36 = vpop.f32.mrb[35].mxu1 }
 0x13e   : > { %3971 = vst [vmem:[%s4532_s17 + $0x60] sm:$0xff] %v3703_v18   ;;  %v2130_v29 = vadd.f32 %v4206_v56, %v4515_v8  ;;  %4003 = vst [vmem:[%s4532_s17 + $0x160] sm:$0xff] %v3863_v22   ;;  %v2449_v32 = vsel %vm2193_vm8, %v2065_v10, %v2321_v23  ;;  %v2064_v34 = vadd.f32 %v4515_v8, %v1245_v60  ;;  %vm2191_vm10 = vcmp.gt.f32.partialorder %v2063_v26, 0.0 }
 0x13f   : > { %v2513_v33 = vsel %vm2257_vm9, %v2129_v14, %v2385_v24  ;;  %v2128_v35 = vadd.f32 %v4515_v8, %v1501_v1  ;;  %v2319_v37 = vmul.f32 0.01, %v2063_v26  ;;  %vm2255_vm11 = vcmp.gt.f32.partialorder %v2127_v27, 0.0 }
 0x140   : > { %v2383_v38 = vmul.f32 0.01, %v2127_v27  ;;  %vm2194_vm12 = vcmp.gt.f32.partialorder %v2066_v28, 0.0  ;;  %v2322_v39 = vmul.f32 0.01, %v2066_v28  ;;  %vm2258_vm13 = vcmp.gt.f32.partialorder %v2130_v29, 0.0 }
 0x141   : > { %v2386_v40 = vmul.f32 0.01, %v2130_v29  ;;  %v2447_v41 = vsel %vm2191_vm10, %v2063_v26, %v2319_v37  ;;  %vm2192_vm14 = vcmp.gt.f32.partialorder %v2064_v34, 0.0  ;;  %v2320_v43 = vmul.f32 0.01, %v2064_v34 }
 0x142   : > { %v2511_v42 = vsel %vm2255_vm11, %v2127_v27, %v2383_v38  ;;  %v2450_v44 = vsel %vm2194_vm12, %v2066_v28, %v2322_v39  ;;  %vm2256_vm15 = vcmp.gt.f32.partialorder %v2128_v35, 0.0  ;;  %v2384_v46 = vmul.f32 0.01, %v2128_v35  ;;  %v4149_v47 = vpop.f32.mrb[36].mxu0  ;;  %v4213_v48 = vpop.f32.mrb[36].mxu1 }
 0x143   : > { %v2514_v45 = vsel %vm2258_vm13, %v2130_v29, %v2386_v40  ;;  %v3718_v49 = vpack.c.bf16 %v2450_v44, %v2449_v32  ;;  %v2448_v51 = vsel %vm2192_vm14, %v2064_v34, %v2320_v43  ;;  %v2069_v52 = vadd.f32 %v4145_v15, %v4515_v8  ;;  %v4620_v53 = vpop.f32.mrb[37].mxu0  ;;  %v4622_v54 = vpop.f32.mrb[37].mxu1 }
 0x144   : > { %v3878_v50 = vpack.c.bf16 %v2514_v45, %v2513_v33  ;;  %v3713_v55 = vpack.c.bf16 %v2448_v51, %v2447_v41  ;;  %v2512_v56 = vsel %vm2256_vm15, %v2128_v35, %v2384_v46  ;;  %v2133_v57 = vadd.f32 %v4209_v16, %v4515_v8  ;;  %v4150_v59 = vpop.f32.mrb[38].mxu0  ;;  %v4214_v60 = vpop.f32.mrb[38].mxu1 }
 0x145   : > { %v2067_v58 = vadd.f32 %v4515_v8, %v1258_v20  ;;  %3974 = vst [vmem:[%s4532_s17 + $0x78] sm:$0xff] %v3718_v49   ;;  %v3873_v61 = vpack.c.bf16 %v2512_v56, %v2511_v42  ;;  %vm2197_vm0 = vcmp.gt.f32.partialorder %v2069_v52, 0.0  ;;  %v2325_v62 = vmul.f32 0.01, %v2069_v52  ;;  %v1277_v0 = vpop.f32.mrb[39].mxu0  ;;  %v1533_v1 = vpop.f32.mrb[39].mxu1 }
 0x146   : > { %4006 = vst [vmem:[%s4532_s17 + $0x178] sm:$0xff] %v3878_v50   ;;  %v2131_v63 = vadd.f32 %v4515_v8, %v1514_v21  ;;  %3973 = vst [vmem:[%s4532_s17 + $0x70] sm:$0xff] %v3713_v55   ;;  %vm2261_vm1 = vcmp.gt.f32.partialorder %v2133_v57, 0.0  ;;  %v2389_v2 = vmul.f32 0.01, %v2133_v57  ;;  %v2070_v6 = vadd.f32 %v4146_v25, %v4515_v8 }
 0x147   : > { %vm2195_vm2 = vcmp.gt.f32.partialorder %v2067_v58, 0.0  ;;  %v2323_v3 = vmul.f32 0.01, %v2067_v58  ;;  %4005 = vst [vmem:[%s4532_s17 + $0x170] sm:$0xff] %v3873_v61   ;;  %v2453_v4 = vsel %vm2197_vm0, %v2069_v52, %v2325_v62  ;;  %v2134_v10 = vadd.f32 %v4210_v30, %v4515_v8 }
 0x148   : > { %vm2259_vm3 = vcmp.gt.f32.partialorder %v2131_v63, 0.0  ;;  %v2387_v5 = vmul.f32 0.01, %v2131_v63  ;;  %v2517_v7 = vsel %vm2261_vm1, %v2133_v57, %v2389_v2  ;;  %v2068_v11 = vadd.f32 %v4515_v8, %v1261_v31 }
 0x149   : > { %v2451_v9 = vsel %vm2195_vm2, %v2067_v58, %v2323_v3  ;;  %vm2198_vm4 = vcmp.gt.f32.partialorder %v2070_v6, 0.0  ;;  %v2326_v13 = vmul.f32 0.01, %v2070_v6  ;;  %v2132_v14 = vadd.f32 %v4515_v8, %v1517_v36 }
 0x14a   : > { %v2515_v12 = vsel %vm2259_vm3, %v2131_v63, %v2387_v5  ;;  %vm2262_vm5 = vcmp.gt.f32.partialorder %v2134_v10, 0.0  ;;  %v2390_v15 = vmul.f32 0.01, %v2134_v10  ;;  %vm2196_vm6 = vcmp.gt.f32.partialorder %v2068_v11, 0.0  ;;  %v4153_v20 = vpop.f32.mrb[40].mxu0  ;;  %v4217_v21 = vpop.f32.mrb[40].mxu1 }
 0x14b   : > { %v2324_v16 = vmul.f32 0.01, %v2068_v11  ;;  %v2454_v17 = vsel %vm2198_vm4, %v2070_v6, %v2326_v13  ;;  %vm2260_vm7 = vcmp.gt.f32.partialorder %v2132_v14, 0.0  ;;  %v2388_v18 = vmul.f32 0.01, %v2132_v14  ;;  %v1290_v26 = vpop.f32.mrb[41].mxu0 }
 0x14c   : > { %v2073_v19 = vadd.f32 %v4149_v47, %v4515_v8  ;;  %v3728_v22 = vpack.c.bf16 %v2454_v17, %v2453_v4  ;;  %v2518_v23 = vsel %vm2262_vm5, %v2134_v10, %v2390_v15  ;;  %v2137_v25 = vadd.f32 %v4213_v48, %v4515_v8  ;;  %v1546_v27 = vpop.f32.mrb[41].mxu1  ;;  %v4637_v31 = vpop.f32.mrb[42].mxu0 }
 0x14d   : > { %v2452_v24 = vsel %vm2196_vm6, %v2068_v11, %v2324_v16  ;;  %v3888_v28 = vpack.c.bf16 %v2518_v23, %v2517_v7  ;;  %v2516_v30 = vsel %vm2260_vm7, %v2132_v14, %v2388_v18  ;;  %v4639_v32 = vpop.f32.mrb[42].mxu1  ;;  %v4642_v36 = vpop.f32.mrb[43].mxu0  ;;  %v2071_v37 = vadd.f32 %v4515_v8, %v4620_v53 }
 0x14e   : > { %v3723_v29 = vpack.c.bf16 %v2452_v24, %v2451_v9  ;;  %vm2201_vm8 = vcmp.gt.f32.partialorder %v2073_v19, 0.0  ;;  %3976 = vst [vmem:[%s4532_s17 + $0x88] sm:$0xff] %v3728_v22   ;;  %v3883_v33 = vpack.c.bf16 %v2516_v30, %v2515_v12  ;;  %v2329_v34 = vmul.f32 0.01, %v2073_v19  ;;  %v4652_v41 = vpop.f32.mrb[43].mxu1 }
 0x14f   : > { %vm2265_vm9 = vcmp.gt.f32.partialorder %v2137_v25, 0.0  ;;  %v2393_v35 = vmul.f32 0.01, %v2137_v25  ;;  %4008 = vst [vmem:[%s4532_s17 + $0x188] sm:$0xff] %v3888_v28   ;;  %v2135_v38 = vadd.f32 %v4515_v8, %v4622_v54  ;;  %v2074_v39 = vadd.f32 %v4150_v59, %v4515_v8 }
 0x150   : > { %3975 = vst [vmem:[%s4532_s17 + $0x80] sm:$0xff] %v3723_v29   ;;  %v2138_v40 = vadd.f32 %v4214_v60, %v4515_v8  ;;  %4007 = vst [vmem:[%s4532_s17 + $0x180] sm:$0xff] %v3883_v33   ;;  %v2457_v42 = vsel %vm2201_vm8, %v2073_v19, %v2329_v34  ;;  %v2072_v44 = vadd.f32 %v4515_v8, %v1277_v0  ;;  %vm2199_vm10 = vcmp.gt.f32.partialorder %v2071_v37, 0.0  ;;  %v4683_v19 = vld [vmem:[%s4867_s2] ss:$0 sm:$0xff] }
 0x151   : > { %v2521_v43 = vsel %vm2265_vm9, %v2137_v25, %v2393_v35  ;;  %v2136_v45 = vadd.f32 %v4515_v8, %v1533_v1  ;;  %v2327_v46 = vmul.f32 0.01, %v2071_v37  ;;  %vm2263_vm11 = vcmp.gt.f32.partialorder %v2135_v38, 0.0 }
 0x152   : > { %v2391_v47 = vmul.f32 0.01, %v2135_v38  ;;  %vm2202_vm12 = vcmp.gt.f32.partialorder %v2074_v39, 0.0  ;;  %v2330_v48 = vmul.f32 0.01, %v2074_v39  ;;  %vm2266_vm13 = vcmp.gt.f32.partialorder %v2138_v40, 0.0 }
 0x153   : > { %v2394_v49 = vmul.f32 0.01, %v2138_v40  ;;  %v2455_v50 = vsel %vm2199_vm10, %v2071_v37, %v2327_v46  ;;  %vm2200_vm14 = vcmp.gt.f32.partialorder %v2072_v44, 0.0  ;;  %v2328_v52 = vmul.f32 0.01, %v2072_v44  ;;  %v4157_v53 = vpop.f32.mrb[44].mxu0 }
 0x154   : > { %v2519_v51 = vsel %vm2263_vm11, %v2135_v38, %v2391_v47  ;;  %v4221_v54 = vpop.f32.mrb[44].mxu1  ;;  %v2458_v55 = vsel %vm2202_vm12, %v2074_v39, %v2330_v48  ;;  %vm2264_vm15 = vcmp.gt.f32.partialorder %v2136_v45, 0.0  ;;  %v2392_v57 = vmul.f32 0.01, %v2136_v45  ;;  %v4658_v58 = vpop.f32.mrb[45].mxu0 }
 0x155   : > { %v2522_v56 = vsel %vm2266_vm13, %v2138_v40, %v2394_v49  ;;  %v4660_v59 = vpop.f32.mrb[45].mxu1  ;;  %v3738_v60 = vpack.c.bf16 %v2458_v55, %v2457_v42  ;;  %v2456_v62 = vsel %vm2200_vm14, %v2072_v44, %v2328_v52  ;;  %v2077_v63 = vadd.f32 %v4153_v20, %v4515_v8  ;;  %v4663_v0 = vpop.f32.mrb[46].mxu0 }
 0x156   : > { %v3898_v61 = vpack.c.bf16 %v2522_v56, %v2521_v43  ;;  %v4665_v1 = vpop.f32.mrb[46].mxu1  ;;  %v3733_v2 = vpack.c.bf16 %v2456_v62, %v2455_v50  ;;  %v2520_v3 = vsel %vm2264_vm15, %v2136_v45, %v2392_v57  ;;  %v2141_v4 = vadd.f32 %v4217_v21, %v4515_v8  ;;  %v4669_v6 = vpop.f32.mrb[47].mxu0 }
 0x157   : > { %v2075_v5 = vadd.f32 %v4515_v8, %v1290_v26  ;;  %v4671_v7 = vpop.f32.mrb[47].mxu1  ;;  %3978 = vst [vmem:[%s4532_s17 + $0x98] sm:$0xff] %v3738_v60   ;;  %v3893_v9 = vpack.c.bf16 %v2520_v3, %v2519_v51  ;;  %vm2205_vm0 = vcmp.gt.f32.partialorder %v2077_v63, 0.0  ;;  %v2333_v10 = vmul.f32 0.01, %v2077_v63 }
 0x158   : > { %4010 = vst [vmem:[%s4532_s17 + $0x198] sm:$0xff] %v3898_v61   ;;  %v2139_v11 = vadd.f32 %v4515_v8, %v1546_v27  ;;  %3977 = vst [vmem:[%s4532_s17 + $0x90] sm:$0xff] %v3733_v2   ;;  %vm2269_vm1 = vcmp.gt.f32.partialorder %v2141_v4, 0.0  ;;  %v2397_v12 = vmul.f32 0.01, %v2141_v4  ;;  %v2078_v16 = vadd.f32 %v4637_v31, %v4515_v8 }
 0x159   : > { %vm2203_vm2 = vcmp.gt.f32.partialorder %v2075_v5, 0.0  ;;  %v2331_v13 = vmul.f32 0.01, %v2075_v5  ;;  %4009 = vst [vmem:[%s4532_s17 + $0x190] sm:$0xff] %v3893_v9   ;;  %v2461_v14 = vsel %vm2205_vm0, %v2077_v63, %v2333_v10  ;;  %v2142_v20 = vadd.f32 %v4683_v19, %v4639_v32 }
 0x15a   : > { %vm2267_vm3 = vcmp.gt.f32.partialorder %v2139_v11, 0.0  ;;  %v2395_v15 = vmul.f32 0.01, %v2139_v11  ;;  %v2525_v17 = vsel %vm2269_vm1, %v2141_v4, %v2397_v12  ;;  %v2076_v21 = vadd.f32 %v4683_v19, %v4642_v36  ;;  %v4689_v22 = vpop.f32.mrb[48].mxu0  ;;  %v4691_v23 = vpop.f32.mrb[48].mxu1 }
 0x15b   : > { %v2459_v18 = vsel %vm2203_vm2, %v2075_v5, %v2331_v13  ;;  %vm2206_vm4 = vcmp.gt.f32.partialorder %v2078_v16, 0.0  ;;  %v2334_v8 = vmul.f32 0.01, %v2078_v16  ;;  %v2140_v25 = vadd.f32 %v4683_v19, %v4652_v41  ;;  %v4695_v26 = vpop.f32.mrb[49].mxu0  ;;  %v4697_v27 = vpop.f32.mrb[49].mxu1 }
 0x15c   : > { %v2523_v24 = vsel %vm2267_vm3, %v2139_v11, %v2395_v15  ;;  %vm2270_vm5 = vcmp.gt.f32.partialorder %v2142_v20, 0.0  ;;  %v2398_v28 = vmul.f32 0.01, %v2142_v20  ;;  %vm2204_vm6 = vcmp.gt.f32.partialorder %v2076_v21, 0.0  ;;  %v4700_v33 = vpop.f32.mrb[50].mxu0  ;;  %v4702_v34 = vpop.f32.mrb[50].mxu1 }
 0x15d   : > { %v2332_v29 = vmul.f32 0.01, %v2076_v21  ;;  %v2462_v30 = vsel %vm2206_vm4, %v2078_v16, %v2334_v8  ;;  %vm2268_vm7 = vcmp.gt.f32.partialorder %v2140_v25, 0.0  ;;  %v2396_v31 = vmul.f32 0.01, %v2140_v25  ;;  %v4705_v39 = vpop.f32.mrb[51].mxu0 }
 0x15e   : > { %v2081_v32 = vadd.f32 %v4683_v19, %v4157_v53  ;;  %v3748_v35 = vpack.c.bf16 %v2462_v30, %v2461_v14  ;;  %v2526_v36 = vsel %vm2270_vm5, %v2142_v20, %v2398_v28  ;;  %v2145_v38 = vadd.f32 %v4683_v19, %v4221_v54  ;;  %v4707_v40 = vpop.f32.mrb[51].mxu1 }
 0x15f   : > { %v2460_v37 = vsel %vm2204_vm6, %v2076_v21, %v2332_v29  ;;  %v3908_v41 = vpack.c.bf16 %v2526_v36, %v2525_v17  ;;  %v2524_v43 = vsel %vm2268_vm7, %v2140_v25, %v2396_v31  ;;  %v2079_v47 = vadd.f32 %v4683_v19, %v4658_v58 }
 0x160   : > { %v3743_v42 = vpack.c.bf16 %v2460_v37, %v2459_v18  ;;  %vm2209_vm8 = vcmp.gt.f32.partialorder %v2081_v32, 0.0  ;;  %3980 = vst [vmem:[%s4532_s17 + $0xa8] sm:$0xff] %v3748_v35   ;;  %v3903_v44 = vpack.c.bf16 %v2524_v43, %v2523_v24  ;;  %v2337_v45 = vmul.f32 0.01, %v2081_v32 }
 0x161   : > { %vm2273_vm9 = vcmp.gt.f32.partialorder %v2145_v38, 0.0  ;;  %v2401_v46 = vmul.f32 0.01, %v2145_v38  ;;  %4012 = vst [vmem:[%s4532_s17 + $0x1a8] sm:$0xff] %v3908_v41   ;;  %v2143_v48 = vadd.f32 %v4683_v19, %v4660_v59  ;;  %v2082_v49 = vadd.f32 %v4683_v19, %v4663_v0 }
 0x162   : > { %3979 = vst [vmem:[%s4532_s17 + $0xa0] sm:$0xff] %v3743_v42   ;;  %v2146_v50 = vadd.f32 %v4683_v19, %v4665_v1  ;;  %4011 = vst [vmem:[%s4532_s17 + $0x1a0] sm:$0xff] %v3903_v44   ;;  %v2465_v51 = vsel %vm2209_vm8, %v2081_v32, %v2337_v45  ;;  %v2080_v53 = vadd.f32 %v4683_v19, %v4669_v6  ;;  %v4725_v55 = vpop.f32.mrb[52].mxu0  ;;  %v4727_v56 = vpop.f32.mrb[52].mxu1  ;;  %vm2207_vm10 = vcmp.gt.f32.partialorder %v2079_v47, 0.0 }
 0x163   : > { %v2529_v52 = vsel %vm2273_vm9, %v2145_v38, %v2401_v46  ;;  %v2144_v54 = vadd.f32 %v4683_v19, %v4671_v7  ;;  %v2335_v57 = vmul.f32 0.01, %v2079_v47  ;;  %vm2271_vm11 = vcmp.gt.f32.partialorder %v2143_v48, 0.0  ;;  %v4729_v0 = vpop.f32.mrb[53].mxu0  ;;  %v4731_v1 = vpop.f32.mrb[53].mxu1 }
 0x164   : > { %v2399_v58 = vmul.f32 0.01, %v2143_v48  ;;  %vm2210_vm12 = vcmp.gt.f32.partialorder %v2082_v49, 0.0  ;;  %v2338_v59 = vmul.f32 0.01, %v2082_v49  ;;  %vm2274_vm13 = vcmp.gt.f32.partialorder %v2146_v50, 0.0 }
 0x165   : > { %v2402_v60 = vmul.f32 0.01, %v2146_v50  ;;  %v2463_v61 = vsel %vm2207_vm10, %v2079_v47, %v2335_v57  ;;  %vm2208_vm14 = vcmp.gt.f32.partialorder %v2080_v53, 0.0  ;;  %v2336_v63 = vmul.f32 0.01, %v2080_v53  ;;  %v4733_v5 = vpop.f32.mrb[54].mxu0 }
 0x166   : > { %v2527_v62 = vsel %vm2271_vm11, %v2143_v48, %v2399_v58  ;;  %v2466_v2 = vsel %vm2210_vm12, %v2082_v49, %v2338_v59  ;;  %vm2272_vm15 = vcmp.gt.f32.partialorder %v2144_v54, 0.0  ;;  %v2400_v4 = vmul.f32 0.01, %v2144_v54  ;;  %v4735_v6 = vpop.f32.mrb[54].mxu1  ;;  %v4739_v12 = vpop.f32.mrb[55].mxu0 }
 0x167   : > { %v2530_v3 = vsel %vm2274_vm13, %v2146_v50, %v2402_v60  ;;  %v3758_v7 = vpack.c.bf16 %v2466_v2, %v2465_v51  ;;  %v2464_v10 = vsel %vm2208_vm14, %v2080_v53, %v2336_v63  ;;  %v2085_v11 = vadd.f32 %v4683_v19, %v4689_v22  ;;  %v4741_v13 = vpop.f32.mrb[55].mxu1 }
 0x168   : > { %v3918_v9 = vpack.c.bf16 %v2530_v3, %v2529_v52  ;;  %v3753_v14 = vpack.c.bf16 %v2464_v10, %v2463_v61  ;;  %v2528_v15 = vsel %vm2272_vm15, %v2144_v54, %v2400_v4  ;;  %v2149_v16 = vadd.f32 %v4683_v19, %v4691_v23 }
 0x169   : > { %v2083_v17 = vadd.f32 %v4683_v19, %v4695_v26  ;;  %3982 = vst [vmem:[%s4532_s17 + $0xb8] sm:$0xff] %v3758_v7   ;;  %v3913_v18 = vpack.c.bf16 %v2528_v15, %v2527_v62  ;;  %vm2213_vm0 = vcmp.gt.f32.partialorder %v2085_v11, 0.0  ;;  %v2341_v20 = vmul.f32 0.01, %v2085_v11 }
 0x16a   : > { %4014 = vst [vmem:[%s4532_s17 + $0x1b8] sm:$0xff] %v3918_v9   ;;  %v2147_v21 = vadd.f32 %v4683_v19, %v4697_v27  ;;  %3981 = vst [vmem:[%s4532_s17 + $0xb0] sm:$0xff] %v3753_v14   ;;  %vm2277_vm1 = vcmp.gt.f32.partialorder %v2149_v16, 0.0  ;;  %v2405_v22 = vmul.f32 0.01, %v2149_v16  ;;  %v2086_v25 = vadd.f32 %v4683_v19, %v4700_v33  ;;  %v4755_v26 = vpop.f32.mrb[56].mxu0 }
 0x16b   : > { %vm2211_vm2 = vcmp.gt.f32.partialorder %v2083_v17, 0.0  ;;  %v2339_v24 = vmul.f32 0.01, %v2083_v17  ;;  %4013 = vst [vmem:[%s4532_s17 + $0x1b0] sm:$0xff] %v3913_v18   ;;  %v2469_v8 = vsel %vm2213_vm0, %v2085_v11, %v2341_v20  ;;  %v4757_v28 = vpop.f32.mrb[56].mxu1  ;;  %v2150_v27 = vadd.f32 %v4683_v19, %v4702_v34  ;;  %v4763_v32 = vpop.f32.mrb[57].mxu0 }
 0x16c   : > { %vm2275_vm3 = vcmp.gt.f32.partialorder %v2147_v21, 0.0  ;;  %v2403_v23 = vmul.f32 0.01, %v2147_v21  ;;  %v2533_v29 = vsel %vm2277_vm1, %v2149_v16, %v2405_v22  ;;  %v2084_v31 = vadd.f32 %v4683_v19, %v4705_v39  ;;  %v4765_v35 = vpop.f32.mrb[57].mxu1  ;;  %v4769_v38 = vpop.f32.mrb[58].mxu0 }
 0x16d   : > { %v2467_v30 = vsel %vm2211_vm2, %v2083_v17, %v2339_v24  ;;  %vm2214_vm4 = vcmp.gt.f32.partialorder %v2086_v25, 0.0  ;;  %v2342_v37 = vmul.f32 0.01, %v2086_v25  ;;  %v2148_v33 = vadd.f32 %v4683_v19, %v4707_v40  ;;  %v4771_v41 = vpop.f32.mrb[58].mxu1  ;;  %v4775_v45 = vpop.f32.mrb[59].mxu0 }
 0x16e   : > { %v2531_v36 = vsel %vm2275_vm3, %v2147_v21, %v2403_v23  ;;  %vm2278_vm5 = vcmp.gt.f32.partialorder %v2150_v27, 0.0  ;;  %v2406_v42 = vmul.f32 0.01, %v2150_v27  ;;  %vm2212_vm6 = vcmp.gt.f32.partialorder %v2084_v31, 0.0  ;;  %v4777_v46 = vpop.f32.mrb[59].mxu1 }
 0x16f   : > { %v2340_v34 = vmul.f32 0.01, %v2084_v31  ;;  %v2470_v39 = vsel %vm2214_vm4, %v2086_v25, %v2342_v37  ;;  %vm2276_vm7 = vcmp.gt.f32.partialorder %v2148_v33, 0.0  ;;  %v2404_v43 = vmul.f32 0.01, %v2148_v33 }
 0x170   : > { %v2089_v44 = vadd.f32 %v4683_v19, %v4725_v55  ;;  %v3768_v40 = vpack.c.bf16 %v2470_v39, %v2469_v8  ;;  %v2534_v47 = vsel %vm2278_vm5, %v2150_v27, %v2406_v42  ;;  %v2153_v49 = vadd.f32 %v4683_v19, %v4727_v56 }
 0x171   : > { %v2468_v48 = vsel %vm2212_vm6, %v2084_v31, %v2340_v34  ;;  %v3928_v50 = vpack.c.bf16 %v2534_v47, %v2533_v29  ;;  %v2532_v52 = vsel %vm2276_vm7, %v2148_v33, %v2404_v43  ;;  %v2087_v58 = vadd.f32 %v4683_v19, %v4729_v0 }
 0x172   : > { %v3763_v51 = vpack.c.bf16 %v2468_v48, %v2467_v30  ;;  %vm2217_vm8 = vcmp.gt.f32.partialorder %v2089_v44, 0.0  ;;  %3984 = vst [vmem:[%s4532_s17 + $0xc8] sm:$0xff] %v3768_v40   ;;  %v3923_v53 = vpack.c.bf16 %v2532_v52, %v2531_v36  ;;  %v2345_v54 = vmul.f32 0.01, %v2089_v44  ;;  %v4782_v57 = vpop.f32.mrb[60].mxu0  ;;  %v4794_v61 = vpop.f32.mrb[60].mxu1 }
 0x173   : > { %vm2281_vm9 = vcmp.gt.f32.partialorder %v2153_v49, 0.0  ;;  %v2409_v55 = vmul.f32 0.01, %v2153_v49  ;;  %4016 = vst [vmem:[%s4532_s17 + $0x1c8] sm:$0xff] %v3928_v50   ;;  %v2151_v56 = vadd.f32 %v4683_v19, %v4731_v1  ;;  %v2090_v59 = vadd.f32 %v4683_v19, %v4733_v5  ;;  %v4796_v62 = vpop.f32.mrb[61].mxu0  ;;  %v4804_v3 = vpop.f32.mrb[61].mxu1 }
 0x174   : > { %3983 = vst [vmem:[%s4532_s17 + $0xc0] sm:$0xff] %v3763_v51   ;;  %v2154_v60 = vadd.f32 %v4683_v19, %v4735_v6  ;;  %4015 = vst [vmem:[%s4532_s17 + $0x1c0] sm:$0xff] %v3923_v53   ;;  %v2473_v63 = vsel %vm2217_vm8, %v2089_v44, %v2345_v54  ;;  %v2088_v0 = vadd.f32 %v4683_v19, %v4739_v12  ;;  %v4806_v4 = vpop.f32.mrb[62].mxu0  ;;  %vm2215_vm10 = vcmp.gt.f32.partialorder %v2087_v58, 0.0  ;;  %v4808_v12 = vpop.f32.mrb[62].mxu1 }
 0x175   : > { %v2537_v2 = vsel %vm2281_vm9, %v2153_v49, %v2409_v55  ;;  %v2152_v1 = vadd.f32 %v4683_v19, %v4741_v13  ;;  %v2343_v5 = vmul.f32 0.01, %v2087_v58  ;;  %vm2279_vm11 = vcmp.gt.f32.partialorder %v2151_v56, 0.0  ;;  %v4810_v13 = vpop.f32.mrb[63].mxu0  ;;  %v1629_v18 = vpop.f32.mrb[63].mxu1 }
 0x176   : > { %v2407_v6 = vmul.f32 0.01, %v2151_v56  ;;  %vm2218_vm12 = vcmp.gt.f32.partialorder %v2090_v59, 0.0  ;;  %v2346_v7 = vmul.f32 0.01, %v2090_v59  ;;  %vm2282_vm13 = vcmp.gt.f32.partialorder %v2154_v60, 0.0 }
 0x177   : > { %v2410_v9 = vmul.f32 0.01, %v2154_v60  ;;  %v2471_v10 = vsel %vm2215_vm10, %v2087_v58, %v2343_v5  ;;  %vm2216_vm14 = vcmp.gt.f32.partialorder %v2088_v0, 0.0  ;;  %v2344_v14 = vmul.f32 0.01, %v2088_v0 }
 0x178   : > { %v2535_v11 = vsel %vm2279_vm11, %v2151_v56, %v2407_v6  ;;  %v2474_v15 = vsel %vm2218_vm12, %v2090_v59, %v2346_v7  ;;  %vm2280_vm15 = vcmp.gt.f32.partialorder %v2152_v1, 0.0  ;;  %v2408_v17 = vmul.f32 0.01, %v2152_v1 }
 0x179   : > { %v2538_v16 = vsel %vm2282_vm13, %v2154_v60, %v2410_v9  ;;  %v3778_v20 = vpack.c.bf16 %v2474_v15, %v2473_v63  ;;  %v2472_v22 = vsel %vm2216_vm14, %v2088_v0, %v2344_v14  ;;  %v2093_v24 = vadd.f32 %v4683_v19, %v4755_v26 }
 0x17a   : > { %v3938_v21 = vpack.c.bf16 %v2538_v16, %v2537_v2  ;;  %v3773_v8 = vpack.c.bf16 %v2472_v22, %v2471_v10  ;;  %v2536_v23 = vsel %vm2280_vm15, %v2152_v1, %v2408_v17  ;;  %v2157_v25 = vadd.f32 %v4683_v19, %v4757_v28 }
 0x17b   : > { %v2091_v29 = vadd.f32 %v4683_v19, %v4763_v32  ;;  %3986 = vst [vmem:[%s4532_s17 + $0xd8] sm:$0xff] %v3778_v20   ;;  %v3933_v30 = vpack.c.bf16 %v2536_v23, %v2535_v11  ;;  %vm2221_vm0 = vcmp.gt.f32.partialorder %v2093_v24, 0.0  ;;  %v2349_v27 = vmul.f32 0.01, %v2093_v24 }
 0x17c   : > { %4018 = vst [vmem:[%s4532_s17 + $0x1d8] sm:$0xff] %v3938_v21   ;;  %v2155_v31 = vadd.f32 %v4683_v19, %v4765_v35  ;;  %3985 = vst [vmem:[%s4532_s17 + $0xd0] sm:$0xff] %v3773_v8   ;;  %vm2285_vm1 = vcmp.gt.f32.partialorder %v2157_v25, 0.0  ;;  %v2413_v26 = vmul.f32 0.01, %v2157_v25  ;;  %v2094_v28 = vadd.f32 %v4683_v19, %v4769_v38 }
 0x17d   : > { %vm2219_vm2 = vcmp.gt.f32.partialorder %v2091_v29, 0.0  ;;  %v2347_v36 = vmul.f32 0.01, %v2091_v29  ;;  %4017 = vst [vmem:[%s4532_s17 + $0x1d0] sm:$0xff] %v3933_v30   ;;  %v2477_v37 = vsel %vm2221_vm0, %v2093_v24, %v2349_v27  ;;  %v2158_v42 = vadd.f32 %v4683_v19, %v4771_v41 }
 0x17e   : > { %vm2283_vm3 = vcmp.gt.f32.partialorder %v2155_v31, 0.0  ;;  %v2541_v32 = vsel %vm2285_vm1, %v2157_v25, %v2413_v26  ;;  %v2411_v33 = vmul.f32 0.01, %v2155_v31  ;;  %v2092_v34 = vadd.f32 %v4683_v19, %v4775_v45 }
 0x17f   : > { %v2475_v35 = vsel %vm2219_vm2, %v2091_v29, %v2347_v36  ;;  %vm2222_vm4 = vcmp.gt.f32.partialorder %v2094_v28, 0.0  ;;  %v2350_v39 = vmul.f32 0.01, %v2094_v28  ;;  %v2156_v43 = vadd.f32 %v4683_v19, %v4777_v46 }
 0x180   : > { %vm2286_vm5 = vcmp.gt.f32.partialorder %v2158_v42, 0.0  ;;  %v2414_v44 = vmul.f32 0.01, %v2158_v42  ;;  %vm2220_vm6 = vcmp.gt.f32.partialorder %v2092_v34, 0.0  ;;  %v2348_v40 = vmul.f32 0.01, %v2092_v34 }
 0x181   : > { %v2478_v38 = vsel %vm2222_vm4, %v2094_v28, %v2350_v39  ;;  %vm2284_vm7 = vcmp.gt.f32.partialorder %v2156_v43, 0.0  ;;  %v2412_v47 = vmul.f32 0.01, %v2156_v43  ;;  %v2097_v41 = vadd.f32 %v4683_v19, %v4782_v57 }
 0x182   : > { %v3788_v45 = vpack.c.bf16 %v2478_v38, %v2477_v37  ;;  %v2542_v48 = vsel %vm2286_vm5, %v2158_v42, %v2414_v44  ;;  %v2476_v49 = vsel %vm2220_vm6, %v2092_v34, %v2348_v40  ;;  %v2161_v50 = vadd.f32 %v4683_v19, %v4794_v61 }
 0x183   : > { %v2539_v46 = vsel %vm2283_vm3, %v2155_v31, %v2411_v33  ;;  %v3948_v51 = vpack.c.bf16 %v2542_v48, %v2541_v32  ;;  %v3783_v52 = vpack.c.bf16 %v2476_v49, %v2475_v35  ;;  %v2540_v53 = vsel %vm2284_vm7, %v2156_v43, %v2412_v47 }
 0x184   : > { %3988 = vst [vmem:[%s4532_s17 + $0xe8] sm:$0xff] %v3788_v45   ;;  %v3943_v54 = vpack.c.bf16 %v2540_v53, %v2539_v46  ;;  %vm2225_vm8 = vcmp.gt.f32.partialorder %v2097_v41, 0.0  ;;  %v2353_v55 = vmul.f32 0.01, %v2097_v41  ;;  %v2417_v58 = vmul.f32 0.01, %v2161_v50 }
 0x185   : > { %4020 = vst [vmem:[%s4532_s17 + $0x1e8] sm:$0xff] %v3948_v51   ;;  %3987 = vst [vmem:[%s4532_s17 + $0xe0] sm:$0xff] %v3783_v52   ;;  %v2095_v57 = vadd.f32 %v4683_v19, %v4796_v62  ;;  %v2159_v56 = vadd.f32 %v4683_v19, %v4804_v3  ;;  %v2098_v59 = vadd.f32 %v4683_v19, %v4806_v4  ;;  %vm2289_vm9 = vcmp.gt.f32.partialorder %v2161_v50, 0.0 }
 0x186   : > { %v2162_v60 = vadd.f32 %v4683_v19, %v4808_v12  ;;  %4019 = vst [vmem:[%s4532_s17 + $0x1e0] sm:$0xff] %v3943_v54   ;;  %v2096_v61 = vadd.f32 %v4683_v19, %v4810_v13  ;;  %v2160_v63 = vadd.f32 %v4683_v19, %v1629_v18  ;;  %v2481_v2 = vsel %vm2225_vm8, %v2097_v41, %v2353_v55 }
 0x187   : > { %vm2223_vm10 = vcmp.gt.f32.partialorder %v2095_v57, 0.0  ;;  %v2351_v0 = vmul.f32 0.01, %v2095_v57  ;;  %v2415_v62 = vmul.f32 0.01, %v2159_v56  ;;  %vm2226_vm11 = vcmp.gt.f32.partialorder %v2098_v59, 0.0 }
 0x188   : > { %v2354_v1 = vmul.f32 0.01, %v2098_v59  ;;  %vm2290_vm12 = vcmp.gt.f32.partialorder %v2162_v60, 0.0  ;;  %v2418_v3 = vmul.f32 0.01, %v2162_v60  ;;  %v2545_v4 = vsel %vm2289_vm9, %v2161_v50, %v2417_v58 }
 0x189   : > { %vm2287_vm13 = vcmp.gt.f32.partialorder %v2159_v56, 0.0  ;;  %vm2224_vm14 = vcmp.gt.f32.partialorder %v2096_v61, 0.0  ;;  %v2352_v5 = vmul.f32 0.01, %v2096_v61  ;;  %vm2288_vm15 = vcmp.gt.f32.partialorder %v2160_v63, 0.0 }
 0x18a   : > { %v2482_v6 = vsel %vm2226_vm11, %v2098_v59, %v2354_v1  ;;  %v2546_v7 = vsel %vm2290_vm12, %v2162_v60, %v2418_v3  ;;  %v2416_v19 = vmul.f32 0.01, %v2160_v63  ;;  %v2479_v9 = vsel %vm2223_vm10, %v2095_v57, %v2351_v0 }
 0x18b   : > { %v3798_v10 = vpack.c.bf16 %v2482_v6, %v2481_v2  ;;  %v3958_v11 = vpack.c.bf16 %v2546_v7, %v2545_v4  ;;  %v2480_v14 = vsel %vm2224_vm14, %v2096_v61, %v2352_v5  ;;  %v2543_v12 = vsel %vm2287_vm13, %v2159_v56, %v2415_v62 }
 0x18c   : > { %v3793_v13 = vpack.c.bf16 %v2480_v14, %v2479_v9  ;;  %v2544_v15 = vsel %vm2288_vm15, %v2160_v63, %v2416_v19 }
 0x18d   : > { %3990 = vst [vmem:[%s4532_s17 + $0xf8] sm:$0xff] %v3798_v10   ;;  %4022 = vst [vmem:[%s4532_s17 + $0x1f8] sm:$0xff] %v3958_v11   ;;  %v3953_v16 = vpack.c.bf16 %v2544_v15, %v2543_v12 }
 0x18e   : > { %3989 = vst [vmem:[%s4532_s17 + $0xf0] sm:$0xff] %v3793_v13  }
 0x18f   : > { %4021 = vst [vmem:[%s4532_s17 + $0x1f0] sm:$0xff] %v3953_v16  }
 0x190 PF: > { %s13_s14 = sadd.s32 1, %s4374_s14   ;;  %s4869_s12 = smov %s4370_s13 }
 0x191   : > { %p10_p5 = scmp.ge.s32.totalorder %s13_s14, 4   ;;  %s4870_s13 = smov %s4872_s15 }
 0x193   :  { %12 = sbr.rel (!%p10_p5) target bundleno = 2 (0x2), region = 76 }

// kernel: _lambda_.5
= control target key start
LH: loop header
LB: loop body
LE: loop exit
PB: predicated region body
PF: predicated region fallthrough
CT: control target
= control target key end

     0   :  { %s2280_s12 = smov 0   ;;  %s2282_s13 = smov 0   ;;  %s2533_s0 = inlined_call_operand.vmem [shape: bf16[512,384], index: 0, kind: input, shape index: {}]   ;;  %s2534_s1 = inlined_call_operand.vmem [shape: bf16[384,128], index: 1, kind: input, shape index: {}]   ;;  %s2535_s2 = inlined_call_operand.vmem [shape: f32[1,128], index: 2, kind: input, shape index: {}]   ;;  %s2536_s3 = inlined_call_operand.vmem [shape: bf16[512,128], index: 3, kind: output, shape index: {}]  }
   0x1   :  { %s2284_s14 = smov 0  }
   0x2 LB: > { %s32_s15 = sadd.s32 1, %s2254_s13  ;;  %p1684_p0 = scmp.ge.s32.totalorder %s2258_s14, 1  ;;  %s2258_s14 = sphi %s2284_s14, %s13_s14   ;;  %s2254_s13 = sphi %s2282_s13, %s2538_s13   ;;  %s2250_s12 = sphi %s2280_s12, %s2537_s12  }
   0x3   : > { %p34_p1 = scmp.ge.s32.totalorder %s32_s15, 2  ;;  %p191_p2 = scmp.lt.s32.totalorder %s2258_s14, 3 }
   0x5   : > { %s2540_s15 = smov (%p34_p1, %s32_s15), 0  ;;  %p192_p3 = pnand %p1684_p0, %p191_p2 }
   0x6   : > { %v2148_v0 = vld [vmem:[%s2534_s1 + $0x40] sm:$0xff] (!%p192_p3)   ;;  %s1685_s18 = sshll.u32 (!%p192_p3), %s2250_s12, 5  ;;  %v2150_v2 = vld [vmem:[%s2534_s1 + $0x48] sm:$0xff] (!%p192_p3)   ;;  %v2152_v4 = vld [vmem:[%s2534_s1 + $0x50] sm:$0xff] (!%p192_p3)  }
   0x7   : > { %195 = sbr.rel (%p192_p3) target bundleno = 355 (0x163), region = 32  ;;  %v2149_v1 = vld [vmem:[%s2534_s1] sm:$0xff] (!%p192_p3)   ;;  %1923 = vmatprep.subr.bf16.mxu0 (!%p192_p3), %v2148_v0  ;;  %2107 = vmatprep.subr.bf16.mxu1 (!%p192_p3), %v2148_v0  ;;  %p236_p4 = scmp.lt.s32.totalorder (!%p192_p3), %s1685_s18, 63  ;;  %v2151_v3 = vld [vmem:[%s2534_s1 + $0x8] sm:$0xff] (!%p192_p3)   ;;  %v2153_v5 = vld [vmem:[%s2534_s1 + $0x10] sm:$0xff] (!%p192_p3)  }
   0x8   : > { %1924 = vmatpush3.bf16.msra.mxu0 (!%p192_p3), %v2149_v1  ;;  %2115 = vmatpush3.bf16.msra.mxu1 (!%p192_p3), %v2149_v1  ;;  %v2154_v6 = vld [vmem:[%s2534_s1 + $0x58] sm:$0xff] (!%p192_p3)   ;;  %v2156_v8 = vld [vmem:[%s2534_s1 + $0x60] sm:$0xff] (!%p192_p3)   ;;  %v2158_v10 = vld [vmem:[%s2534_s1 + $0x68] sm:$0xff] (!%p192_p3)  }
   0x9   : > { %1925 = vmatprep.subr.bf16.mxu0 (!%p192_p3), %v2150_v2  ;;  %2108 = vmatprep.subr.bf16.mxu1 (!%p192_p3), %v2150_v2  ;;  %v2155_v7 = vld [vmem:[%s2534_s1 + $0x18] sm:$0xff] (!%p192_p3)   ;;  %v2157_v9 = vld [vmem:[%s2534_s1 + $0x20] sm:$0xff] (!%p192_p3)   ;;  %v2159_v13 = vld [vmem:[%s2534_s1 + $0x28] sm:$0xff] (!%p192_p3)  }
   0xa   : > { %v2160_v14 = vld [vmem:[%s2534_s1 + $0x70] sm:$0xff] (!%p192_p3)   ;;  %v2162_v16 = vld [vmem:[%s2534_s1 + $0x78] sm:$0xff] (!%p192_p3)   ;;  %v2170_v18 = vld [vmem:[%s2534_s1 + $0x80] sm:$0xff] (!%p192_p3)  }
   0xb   : > { %v2161_v15 = vld [vmem:[%s2534_s1 + $0x30] sm:$0xff] (!%p192_p3)   ;;  %v2163_v17 = vld [vmem:[%s2534_s1 + $0x38] sm:$0xff] (!%p192_p3)   ;;  %v2171_v22 = vld [vmem:[%s2534_s1 + $0x88] sm:$0xff] (!%p192_p3)  }
   0xc   : > { %1926 = vmatpush3.bf16.msra.mxu0 (!%p192_p3), %v2151_v3  ;;  %2116 = vmatpush3.bf16.msra.mxu1 (!%p192_p3), %v2151_v3  ;;  %v2178_v25 = vld [vmem:[%s2534_s1 + $0x90] sm:$0xff] (!%p192_p3)   ;;  %v2179_v27 = vld [vmem:[%s2534_s1 + $0x98] sm:$0xff] (!%p192_p3)   ;;  %v2186_v30 = vld [vmem:[%s2534_s1 + $0xa0] sm:$0xff] (!%p192_p3)  }
   0xd   : > { %1927 = vmatprep.subr.bf16.mxu0 (!%p192_p3), %v2152_v4  ;;  %2109 = vmatprep.subr.bf16.mxu1 (!%p192_p3), %v2152_v4  ;;  %v2187_v33 = vld [vmem:[%s2534_s1 + $0xa8] sm:$0xff] (!%p192_p3)   ;;  %v2194_v36 = vld [vmem:[%s2534_s1 + $0xb0] sm:$0xff] (!%p192_p3)   ;;  %v2195_v40 = vld [vmem:[%s2534_s1 + $0xb8] sm:$0xff] (!%p192_p3)  }
   0xe   : > { %s2542_s18 = smov (!%p236_p4, %s1685_s18), 63 }
   0xf   : > { %s2123_s4 = smul.u32 12, %s2542_s18  ;;  %s1688_s25 = sshll.u32 %s2542_s18, 2 }
  0x10   : > { %1928 = vmatpush3.bf16.msra.mxu0 %v2153_v5  ;;  %2117 = vmatpush3.bf16.msra.mxu1 %v2153_v5  ;;  %s2461_s28 = scalar_lea.vmem %s2536_s3, %s1688_s25 }
  0x11   : > { %1929 = vmatprep.subr.bf16.mxu0 %v2154_v6  ;;  %2110 = vmatprep.subr.bf16.mxu1 %v2154_v6  ;;  %s2331_s11 = scalar_lea.vmem %s2533_s0, %s2123_s4 }
  0x12   : > { %v2166_v11 = vld [vmem:[%s2331_s11 + $0x4] ss:$12 sps:$4 sm:$0xff]   ;;  %v2164_v19 = vld [vmem:[%s2331_s11] ss:$12 sps:$4 sm:$0xff]   ;;  %v2172_v21 = vld [vmem:[%s2331_s11 + $0x1c] ss:$12 sps:$4 sm:$0xff]  }
  0x13   : > { %v2169_v12 = vld [vmem:[%s2331_s11 + $0x124] ss:$12 sps:$4 sm:$0xff]   ;;  %880 = vmatprep.mubr.bf16.mxu0 %v2166_v11  ;;  %v2167_v20 = vld [vmem:[%s2331_s11 + $0x120] ss:$12 sps:$4 sm:$0xff]   ;;  %v2174_v23 = vld [vmem:[%s2331_s11 + $0x13c] ss:$12 sps:$4 sm:$0xff]  }
  0x14   : > { %1930 = vmatpush3.bf16.msra.mxu0 %v2155_v7  ;;  %2118 = vmatpush3.bf16.msra.mxu1 %v2155_v7  ;;  %v2176_v24 = vld [vmem:[%s2331_s11 + $0x18] ss:$12 sps:$4 sm:$0xff]   ;;  %v2180_v28 = vld [vmem:[%s2331_s11 + $0x34] ss:$12 sps:$4 sm:$0xff]   ;;  %v2184_v31 = vld [vmem:[%s2331_s11 + $0x30] ss:$12 sps:$4 sm:$0xff]  }
  0x15   : > { %1931 = vmatprep.subr.bf16.mxu0 %v2156_v8  ;;  %2111 = vmatprep.subr.bf16.mxu1 %v2156_v8  ;;  %v2177_v26 = vld [vmem:[%s2331_s11 + $0x138] ss:$12 sps:$4 sm:$0xff]   ;;  %v2182_v29 = vld [vmem:[%s2331_s11 + $0x154] ss:$12 sps:$4 sm:$0xff]   ;;  %v2185_v32 = vld [vmem:[%s2331_s11 + $0x150] ss:$12 sps:$4 sm:$0xff]  }
  0x16   : > { %976 = vmatprep.mubr.bf16.mxu1 %v2169_v12  ;;  %v2188_v34 = vld [vmem:[%s2331_s11 + $0x4c] ss:$12 sps:$4 sm:$0xff]   ;;  %v2192_v37 = vld [vmem:[%s2331_s11 + $0x48] ss:$12 sps:$4 sm:$0xff]   ;;  %v2196_v39 = vld [vmem:[%s2331_s11 + $0x64] ss:$12 sps:$4 sm:$0xff]  }
  0x17   : > { %v2190_v35 = vld [vmem:[%s2331_s11 + $0x16c] ss:$12 sps:$4 sm:$0xff]   ;;  %v2193_v38 = vld [vmem:[%s2331_s11 + $0x168] ss:$12 sps:$4 sm:$0xff]   ;;  %v2205_v47 = vld [vmem:[%s2331_s11 + $0x50] ss:$12 sps:$4 sm:$0xff]  }
  0x18   : > { %1932 = vmatpush3.bf16.msra.mxu0 %v2157_v9  ;;  %2119 = vmatpush3.bf16.msra.mxu1 %v2157_v9  ;;  %v2198_v41 = vld [vmem:[%s2331_s11 + $0x8] ss:$12 sps:$4 sm:$0xff]   ;;  %v2199_v42 = vld [vmem:[%s2331_s11 + $0x60] ss:$12 sps:$4 sm:$0xff]   ;;  %v2203_v45 = vld [vmem:[%s2331_s11 + $0x38] ss:$12 sps:$4 sm:$0xff]  }
  0x19   : > { %1933 = vmatprep.subr.bf16.mxu0 %v2158_v10  ;;  %2112 = vmatprep.subr.bf16.mxu1 %v2158_v10  ;;  %v2200_v43 = vld [vmem:[%s2331_s11 + $0x20] ss:$12 sps:$4 sm:$0xff]   ;;  %v2201_v44 = vld [vmem:[%s2331_s11 + $0x7c] ss:$12 sps:$4 sm:$0xff]   ;;  %v2204_v46 = vld [vmem:[%s2331_s11 + $0x78] ss:$12 sps:$4 sm:$0xff]  }
  0x1a   : > { %v2206_v48 = vld [vmem:[%s2331_s11 + $0x94] ss:$12 sps:$4 sm:$0xff]   ;;  %v2209_v50 = vld [vmem:[%s2331_s11 + $0x90] ss:$12 sps:$4 sm:$0xff]   ;;  %v2211_v52 = vld [vmem:[%s2331_s11 + $0xac] ss:$12 sps:$4 sm:$0xff]  }
  0x1b   : > { %v2208_v49 = vld [vmem:[%s2331_s11 + $0x68] ss:$12 sps:$4 sm:$0xff]   ;;  %v2210_v51 = vld [vmem:[%s2331_s11 + $0x80] ss:$12 sps:$4 sm:$0xff]   ;;  %v2213_v53 = vld [vmem:[%s2331_s11 + $0x98] ss:$12 sps:$4 sm:$0xff]  }
  0x1c   : > { %1934 = vmatpush3.bf16.msra.mxu0 %v2159_v13  ;;  %2120 = vmatpush3.bf16.msra.mxu1 %v2159_v13  ;;  %v2214_v54 = vld [vmem:[%s2331_s11 + $0xa8] ss:$12 sps:$4 sm:$0xff]   ;;  %v2215_v55 = vld [vmem:[%s2331_s11 + $0xb0] ss:$12 sps:$4 sm:$0xff]   ;;  %v2219_v58 = vld [vmem:[%s2331_s11 + $0xc0] ss:$12 sps:$4 sm:$0xff]  }
  0x1d   : > { %1935 = vmatprep.subr.bf16.mxu0 %v2160_v14  ;;  %2113 = vmatprep.subr.bf16.mxu1 %v2160_v14  ;;  %v2216_v56 = vld [vmem:[%s2331_s11 + $0xc4] ss:$12 sps:$4 sm:$0xff]   ;;  %v2218_v57 = vld [vmem:[%s2331_s11 + $0xc8] ss:$12 sps:$4 sm:$0xff]   ;;  %v2220_v59 = vld [vmem:[%s2331_s11 + $0xe0] ss:$12 sps:$4 sm:$0xff]  }
  0x1e   : > { %v2221_v60 = vld [vmem:[%s2331_s11 + $0xdc] ss:$12 sps:$4 sm:$0xff]   ;;  %v2223_v61 = vld [vmem:[%s2331_s11 + $0xf8] ss:$12 sps:$4 sm:$0xff]   ;;  %v2226_v0 = vld [vmem:[%s2331_s11 + $0xf4] ss:$12 sps:$4 sm:$0xff]  }
  0x1f   : > { %v2224_v62 = vld [vmem:[%s2331_s11 + $0xd8] ss:$12 sps:$4 sm:$0xff]   ;;  %v2225_v63 = vld [vmem:[%s2331_s11 + $0x110] ss:$12 sps:$4 sm:$0xff]   ;;  %v2228_v1 = vld [vmem:[%s2331_s11 + $0x128] ss:$12 sps:$4 sm:$0xff]  }
  0x20   : > { %1936 = vmatpush3.bf16.msra.mxu0 %v2161_v15  ;;  %2121 = vmatpush3.bf16.msra.mxu1 %v2161_v15  ;;  %v2229_v2 = vld [vmem:[%s2331_s11 + $0xf0] ss:$12 sps:$4 sm:$0xff]   ;;  %v2230_v3 = vld [vmem:[%s2331_s11 + $0x140] ss:$12 sps:$4 sm:$0xff]   ;;  %v2233_v5 = vld [vmem:[%s2331_s11 + $0x158] ss:$12 sps:$4 sm:$0xff]  }
  0x21   : > { %1937 = vmatprep.subr.bf16.mxu0 %v2162_v16  ;;  %2114 = vmatprep.subr.bf16.mxu1 %v2162_v16  ;;  %v2231_v4 = vld [vmem:[%s2331_s11 + $0x10c] ss:$12 sps:$4 sm:$0xff]   ;;  %v2234_v6 = vld [vmem:[%s2331_s11 + $0x108] ss:$12 sps:$4 sm:$0xff]   ;;  %v2235_v7 = vld [vmem:[%s2331_s11 + $0x170] ss:$12 sps:$4 sm:$0xff]  }
  0x24   : > { %1938 = vmatpush3.bf16.msra.mxu0 %v2163_v17  ;;  %2122 = vmatpush3.bf16.msra.mxu1 %v2163_v17 }
  0x25   : > { %2059 = vmatprep.subr.bf16.mxu1 %v2170_v18 }
  0x27   : > { %881 = vmatmul.mubr.bf16.vlgmr.msra.gmra.mrb[0].mxu0 %v2164_v19  ;;  %977 = vmatmul.mubr.bf16.vlgmr.msra.gmra.mrb[0].mxu1 %v2167_v20 }
  0x28   : > { %2060 = vmatpush3.bf16.msra.mxu1 %v2170_v18  ;;  %888 = vmatprep.mubr.bf16.mxu0 %v2172_v21 }
  0x29   : > { %2061 = vmatprep.subr.bf16.mxu1 %v2171_v22  ;;  %984 = vmatprep.mubr.bf16.mxu1 %v2174_v23 }
  0x2c   : > { %2062 = vmatpush3.bf16.msra.mxu1 %v2171_v22 }
  0x2d   : > { %2063 = vmatprep.subr.bf16.mxu1 %v2178_v25 }
  0x2f   : > { %889 = vmatmul.mubr.bf16.gmra.mrb[4].mxu0 %v2176_v24  ;;  %985 = vmatmul.mubr.bf16.gmra.mrb[4].mxu1 %v2177_v26 }
  0x30   : > { %2064 = vmatpush3.bf16.msra.mxu1 %v2178_v25  ;;  %896 = vmatprep.mubr.bf16.mxu0 %v2180_v28 }
  0x31   : > { %2065 = vmatprep.subr.bf16.mxu1 %v2179_v27  ;;  %992 = vmatprep.mubr.bf16.mxu1 %v2182_v29 }
  0x34   : > { %2066 = vmatpush3.bf16.msra.mxu1 %v2179_v27 }
  0x35   : > { %2067 = vmatprep.subr.bf16.mxu1 %v2186_v30 }
  0x37   : > { %897 = vmatmul.mubr.bf16.gmra.mrb[8].mxu0 %v2184_v31  ;;  %993 = vmatmul.mubr.bf16.gmra.mrb[8].mxu1 %v2185_v32 }
  0x38   : > { %2068 = vmatpush3.bf16.msra.mxu1 %v2186_v30  ;;  %904 = vmatprep.mubr.bf16.mxu0 %v2188_v34 }
  0x39   : > { %2069 = vmatprep.subr.bf16.mxu1 %v2187_v33  ;;  %1000 = vmatprep.mubr.bf16.mxu1 %v2190_v35 }
  0x3c   : > { %2070 = vmatpush3.bf16.msra.mxu1 %v2187_v33 }
  0x3d   : > { %2071 = vmatprep.subr.bf16.mxu1 %v2194_v36 }
  0x3f   : > { %905 = vmatmul.mubr.bf16.gmra.mrb[12].mxu0 %v2192_v37  ;;  %1001 = vmatmul.mubr.bf16.gmra.mrb[12].mxu1 %v2193_v38 }
  0x40   : > { %2072 = vmatpush3.bf16.msra.mxu1 %v2194_v36  ;;  %912 = vmatprep.mubr.bf16.mxu0 %v2196_v39 }
  0x41   : > { %2073 = vmatprep.subr.bf16.mxu1 %v2195_v40  ;;  %2075 = vmatprep.mubr.bf16.mxu1 %v2198_v41 }
  0x44   : > { %2074 = vmatpush3.bf16.msra.mxu1 %v2195_v40 }
  0x47   : > { %913 = vmatmul.mubr.bf16.gmra.mrb[16].mxu0 %v2199_v42  ;;  %2076 = vmatmul.mubr.bf16.vlgmr.msra.gmra.mrb[16].mxu1 %v2200_v43 }
  0x48   : > { %920 = vmatprep.mubr.bf16.mxu0 %v2201_v44  ;;  %2079 = vmatprep.mubr.bf16.mxu1 %v2203_v45 }
  0x4f   : > { %921 = vmatmul.mubr.bf16.gmra.mrb[20].mxu0 %v2204_v46  ;;  %2080 = vmatmul.mubr.bf16.gmra.mrb[20].mxu1 %v2205_v47 }
  0x50   : > { %928 = vmatprep.mubr.bf16.mxu0 %v2206_v48  ;;  %2083 = vmatprep.mubr.bf16.mxu1 %v2208_v49 }
  0x57   : > { %929 = vmatmul.mubr.bf16.gmra.mrb[24].mxu0 %v2209_v50  ;;  %2084 = vmatmul.mubr.bf16.gmra.mrb[24].mxu1 %v2210_v51 }
  0x58   : > { %936 = vmatprep.mubr.bf16.mxu0 %v2211_v52  ;;  %2087 = vmatprep.mubr.bf16.mxu1 %v2213_v53 }
  0x5f   : > { %937 = vmatmul.mubr.bf16.gmra.mrb[28].mxu0 %v2214_v54  ;;  %2088 = vmatmul.mubr.bf16.gmra.mrb[28].mxu1 %v2215_v55 }
  0x60   : > { %944 = vmatprep.mubr.bf16.mxu0 %v2216_v56  ;;  %2091 = vmatprep.mubr.bf16.mxu1 %v2218_v57 }
  0x67   : > { %945 = vmatmul.mubr.bf16.gmra.mrb[32].mxu0 %v2219_v58  ;;  %2092 = vmatmul.mubr.bf16.gmra.mrb[32].mxu1 %v2220_v59  ;;  %v2447_v58 = vld [vmem:[%s2535_s2] ss:$0 sm:$0xff] }
  0x68   : > { %952 = vmatprep.mubr.bf16.mxu0 %v2221_v60  ;;  %2095 = vmatprep.mubr.bf16.mxu1 %v2223_v61 }
  0x6f   : > { %953 = vmatmul.mubr.bf16.gmra.mrb[36].mxu0 %v2224_v62  ;;  %2096 = vmatmul.mubr.bf16.gmra.mrb[36].mxu1 %v2225_v63 }
  0x70   : > { %960 = vmatprep.mubr.bf16.mxu0 %v2226_v0  ;;  %2099 = vmatprep.mubr.bf16.mxu1 %v2228_v1 }
  0x77   : > { %961 = vmatmul.mubr.bf16.gmra.mrb[40].mxu0 %v2229_v2  ;;  %2100 = vmatmul.mubr.bf16.gmra.mrb[40].mxu1 %v2230_v3 }
  0x78   : > { %968 = vmatprep.mubr.bf16.mxu0 %v2231_v4  ;;  %2103 = vmatprep.mubr.bf16.mxu1 %v2233_v5 }
  0x7f   : > { %969 = vmatmul.mubr.bf16.gmra.mrb[44].mxu0 %v2234_v6  ;;  %2104 = vmatmul.mubr.bf16.gmra.mrb[44].mxu1 %v2235_v7 }
  0xfa   : > { %v1939_v8 = vpop.f32.mrb[0].mxu0  ;;  %v2011_v9 = vpop.f32.mrb[0].mxu1 }
  0xfb   : > { %v1940_v10 = vpop.f32.mrb[1].mxu0  ;;  %v2012_v11 = vpop.f32.mrb[1].mxu1 }
  0xfc   : > { %v1941_v12 = vadd.f32 %v1940_v10, %v1939_v8  ;;  %v2426_v13 = vadd.f32 %v2012_v11, %v2011_v9  ;;  %v1942_v14 = vpop.f32.mrb[2].mxu0  ;;  %v2014_v15 = vpop.f32.mrb[2].mxu1 }
  0xfd   : > { %v1943_v16 = vpop.f32.mrb[3].mxu0  ;;  %v2015_v17 = vpop.f32.mrb[3].mxu1 }
  0xfe   : > { %v1944_v18 = vadd.f32 %v1943_v16, %v1942_v14  ;;  %v2428_v19 = vadd.f32 %v2015_v17, %v2014_v15 }
 0x102   : > { %v1945_v20 = vpop.f32.mrb[4].mxu0  ;;  %v2017_v21 = vpop.f32.mrb[4].mxu1 }
 0x103   : > { %v1946_v22 = vpop.f32.mrb[5].mxu0  ;;  %v2018_v23 = vpop.f32.mrb[5].mxu1 }
 0x104   : > { %v1947_v24 = vadd.f32 %v1946_v22, %v1945_v20  ;;  %v2430_v25 = vadd.f32 %v2018_v23, %v2017_v21  ;;  %v1948_v26 = vpop.f32.mrb[6].mxu0  ;;  %v2020_v27 = vpop.f32.mrb[6].mxu1 }
 0x105   : > { %v1949_v28 = vpop.f32.mrb[7].mxu0  ;;  %v2021_v29 = vpop.f32.mrb[7].mxu1 }
 0x106   : > { %v1950_v30 = vadd.f32 %v1949_v28, %v1948_v26  ;;  %v2432_v31 = vadd.f32 %v2021_v29, %v2020_v27 }
 0x10a   : > { %v1951_v32 = vpop.f32.mrb[8].mxu0  ;;  %v2023_v33 = vpop.f32.mrb[8].mxu1 }
 0x10b   : > { %v1952_v34 = vpop.f32.mrb[9].mxu0  ;;  %v2024_v35 = vpop.f32.mrb[9].mxu1 }
 0x10c   : > { %v1953_v36 = vadd.f32 %v1952_v34, %v1951_v32  ;;  %v2434_v37 = vadd.f32 %v2024_v35, %v2023_v33  ;;  %v1954_v38 = vpop.f32.mrb[10].mxu0  ;;  %v2026_v39 = vpop.f32.mrb[10].mxu1 }
 0x10d   : > { %v1955_v40 = vpop.f32.mrb[11].mxu0  ;;  %v2027_v41 = vpop.f32.mrb[11].mxu1 }
 0x10e   : > { %v2436_v42 = vadd.f32 %v1955_v40, %v1954_v38  ;;  %v2438_v43 = vadd.f32 %v2027_v41, %v2026_v39 }
 0x112   : > { %v1957_v44 = vpop.f32.mrb[12].mxu0  ;;  %v2029_v45 = vpop.f32.mrb[12].mxu1 }
 0x113   : > { %v1958_v46 = vpop.f32.mrb[13].mxu0  ;;  %v2030_v47 = vpop.f32.mrb[13].mxu1 }
 0x114   : > { %v1959_v48 = vadd.f32 %v1958_v46, %v1957_v44  ;;  %v2440_v49 = vadd.f32 %v2030_v47, %v2029_v45  ;;  %v1960_v50 = vpop.f32.mrb[14].mxu0  ;;  %v2032_v51 = vpop.f32.mrb[14].mxu1 }
 0x115   : > { %v1961_v52 = vpop.f32.mrb[15].mxu0  ;;  %v2033_v53 = vpop.f32.mrb[15].mxu1 }
 0x116   : > { %v1962_v54 = vadd.f32 %v1961_v52, %v1960_v50  ;;  %v2442_v55 = vadd.f32 %v2033_v53, %v2032_v51 }
 0x11a   : > { %v1963_v56 = vpop.f32.mrb[16].mxu0  ;;  %v2077_v57 = vpop.f32.mrb[16].mxu1 }
 0x11b   : > { %v1052_v59 = vadd.f32 %v2077_v57, %v1947_v24  ;;  %v1964_v60 = vpop.f32.mrb[17].mxu0  ;;  %v1043_v61 = vpop.f32.mrb[17].mxu1 }
 0x11c   : > { %v2449_v62 = vadd.f32 %v1964_v60, %v1963_v56  ;;  %v1044_v63 = vadd.f32 %v1941_v12, %v1043_v61  ;;  %v1966_v0 = vpop.f32.mrb[18].mxu0  ;;  %v2078_v1 = vpop.f32.mrb[18].mxu1 }
 0x11d   : > { %v1278_v2 = vadd.f32 %v2447_v58, %v1052_v59  ;;  %v1055_v3 = vadd.f32 %v2078_v1, %v1950_v30  ;;  %v1967_v4 = vpop.f32.mrb[19].mxu0  ;;  %v1046_v5 = vpop.f32.mrb[19].mxu1 }
 0x11e   : > { %v1276_v6 = vadd.f32 %v2447_v58, %v1044_v63  ;;  %v2453_v7 = vadd.f32 %v1967_v4, %v1966_v0  ;;  %v1047_v8 = vadd.f32 %v1944_v18, %v1046_v5 }
 0x11f   : > { %v1342_v9 = vmul.f32 0.01, %v1278_v2  ;;  %v1279_v10 = vadd.f32 %v2447_v58, %v1055_v3  ;;  %vm1310_vm0 = vcmp.gt.f32.partialorder %v1278_v2, 0.0 }
 0x120   : > { %vm1308_vm1 = vcmp.gt.f32.partialorder %v1276_v6, 0.0  ;;  %v1340_v11 = vmul.f32 0.01, %v1276_v6  ;;  %v1277_v12 = vadd.f32 %v2447_v58, %v1047_v8 }
 0x121   : > { %vm1311_vm2 = vcmp.gt.f32.partialorder %v1279_v10, 0.0  ;;  %v1343_v14 = vmul.f32 0.01, %v1279_v10  ;;  %v1374_v20 = vsel %vm1310_vm0, %v1278_v2, %v1342_v9 }
 0x122   : > { %vm1309_vm3 = vcmp.gt.f32.partialorder %v1277_v12, 0.0  ;;  %v1341_v15 = vmul.f32 0.01, %v1277_v12  ;;  %v1969_v16 = vpop.f32.mrb[20].mxu0  ;;  %v2081_v17 = vpop.f32.mrb[20].mxu1  ;;  %v1372_v21 = vsel %vm1308_vm1, %v1276_v6, %v1340_v11 }
 0x123   : > { %v1375_v18 = vsel %vm1311_vm2, %v1279_v10, %v1343_v14  ;;  %v1068_v22 = vadd.f32 %v2081_v17, %v1959_v48  ;;  %v1970_v23 = vpop.f32.mrb[21].mxu0  ;;  %v1059_v24 = vpop.f32.mrb[21].mxu1 }
 0x124   : > { %v1836_v26 = vpack.c.bf16 %v1375_v18, %v1374_v20  ;;  %v1373_v27 = vsel %vm1309_vm3, %v1277_v12, %v1341_v15  ;;  %v1971_v28 = vadd.f32 %v1970_v23, %v1969_v16  ;;  %v1060_v29 = vadd.f32 %v1953_v36, %v1059_v24  ;;  %v1972_v30 = vpop.f32.mrb[22].mxu0  ;;  %v2082_v32 = vpop.f32.mrb[22].mxu1 }
 0x125   : > { %v1831_v33 = vpack.c.bf16 %v1373_v27, %v1372_v21  ;;  %v1282_v34 = vadd.f32 %v2447_v58, %v1068_v22  ;;  %v1071_v35 = vadd.f32 %v2082_v32, %v1962_v54  ;;  %v1973_v38 = vpop.f32.mrb[23].mxu0  ;;  %v1062_v39 = vpop.f32.mrb[23].mxu1 }
 0x126   : > { %1908 = vst [vmem:[%s2461_s28 + $0x8] sm:$0xff] %v1836_v26   ;;  %v1280_v40 = vadd.f32 %v2447_v58, %v1060_v29  ;;  %v1974_v41 = vadd.f32 %v1973_v38, %v1972_v30  ;;  %v1063_v44 = vadd.f32 %v2436_v42, %v1062_v39 }
 0x127   : > { %1832 = vst [vmem:[%s2461_s28] sm:$0xff] %v1831_v33   ;;  %v1346_v45 = vmul.f32 0.01, %v1282_v34  ;;  %v1283_v46 = vadd.f32 %v2447_v58, %v1071_v35  ;;  %vm1314_vm4 = vcmp.gt.f32.partialorder %v1282_v34, 0.0 }
 0x128   : > { %vm1312_vm5 = vcmp.gt.f32.partialorder %v1280_v40, 0.0  ;;  %v1344_v36 = vmul.f32 0.01, %v1280_v40  ;;  %v1281_v47 = vadd.f32 %v2447_v58, %v1063_v44 }
 0x129   : > { %vm1315_vm6 = vcmp.gt.f32.partialorder %v1283_v46, 0.0  ;;  %v1347_v48 = vmul.f32 0.01, %v1283_v46  ;;  %v1378_v53 = vsel %vm1314_vm4, %v1282_v34, %v1346_v45 }
 0x12a   : > { %vm1313_vm7 = vcmp.gt.f32.partialorder %v1281_v47, 0.0  ;;  %v1345_v50 = vmul.f32 0.01, %v1281_v47  ;;  %v1975_v51 = vpop.f32.mrb[24].mxu0  ;;  %v2085_v52 = vpop.f32.mrb[24].mxu1  ;;  %v1376_v54 = vsel %vm1312_vm5, %v1280_v40, %v1344_v36 }
 0x12b   : > { %v1379_v56 = vsel %vm1315_vm6, %v1283_v46, %v1347_v48  ;;  %v1084_v42 = vadd.f32 %v2085_v52, %v1971_v28  ;;  %v1976_v57 = vpop.f32.mrb[25].mxu0  ;;  %v1075_v59 = vpop.f32.mrb[25].mxu1 }
 0x12c   : > { %v1846_v60 = vpack.c.bf16 %v1379_v56, %v1378_v53  ;;  %v1377_v61 = vsel %vm1313_vm7, %v1281_v47, %v1345_v50  ;;  %v1977_v63 = vadd.f32 %v1976_v57, %v1975_v51  ;;  %v1076_v0 = vadd.f32 %v2449_v62, %v1075_v59  ;;  %v1978_v1 = vpop.f32.mrb[26].mxu0  ;;  %v2086_v2 = vpop.f32.mrb[26].mxu1 }
 0x12d   : > { %v1841_v3 = vpack.c.bf16 %v1377_v61, %v1376_v54  ;;  %v1286_v4 = vadd.f32 %v2447_v58, %v1084_v42  ;;  %v1087_v5 = vadd.f32 %v2086_v2, %v1974_v41  ;;  %v1979_v6 = vpop.f32.mrb[27].mxu0  ;;  %v1078_v8 = vpop.f32.mrb[27].mxu1 }
 0x12e   : > { %1910 = vst [vmem:[%s2461_s28 + $0x18] sm:$0xff] %v1846_v60   ;;  %v1284_v9 = vadd.f32 %v2447_v58, %v1076_v0  ;;  %v1980_v10 = vadd.f32 %v1979_v6, %v1978_v1  ;;  %v1079_v11 = vadd.f32 %v2453_v7, %v1078_v8 }
 0x12f   : > { %1909 = vst [vmem:[%s2461_s28 + $0x10] sm:$0xff] %v1841_v3   ;;  %v1350_v12 = vmul.f32 0.01, %v1286_v4  ;;  %v1287_v14 = vadd.f32 %v2447_v58, %v1087_v5  ;;  %vm1318_vm8 = vcmp.gt.f32.partialorder %v1286_v4, 0.0 }
 0x130   : > { %vm1316_vm9 = vcmp.gt.f32.partialorder %v1284_v9, 0.0  ;;  %v1348_v62 = vmul.f32 0.01, %v1284_v9  ;;  %v1285_v15 = vadd.f32 %v2447_v58, %v1079_v11 }
 0x131   : > { %vm1319_vm10 = vcmp.gt.f32.partialorder %v1287_v14, 0.0  ;;  %v1351_v16 = vmul.f32 0.01, %v1287_v14  ;;  %v1382_v18 = vsel %vm1318_vm8, %v1286_v4, %v1350_v12 }
 0x132   : > { %vm1317_vm11 = vcmp.gt.f32.partialorder %v1285_v15, 0.0  ;;  %v1349_v17 = vmul.f32 0.01, %v1285_v15  ;;  %v1981_v20 = vpop.f32.mrb[28].mxu0  ;;  %v2089_v21 = vpop.f32.mrb[28].mxu1  ;;  %v1380_v22 = vsel %vm1316_vm9, %v1284_v9, %v1348_v62 }
 0x133   : > { %v1383_v23 = vsel %vm1319_vm10, %v1287_v14, %v1351_v16  ;;  %v1982_v7 = vpop.f32.mrb[29].mxu0  ;;  %v1091_v24 = vpop.f32.mrb[29].mxu1 }
 0x134   : > { %v1856_v26 = vpack.c.bf16 %v1383_v23, %v1382_v18  ;;  %v1381_v27 = vsel %vm1317_vm11, %v1285_v15, %v1349_v17  ;;  %v1983_v28 = vadd.f32 %v1982_v7, %v1981_v20  ;;  %v1092_v29 = vadd.f32 %v1977_v63, %v1091_v24  ;;  %v1984_v30 = vpop.f32.mrb[30].mxu0  ;;  %v2090_v32 = vpop.f32.mrb[30].mxu1 }
 0x135   : > { %v1851_v33 = vpack.c.bf16 %v1381_v27, %v1380_v22  ;;  %v1985_v34 = vpop.f32.mrb[31].mxu0  ;;  %v1094_v35 = vpop.f32.mrb[31].mxu1 }
 0x136   : > { %1912 = vst [vmem:[%s2461_s28 + $0x28] sm:$0xff] %v1856_v26   ;;  %v1100_v38 = vadd.f32 %v2089_v21, %v1983_v28  ;;  %v1288_v39 = vadd.f32 %v2447_v58, %v1092_v29  ;;  %v1986_v40 = vadd.f32 %v1985_v34, %v1984_v30  ;;  %v1095_v41 = vadd.f32 %v1980_v10, %v1094_v35 }
 0x137   : > { %1911 = vst [vmem:[%s2461_s28 + $0x20] sm:$0xff] %v1851_v33  }
 0x138   : > { %v1290_v44 = vadd.f32 %v2447_v58, %v1100_v38  ;;  %v1103_v45 = vadd.f32 %v2090_v32, %v1986_v40  ;;  %v1352_v46 = vmul.f32 0.01, %v1288_v39  ;;  %v1289_v36 = vadd.f32 %v2447_v58, %v1095_v41 }
 0x139   : > { %vm1320_vm13 = vcmp.gt.f32.partialorder %v1288_v39, 0.0 }
 0x13a   : > { %vm1322_vm12 = vcmp.gt.f32.partialorder %v1290_v44, 0.0  ;;  %v1354_v47 = vmul.f32 0.01, %v1290_v44  ;;  %v1291_v48 = vadd.f32 %v2447_v58, %v1103_v45  ;;  %v1987_v50 = vpop.f32.mrb[32].mxu0  ;;  %v2093_v51 = vpop.f32.mrb[32].mxu1  ;;  %vm1321_vm14 = vcmp.gt.f32.partialorder %v1289_v36, 0.0 }
 0x13b   : > { %v1353_v52 = vmul.f32 0.01, %v1289_v36  ;;  %v1988_v53 = vpop.f32.mrb[33].mxu0  ;;  %v1107_v54 = vpop.f32.mrb[33].mxu1  ;;  %v1384_v61 = vsel %vm1320_vm13, %v1288_v39, %v1352_v46 }
 0x13c   : > { %vm1323_vm15 = vcmp.gt.f32.partialorder %v1291_v48, 0.0  ;;  %v1355_v56 = vmul.f32 0.01, %v1291_v48  ;;  %v1989_v42 = vadd.f32 %v1988_v53, %v1987_v50  ;;  %v1990_v57 = vpop.f32.mrb[34].mxu0  ;;  %v2094_v59 = vpop.f32.mrb[34].mxu1  ;;  %v1386_v60 = vsel %vm1322_vm12, %v1290_v44, %v1354_v47 }
 0x13d   : > { %v1385_v63 = vsel %vm1321_vm14, %v1289_v36, %v1353_v52  ;;  %v1991_v0 = vpop.f32.mrb[35].mxu0  ;;  %v1110_v1 = vpop.f32.mrb[35].mxu1 }
 0x13e   : > { %v1387_v2 = vsel %vm1323_vm15, %v1291_v48, %v1355_v56  ;;  %v1861_v3 = vpack.c.bf16 %v1385_v63, %v1384_v61  ;;  %v1108_v4 = vadd.f32 %v1989_v42, %v1107_v54  ;;  %v1992_v5 = vadd.f32 %v1991_v0, %v1990_v57 }
 0x13f   : > { %v1866_v6 = vpack.c.bf16 %v1387_v2, %v1386_v60 }
 0x140   : > { %1913 = vst [vmem:[%s2461_s28 + $0x30] sm:$0xff] %v1861_v3   ;;  %v1292_v8 = vadd.f32 %v2447_v58, %v1108_v4  ;;  %v1111_v9 = vadd.f32 %v1992_v5, %v1110_v1 }
 0x141   : > { %1914 = vst [vmem:[%s2461_s28 + $0x38] sm:$0xff] %v1866_v6  }
 0x142   : > { %v1356_v10 = vmul.f32 0.01, %v1292_v8  ;;  %v1293_v11 = vadd.f32 %v2447_v58, %v1111_v9  ;;  %v1993_v12 = vpop.f32.mrb[36].mxu0  ;;  %v2488_v14 = vpop.f32.mrb[36].mxu1  ;;  %vm1324_vm0 = vcmp.gt.f32.partialorder %v1292_v8, 0.0 }
 0x143   : > { %v1994_v62 = vpop.f32.mrb[37].mxu0  ;;  %v1123_v15 = vpop.f32.mrb[37].mxu1 }
 0x144   : > { %vm1325_vm1 = vcmp.gt.f32.partialorder %v1293_v11, 0.0  ;;  %v1357_v16 = vmul.f32 0.01, %v1293_v11  ;;  %v1995_v17 = vadd.f32 %v1994_v62, %v1993_v12  ;;  %v1996_v20 = vpop.f32.mrb[38].mxu0  ;;  %v2490_v21 = vpop.f32.mrb[38].mxu1  ;;  %v1388_v23 = vsel %vm1324_vm0, %v1292_v8, %v1356_v10 }
 0x145   : > { %v1997_v18 = vpop.f32.mrb[39].mxu0  ;;  %v1126_v22 = vpop.f32.mrb[39].mxu1 }
 0x146   : > { %v1389_v7 = vsel %vm1325_vm1, %v1293_v11, %v1357_v16  ;;  %v1116_v24 = vadd.f32 %v2093_v51, %v1995_v17  ;;  %v1998_v26 = vadd.f32 %v1997_v18, %v1996_v20 }
 0x147   : > { %v1871_v27 = vpack.c.bf16 %v1389_v7, %v1388_v23 }
 0x148   : > { %v1294_v28 = vadd.f32 %v2447_v58, %v1116_v24  ;;  %v1119_v29 = vadd.f32 %v2094_v59, %v1998_v26 }
 0x149   : > { %1915 = vst [vmem:[%s2461_s28 + $0x40] sm:$0xff] %v1871_v27  }
 0x14a   : > { %vm1326_vm2 = vcmp.gt.f32.partialorder %v1294_v28, 0.0  ;;  %v1358_v30 = vmul.f32 0.01, %v1294_v28  ;;  %v1295_v32 = vadd.f32 %v2447_v58, %v1119_v29  ;;  %v1999_v33 = vpop.f32.mrb[40].mxu0  ;;  %v2101_v34 = vpop.f32.mrb[40].mxu1 }
 0x14b   : > { %v1148_v35 = vadd.f32 %v2101_v34, %v2430_v25  ;;  %v2000_v38 = vpop.f32.mrb[41].mxu0  ;;  %v1139_v39 = vpop.f32.mrb[41].mxu1 }
 0x14c   : > { %vm1327_vm3 = vcmp.gt.f32.partialorder %v1295_v32, 0.0  ;;  %v1359_v40 = vmul.f32 0.01, %v1295_v32  ;;  %v2001_v41 = vadd.f32 %v2000_v38, %v1999_v33  ;;  %v2002_v44 = vpop.f32.mrb[42].mxu0  ;;  %v2102_v45 = vpop.f32.mrb[42].mxu1  ;;  %v1390_v46 = vsel %vm1326_vm2, %v1294_v28, %v1358_v30 }
 0x14d   : > { %v1302_v36 = vadd.f32 %v2447_v58, %v1148_v35  ;;  %v1140_v47 = vadd.f32 %v2426_v13, %v1139_v39  ;;  %v1151_v48 = vadd.f32 %v2102_v45, %v2432_v31  ;;  %v2003_v50 = vpop.f32.mrb[43].mxu0  ;;  %v1142_v51 = vpop.f32.mrb[43].mxu1 }
 0x14e   : > { %v1391_v52 = vsel %vm1327_vm3, %v1295_v32, %v1359_v40  ;;  %v1124_v53 = vadd.f32 %v2001_v41, %v1123_v15  ;;  %v2004_v25 = vadd.f32 %v2003_v50, %v2002_v44  ;;  %v1143_v54 = vadd.f32 %v2428_v19, %v1142_v51 }
 0x14f   : > { %v1876_v56 = vpack.c.bf16 %v1391_v52, %v1390_v46  ;;  %vm1334_vm4 = vcmp.gt.f32.partialorder %v1302_v36, 0.0  ;;  %v1366_v42 = vmul.f32 0.01, %v1302_v36  ;;  %v1300_v57 = vadd.f32 %v2447_v58, %v1140_v47 }
 0x150   : > { %v1296_v59 = vadd.f32 %v2447_v58, %v1124_v53  ;;  %v1303_v60 = vadd.f32 %v2447_v58, %v1151_v48  ;;  %v1127_v13 = vadd.f32 %v2004_v25, %v1126_v22  ;;  %v1301_v61 = vadd.f32 %v2447_v58, %v1143_v54 }
 0x151   : > { %1916 = vst [vmem:[%s2461_s28 + $0x48] sm:$0xff] %v1876_v56   ;;  %vm1332_vm5 = vcmp.gt.f32.partialorder %v1300_v57, 0.0  ;;  %v1364_v31 = vmul.f32 0.01, %v1300_v57  ;;  %v1398_v19 = vsel %vm1334_vm4, %v1302_v36, %v1366_v42 }
 0x152   : > { %vm1328_vm6 = vcmp.gt.f32.partialorder %v1296_v59, 0.0  ;;  %v1360_v63 = vmul.f32 0.01, %v1296_v59  ;;  %vm1335_vm7 = vcmp.gt.f32.partialorder %v1303_v60, 0.0  ;;  %v1367_v0 = vmul.f32 0.01, %v1303_v60 }
 0x153   : > { %v1297_v1 = vadd.f32 %v2447_v58, %v1127_v13  ;;  %vm1333_vm8 = vcmp.gt.f32.partialorder %v1301_v61, 0.0  ;;  %v1365_v2 = vmul.f32 0.01, %v1301_v61  ;;  %v2005_v3 = vpop.f32.mrb[44].mxu0  ;;  %v2105_v4 = vpop.f32.mrb[44].mxu1  ;;  %v1396_v6 = vsel %vm1332_vm5, %v1300_v57, %v1364_v31 }
 0x154   : > { %v1392_v5 = vsel %vm1328_vm6, %v1296_v59, %v1360_v63  ;;  %v1399_v8 = vsel %vm1335_vm7, %v1303_v60, %v1367_v0  ;;  %v1164_v9 = vadd.f32 %v2105_v4, %v2440_v49  ;;  %v2006_v10 = vpop.f32.mrb[45].mxu0  ;;  %v1155_v11 = vpop.f32.mrb[45].mxu1 }
 0x155   : > { %v1896_v12 = vpack.c.bf16 %v1399_v8, %v1398_v19  ;;  %vm1329_vm9 = vcmp.gt.f32.partialorder %v1297_v1, 0.0  ;;  %v1361_v62 = vmul.f32 0.01, %v1297_v1  ;;  %v1397_v15 = vsel %vm1333_vm8, %v1301_v61, %v1365_v2  ;;  %v2008_v16 = vpop.f32.mrb[46].mxu0  ;;  %v2106_v17 = vpop.f32.mrb[46].mxu1 }
 0x156   : > { %v1891_v20 = vpack.c.bf16 %v1397_v15, %v1396_v6  ;;  %v1306_v18 = vadd.f32 %v2447_v58, %v1164_v9  ;;  %v2007_v22 = vadd.f32 %v2006_v10, %v2005_v3  ;;  %v1156_v23 = vadd.f32 %v2434_v37, %v1155_v11  ;;  %v2009_v7 = vpop.f32.mrb[47].mxu0  ;;  %v1158_v24 = vpop.f32.mrb[47].mxu1 }
 0x157   : > { %1920 = vst [vmem:[%s2461_s28 + $0x68] sm:$0xff] %v1896_v12   ;;  %v1393_v49 = vsel %vm1329_vm9, %v1297_v1, %v1361_v62  ;;  %v1167_v26 = vadd.f32 %v2106_v17, %v2442_v55  ;;  %v2010_v27 = vadd.f32 %v2009_v7, %v2008_v16  ;;  %v1159_v28 = vadd.f32 %v2438_v43, %v1158_v24 }
 0x158   : > { %v1881_v29 = vpack.c.bf16 %v1393_v49, %v1392_v5  ;;  %1919 = vst [vmem:[%s2461_s28 + $0x60] sm:$0xff] %v1891_v20   ;;  %v1370_v30 = vmul.f32 0.01, %v1306_v18  ;;  %v1132_v32 = vadd.f32 %v2488_v14, %v2007_v22  ;;  %v1304_v33 = vadd.f32 %v2447_v58, %v1156_v23 }
 0x159   : > { %v1307_v34 = vadd.f32 %v2447_v58, %v1167_v26  ;;  %v1135_v37 = vadd.f32 %v2490_v21, %v2010_v27  ;;  %v1305_v35 = vadd.f32 %v2447_v58, %v1159_v28  ;;  %vm1338_vm10 = vcmp.gt.f32.partialorder %v1306_v18, 0.0 }
 0x15a   : > { %1917 = vst [vmem:[%s2461_s28 + $0x50] sm:$0xff] %v1881_v29   ;;  %v1298_v55 = vadd.f32 %v2447_v58, %v1132_v32  ;;  %v1368_v38 = vmul.f32 0.01, %v1304_v33  ;;  %vm1336_vm12 = vcmp.gt.f32.partialorder %v1304_v33, 0.0  ;;  %v1402_v40 = vsel %vm1338_vm10, %v1306_v18, %v1370_v30 }
 0x15b   : > { %vm1339_vm11 = vcmp.gt.f32.partialorder %v1307_v34, 0.0  ;;  %v1371_v43 = vmul.f32 0.01, %v1307_v34  ;;  %v1299_v14 = vadd.f32 %v2447_v58, %v1135_v37  ;;  %vm1337_vm13 = vcmp.gt.f32.partialorder %v1305_v35, 0.0 }
 0x15c   : > { %v1362_v39 = vmul.f32 0.01, %v1298_v55  ;;  %vm1330_vm14 = vcmp.gt.f32.partialorder %v1298_v55, 0.0  ;;  %v1369_v41 = vmul.f32 0.01, %v1305_v35  ;;  %v1400_v46 = vsel %vm1336_vm12, %v1304_v33, %v1368_v38 }
 0x15d   : > { %v1403_v21 = vsel %vm1339_vm11, %v1307_v34, %v1371_v43  ;;  %vm1331_vm15 = vcmp.gt.f32.partialorder %v1299_v14, 0.0  ;;  %v1363_v45 = vmul.f32 0.01, %v1299_v14 }
 0x15e   : > { %v1906_v44 = vpack.c.bf16 %v1403_v21, %v1402_v40  ;;  %v1401_v36 = vsel %vm1337_vm13, %v1305_v35, %v1369_v41  ;;  %v1394_v47 = vsel %vm1330_vm14, %v1298_v55, %v1362_v39 }
 0x15f   : > { %v1395_v48 = vsel %vm1331_vm15, %v1299_v14, %v1363_v45  ;;  %v1901_v50 = vpack.c.bf16 %v1401_v36, %v1400_v46 }
 0x160   : > { %1922 = vst [vmem:[%s2461_s28 + $0x78] sm:$0xff] %v1906_v44   ;;  %v1886_v51 = vpack.c.bf16 %v1395_v48, %v1394_v47 }
 0x161   : > { %1921 = vst [vmem:[%s2461_s28 + $0x70] sm:$0xff] %v1901_v50  }
 0x162   : > { %1918 = vst [vmem:[%s2461_s28 + $0x58] sm:$0xff] %v1886_v51  }
 0x163 PF: > { %s13_s14 = sadd.s32 1, %s2258_s14   ;;  %s2537_s12 = smov %s2254_s13 }
 0x164   : > { %p10_p5 = scmp.ge.s32.totalorder %s13_s14, 4   ;;  %s2538_s13 = smov %s2540_s15 }
 0x166   :  { %12 = sbr.rel (!%p10_p5) target bundleno = 2 (0x2), region = 76 }

// kernel: _lambda_.6
= control target key start
LH: loop header
LB: loop body
LE: loop exit
PB: predicated region body
PF: predicated region fallthrough
CT: control target
= control target key end

     0   :  { %s1563_s12 = smov 0   ;;  %s1565_s13 = smov 0   ;;  %s1706_s0 = inlined_call_operand.vmem [shape: bf16[512,128], index: 0, kind: input, shape index: {}]   ;;  %s1707_s1 = inlined_call_operand.vmem [shape: bf16[128,128], index: 1, kind: input, shape index: {}]   ;;  %s1708_s2 = inlined_call_operand.vmem [shape: f32[1,128], index: 2, kind: input, shape index: {}]   ;;  %s1709_s3 = inlined_call_operand.vmem [shape: bf16[512,128], index: 3, kind: output, shape index: {}]  }
   0x1   :  { %s1567_s14 = smov 0  }
   0x2 LB: > { %s32_s15 = sadd.s32 1, %s1537_s13  ;;  %p1192_p0 = scmp.ge.s32.totalorder %s1541_s14, 1  ;;  %s1541_s14 = sphi %s1567_s14, %s13_s14   ;;  %s1537_s13 = sphi %s1565_s13, %s1711_s13   ;;  %s1533_s12 = sphi %s1563_s12, %s1710_s12  }
   0x3   : > { %p34_p1 = scmp.ge.s32.totalorder %s32_s15, 2  ;;  %p188_p2 = scmp.lt.s32.totalorder %s1541_s14, 3 }
   0x5   : > { %s1713_s15 = smov (%p34_p1, %s32_s15), 0  ;;  %p189_p3 = pnand %p1192_p0, %p188_p2 }
   0x6   : > { %v1495_v0 = vld [vmem:[%s1707_s1] sm:$0xff] (!%p189_p3)   ;;  %s1193_s18 = sshll.u32 (!%p189_p3), %s1533_s12, 5  ;;  %v1496_v1 = vld [vmem:[%s1707_s1 + $0x8] sm:$0xff] (!%p189_p3)   ;;  %v1497_v2 = vld [vmem:[%s1707_s1 + $0x10] sm:$0xff] (!%p189_p3)  }
   0x7   : > { %192 = sbr.rel (%p189_p3) target bundleno = 294 (0x126), region = 32  ;;  %p230_p4 = scmp.lt.s32.totalorder (!%p189_p3), %s1193_s18, 63  ;;  %1407 = vmatprep.subr.bf16.mxu0 (!%p189_p3), %v1495_v0  ;;  %1455 = vmatprep.subr.bf16.mxu1 (!%p189_p3), %v1495_v0  ;;  %v1498_v3 = vld [vmem:[%s1707_s1 + $0x18] sm:$0xff] (!%p189_p3)   ;;  %v1499_v6 = vld [vmem:[%s1707_s1 + $0x20] sm:$0xff] (!%p189_p3)   ;;  %v1500_v7 = vld [vmem:[%s1707_s1 + $0x28] sm:$0xff] (!%p189_p3)  }
   0x8   : > { %1408 = vmatpush3.bf16.msra.mxu0 (!%p189_p3), %v1495_v0  ;;  %1463 = vmatpush3.bf16.msra.mxu1 (!%p189_p3), %v1495_v0  ;;  %v1501_v8 = vld [vmem:[%s1707_s1 + $0x30] sm:$0xff] (!%p189_p3)   ;;  %v1502_v9 = vld [vmem:[%s1707_s1 + $0x38] sm:$0xff] (!%p189_p3)   ;;  %v1634_v24 = vld [vmem:[%s1708_s2] ss:$0 sm:$0xff] (!%p189_p3) }
   0x9   : > { %1409 = vmatprep.subr.bf16.mxu0 (!%p189_p3), %v1496_v1  ;;  %1456 = vmatprep.subr.bf16.mxu1 (!%p189_p3), %v1496_v1 }
   0xc   : > { %1410 = vmatpush3.bf16.msra.mxu0 (!%p189_p3), %v1496_v1  ;;  %1464 = vmatpush3.bf16.msra.mxu1 (!%p189_p3), %v1496_v1 }
   0xd   : > { %1411 = vmatprep.subr.bf16.mxu0 (!%p189_p3), %v1497_v2  ;;  %1457 = vmatprep.subr.bf16.mxu1 (!%p189_p3), %v1497_v2 }
   0xe   : > { %s1715_s18 = smov (!%p230_p4, %s1193_s18), 63 }
   0xf   : > { %s1194_s23 = sshll.u32 %s1715_s18, 2 }
  0x10   : > { %s1598_s26 = scalar_lea.vmem %s1706_s0, %s1194_s23  ;;  %1412 = vmatpush3.bf16.msra.mxu0 %v1497_v2  ;;  %1465 = vmatpush3.bf16.msra.mxu1 %v1497_v2  ;;  %s1651_s17 = scalar_lea.vmem %s1709_s3, %s1194_s23 }
  0x11   : > { %v1503_v4 = vld [vmem:[%s1598_s26] sm:$0xff]   ;;  %1413 = vmatprep.subr.bf16.mxu0 %v1498_v3  ;;  %1458 = vmatprep.subr.bf16.mxu1 %v1498_v3  ;;  %v1505_v10 = vld [vmem:[%s1598_s26 + $0x8] sm:$0xff]   ;;  %v1507_v12 = vld [vmem:[%s1598_s26 + $0x10] sm:$0xff]  }
  0x12   : > { %v1504_v5 = vld [vmem:[%s1598_s26 + $0x40] sm:$0xff]   ;;  %1423 = vmatprep.mubr.bf16.mxu0 %v1503_v4  ;;  %v1506_v11 = vld [vmem:[%s1598_s26 + $0x48] sm:$0xff]   ;;  %v1508_v13 = vld [vmem:[%s1598_s26 + $0x50] sm:$0xff]  }
  0x13   : > { %1439 = vmatprep.mubr.bf16.mxu1 %v1504_v5  ;;  %v1509_v14 = vld [vmem:[%s1598_s26 + $0x18] sm:$0xff]   ;;  %v1511_v16 = vld [vmem:[%s1598_s26 + $0x20] sm:$0xff]   ;;  %v1513_v18 = vld [vmem:[%s1598_s26 + $0x28] sm:$0xff]  }
  0x14   : > { %1414 = vmatpush3.bf16.msra.mxu0 %v1498_v3  ;;  %1466 = vmatpush3.bf16.msra.mxu1 %v1498_v3  ;;  %v1510_v15 = vld [vmem:[%s1598_s26 + $0x58] sm:$0xff]   ;;  %v1512_v17 = vld [vmem:[%s1598_s26 + $0x60] sm:$0xff]   ;;  %v1514_v19 = vld [vmem:[%s1598_s26 + $0x68] sm:$0xff]  }
  0x15   : > { %1415 = vmatprep.subr.bf16.mxu0 %v1499_v6  ;;  %1459 = vmatprep.subr.bf16.mxu1 %v1499_v6  ;;  %v1515_v20 = vld [vmem:[%s1598_s26 + $0x30] sm:$0xff]   ;;  %v1517_v22 = vld [vmem:[%s1598_s26 + $0x38] sm:$0xff]  }
  0x16   : > { %v1516_v21 = vld [vmem:[%s1598_s26 + $0x70] sm:$0xff]   ;;  %v1518_v23 = vld [vmem:[%s1598_s26 + $0x78] sm:$0xff]  }
  0x18   : > { %1416 = vmatpush3.bf16.msra.mxu0 %v1499_v6  ;;  %1467 = vmatpush3.bf16.msra.mxu1 %v1499_v6 }
  0x19   : > { %1417 = vmatprep.subr.bf16.mxu0 %v1500_v7  ;;  %1460 = vmatprep.subr.bf16.mxu1 %v1500_v7 }
  0x1c   : > { %1418 = vmatpush3.bf16.msra.mxu0 %v1500_v7  ;;  %1468 = vmatpush3.bf16.msra.mxu1 %v1500_v7 }
  0x1d   : > { %1419 = vmatprep.subr.bf16.mxu0 %v1501_v8  ;;  %1461 = vmatprep.subr.bf16.mxu1 %v1501_v8 }
  0x20   : > { %1420 = vmatpush3.bf16.msra.mxu0 %v1501_v8  ;;  %1469 = vmatpush3.bf16.msra.mxu1 %v1501_v8 }
  0x21   : > { %1421 = vmatprep.subr.bf16.mxu0 %v1502_v9  ;;  %1462 = vmatprep.subr.bf16.mxu1 %v1502_v9 }
  0x24   : > { %1422 = vmatpush3.bf16.msra.mxu0 %v1502_v9  ;;  %1470 = vmatpush3.bf16.msra.mxu1 %v1502_v9 }
  0x27   : > { %1424 = vmatmul.mubr.bf16.vlgmr.msra.gmra.mrb[0].mxu0 %v1505_v10  ;;  %1440 = vmatmul.mubr.bf16.vlgmr.msra.gmra.mrb[0].mxu1 %v1506_v11 }
  0x28   : > { %1427 = vmatprep.mubr.bf16.mxu0 %v1507_v12  ;;  %1443 = vmatprep.mubr.bf16.mxu1 %v1508_v13 }
  0x2f   : > { %1428 = vmatmul.mubr.bf16.gmra.mrb[4].mxu0 %v1509_v14  ;;  %1444 = vmatmul.mubr.bf16.gmra.mrb[4].mxu1 %v1510_v15 }
  0x30   : > { %1431 = vmatprep.mubr.bf16.mxu0 %v1511_v16  ;;  %1447 = vmatprep.mubr.bf16.mxu1 %v1512_v17 }
  0x37   : > { %1432 = vmatmul.mubr.bf16.gmra.mrb[8].mxu0 %v1513_v18  ;;  %1448 = vmatmul.mubr.bf16.gmra.mrb[8].mxu1 %v1514_v19 }
  0x38   : > { %1435 = vmatprep.mubr.bf16.mxu0 %v1515_v20  ;;  %1451 = vmatprep.mubr.bf16.mxu1 %v1516_v21 }
  0x3f   : > { %1436 = vmatmul.mubr.bf16.gmra.mrb[12].mxu0 %v1517_v22  ;;  %1452 = vmatmul.mubr.bf16.gmra.mrb[12].mxu1 %v1518_v23 }
  0xfa   : > { %v1425_v25 = vpop.f32.mrb[0].mxu0  ;;  %v1441_v26 = vpop.f32.mrb[0].mxu1 }
  0xfb   : > { %v789_v27 = vadd.f32 %v1425_v25, %v1634_v24  ;;  %v805_v28 = vadd.f32 %v1441_v26, %v1634_v24  ;;  %v554_v29 = vpop.f32.mrb[1].mxu0  ;;  %v618_v30 = vpop.f32.mrb[1].mxu1 }
  0xfc   : > { %v787_v31 = vadd.f32 %v1634_v24, %v554_v29  ;;  %v803_v32 = vadd.f32 %v1634_v24, %v618_v30  ;;  %v1426_v33 = vpop.f32.mrb[2].mxu0  ;;  %v1442_v34 = vpop.f32.mrb[2].mxu1 }
  0xfd   : > { %vm821_vm0 = vcmp.gt.f32.partialorder %v789_v27, 0.0  ;;  %v853_v35 = vmul.f32 0.01, %v789_v27  ;;  %vm837_vm1 = vcmp.gt.f32.partialorder %v805_v28, 0.0  ;;  %v869_v36 = vmul.f32 0.01, %v805_v28 }
  0xfe   : > { %vm819_vm2 = vcmp.gt.f32.partialorder %v787_v31, 0.0  ;;  %v851_v37 = vmul.f32 0.01, %v787_v31  ;;  %vm835_vm3 = vcmp.gt.f32.partialorder %v803_v32, 0.0  ;;  %v867_v38 = vmul.f32 0.01, %v803_v32 }
  0xff   : > { %v790_v39 = vadd.f32 %v1426_v33, %v1634_v24  ;;  %v806_v40 = vadd.f32 %v1442_v34, %v1634_v24  ;;  %v557_v41 = vpop.f32.mrb[3].mxu0  ;;  %v621_v42 = vpop.f32.mrb[3].mxu1  ;;  %v885_v43 = vsel %vm821_vm0, %v789_v27, %v853_v35  ;;  %v901_v44 = vsel %vm837_vm1, %v805_v28, %v869_v36 }
 0x100   : > { %v788_v45 = vadd.f32 %v1634_v24, %v557_v41  ;;  %v804_v46 = vadd.f32 %v1634_v24, %v621_v42  ;;  %v883_v51 = vsel %vm819_vm2, %v787_v31, %v851_v37  ;;  %v899_v52 = vsel %vm835_vm3, %v803_v32, %v867_v38 }
 0x101   : > { %vm822_vm4 = vcmp.gt.f32.partialorder %v790_v39, 0.0  ;;  %v854_v47 = vmul.f32 0.01, %v790_v39  ;;  %vm838_vm5 = vcmp.gt.f32.partialorder %v806_v40, 0.0  ;;  %v870_v48 = vmul.f32 0.01, %v806_v40 }
 0x102   : > { %vm820_vm6 = vcmp.gt.f32.partialorder %v788_v45, 0.0  ;;  %v852_v49 = vmul.f32 0.01, %v788_v45  ;;  %vm836_vm7 = vcmp.gt.f32.partialorder %v804_v46, 0.0  ;;  %v868_v50 = vmul.f32 0.01, %v804_v46 }
 0x103   : > { %v886_v53 = vsel %vm822_vm4, %v790_v39, %v854_v47  ;;  %v902_v54 = vsel %vm838_vm5, %v806_v40, %v870_v48  ;;  %v1429_v55 = vpop.f32.mrb[4].mxu0  ;;  %v1445_v56 = vpop.f32.mrb[4].mxu1 }
 0x104   : > { %v1296_v57 = vpack.c.bf16 %v886_v53, %v885_v43  ;;  %v1336_v58 = vpack.c.bf16 %v902_v54, %v901_v44  ;;  %v884_v59 = vsel %vm820_vm6, %v788_v45, %v852_v49  ;;  %v900_v60 = vsel %vm836_vm7, %v804_v46, %v868_v50  ;;  %v570_v61 = vpop.f32.mrb[5].mxu0  ;;  %v634_v62 = vpop.f32.mrb[5].mxu1 }
 0x105   : > { %v1291_v63 = vpack.c.bf16 %v884_v59, %v883_v51  ;;  %v1331_v0 = vpack.c.bf16 %v900_v60, %v899_v52  ;;  %v793_v1 = vadd.f32 %v1429_v55, %v1634_v24  ;;  %v809_v2 = vadd.f32 %v1445_v56, %v1634_v24  ;;  %v1430_v3 = vpop.f32.mrb[6].mxu0  ;;  %v1446_v4 = vpop.f32.mrb[6].mxu1 }
 0x106   : > { %1368 = vst [vmem:[%s1651_s17 + $0x8] sm:$0xff] %v1296_v57   ;;  %1376 = vst [vmem:[%s1651_s17 + $0x48] sm:$0xff] %v1336_v58   ;;  %v791_v5 = vadd.f32 %v1634_v24, %v570_v61  ;;  %v807_v6 = vadd.f32 %v1634_v24, %v634_v62  ;;  %v794_v7 = vadd.f32 %v1430_v3, %v1634_v24  ;;  %v573_v9 = vpop.f32.mrb[7].mxu0  ;;  %v637_v10 = vpop.f32.mrb[7].mxu1 }
 0x107   : > { %v810_v8 = vadd.f32 %v1446_v4, %v1634_v24  ;;  %1292 = vst [vmem:[%s1651_s17] sm:$0xff] %v1291_v63   ;;  %1375 = vst [vmem:[%s1651_s17 + $0x40] sm:$0xff] %v1331_v0   ;;  %vm825_vm8 = vcmp.gt.f32.partialorder %v793_v1, 0.0  ;;  %v857_v11 = vmul.f32 0.01, %v793_v1  ;;  %vm841_vm9 = vcmp.gt.f32.partialorder %v809_v2, 0.0 }
 0x108   : > { %v873_v12 = vmul.f32 0.01, %v809_v2  ;;  %vm823_vm10 = vcmp.gt.f32.partialorder %v791_v5, 0.0  ;;  %v855_v13 = vmul.f32 0.01, %v791_v5  ;;  %vm839_vm11 = vcmp.gt.f32.partialorder %v807_v6, 0.0 }
 0x109   : > { %v889_v14 = vsel %vm825_vm8, %v793_v1, %v857_v11  ;;  %v871_v15 = vmul.f32 0.01, %v807_v6  ;;  %vm826_vm12 = vcmp.gt.f32.partialorder %v794_v7, 0.0  ;;  %v858_v16 = vmul.f32 0.01, %v794_v7 }
 0x10a   : > { %v905_v17 = vsel %vm841_vm9, %v809_v2, %v873_v12  ;;  %v887_v18 = vsel %vm823_vm10, %v791_v5, %v855_v13  ;;  %vm842_vm13 = vcmp.gt.f32.partialorder %v810_v8, 0.0  ;;  %v874_v19 = vmul.f32 0.01, %v810_v8  ;;  %v1433_v20 = vpop.f32.mrb[8].mxu0  ;;  %v1449_v21 = vpop.f32.mrb[8].mxu1 }
 0x10b   : > { %v890_v22 = vsel %vm826_vm12, %v794_v7, %v858_v16  ;;  %v792_v23 = vadd.f32 %v1634_v24, %v573_v9  ;;  %v808_v25 = vadd.f32 %v1634_v24, %v637_v10  ;;  %v797_v26 = vadd.f32 %v1433_v20, %v1634_v24  ;;  %v586_v27 = vpop.f32.mrb[9].mxu0  ;;  %v650_v28 = vpop.f32.mrb[9].mxu1 }
 0x10c   : > { %v1306_v29 = vpack.c.bf16 %v890_v22, %v889_v14  ;;  %v906_v30 = vsel %vm842_vm13, %v810_v8, %v874_v19  ;;  %v813_v31 = vadd.f32 %v1449_v21, %v1634_v24  ;;  %v795_v32 = vadd.f32 %v1634_v24, %v586_v27  ;;  %v1434_v33 = vpop.f32.mrb[10].mxu0  ;;  %v1450_v34 = vpop.f32.mrb[10].mxu1 }
 0x10d   : > { %v1346_v35 = vpack.c.bf16 %v906_v30, %v905_v17  ;;  %vm824_vm14 = vcmp.gt.f32.partialorder %v792_v23, 0.0  ;;  %v856_v36 = vmul.f32 0.01, %v792_v23  ;;  %vm840_vm15 = vcmp.gt.f32.partialorder %v808_v25, 0.0  ;;  %v589_v37 = vpop.f32.mrb[11].mxu0  ;;  %v653_v38 = vpop.f32.mrb[11].mxu1 }
 0x10e   : > { %1370 = vst [vmem:[%s1651_s17 + $0x18] sm:$0xff] %v1306_v29   ;;  %v872_v39 = vmul.f32 0.01, %v808_v25  ;;  %vm829_vm0 = vcmp.gt.f32.partialorder %v797_v26, 0.0  ;;  %v861_v40 = vmul.f32 0.01, %v797_v26  ;;  %v903_v41 = vsel %vm839_vm11, %v807_v6, %v871_v15 }
 0x10f   : > { %vm845_vm1 = vcmp.gt.f32.partialorder %v813_v31, 0.0  ;;  %1378 = vst [vmem:[%s1651_s17 + $0x58] sm:$0xff] %v1346_v35   ;;  %v888_v42 = vsel %vm824_vm14, %v792_v23, %v856_v36  ;;  %v877_v43 = vmul.f32 0.01, %v813_v31  ;;  %vm827_vm2 = vcmp.gt.f32.partialorder %v795_v32, 0.0 }
 0x110   : > { %v1301_v44 = vpack.c.bf16 %v888_v42, %v887_v18  ;;  %v904_v45 = vsel %vm840_vm15, %v808_v25, %v872_v39  ;;  %v859_v46 = vmul.f32 0.01, %v795_v32  ;;  %v811_v47 = vadd.f32 %v1634_v24, %v650_v28 }
 0x111   : > { %v1341_v48 = vpack.c.bf16 %v904_v45, %v903_v41  ;;  %v893_v49 = vsel %vm829_vm0, %v797_v26, %v861_v40  ;;  %v909_v50 = vsel %vm845_vm1, %v813_v31, %v877_v43  ;;  %v798_v51 = vadd.f32 %v1434_v33, %v1634_v24 }
 0x112   : > { %1369 = vst [vmem:[%s1651_s17 + $0x10] sm:$0xff] %v1301_v44   ;;  %vm843_vm3 = vcmp.gt.f32.partialorder %v811_v47, 0.0  ;;  %v875_v52 = vmul.f32 0.01, %v811_v47  ;;  %v814_v53 = vadd.f32 %v1450_v34, %v1634_v24  ;;  %v796_v54 = vadd.f32 %v1634_v24, %v589_v37  ;;  %v1437_v55 = vpop.f32.mrb[12].mxu0  ;;  %v1453_v56 = vpop.f32.mrb[12].mxu1 }
 0x113   : > { %1377 = vst [vmem:[%s1651_s17 + $0x50] sm:$0xff] %v1341_v48   ;;  %vm830_vm4 = vcmp.gt.f32.partialorder %v798_v51, 0.0  ;;  %v862_v57 = vmul.f32 0.01, %v798_v51  ;;  %v812_v58 = vadd.f32 %v1634_v24, %v653_v38  ;;  %v801_v59 = vadd.f32 %v1437_v55, %v1634_v24  ;;  %v602_v60 = vpop.f32.mrb[13].mxu0  ;;  %v666_v61 = vpop.f32.mrb[13].mxu1 }
 0x114   : > { %v891_v62 = vsel %vm827_vm2, %v795_v32, %v859_v46  ;;  %vm846_vm5 = vcmp.gt.f32.partialorder %v814_v53, 0.0  ;;  %v878_v63 = vmul.f32 0.01, %v814_v53  ;;  %vm828_vm6 = vcmp.gt.f32.partialorder %v796_v54, 0.0  ;;  %v1438_v0 = vpop.f32.mrb[14].mxu0  ;;  %v1454_v1 = vpop.f32.mrb[14].mxu1 }
 0x115   : > { %v894_v2 = vsel %vm830_vm4, %v798_v51, %v862_v57  ;;  %v860_v3 = vmul.f32 0.01, %v796_v54  ;;  %vm844_vm7 = vcmp.gt.f32.partialorder %v812_v58, 0.0  ;;  %v876_v4 = vmul.f32 0.01, %v812_v58  ;;  %v605_v5 = vpop.f32.mrb[15].mxu0 }
 0x116   : > { %v907_v6 = vsel %vm843_vm3, %v811_v47, %v875_v52  ;;  %v1316_v7 = vpack.c.bf16 %v894_v2, %v893_v49  ;;  %v910_v8 = vsel %vm846_vm5, %v814_v53, %v878_v63  ;;  %v865_v9 = vmul.f32 0.01, %v801_v59  ;;  %v669_v10 = vpop.f32.mrb[15].mxu1 }
 0x117   : > { %v1356_v11 = vpack.c.bf16 %v910_v8, %v909_v50  ;;  %v892_v12 = vsel %vm828_vm6, %v796_v54, %v860_v3  ;;  %v908_v13 = vsel %vm844_vm7, %v812_v58, %v876_v4  ;;  %v817_v14 = vadd.f32 %v1453_v56, %v1634_v24 }
 0x118   : > { %1372 = vst [vmem:[%s1651_s17 + $0x28] sm:$0xff] %v1316_v7   ;;  %v1311_v15 = vpack.c.bf16 %v892_v12, %v891_v62  ;;  %v1351_v16 = vpack.c.bf16 %v908_v13, %v907_v6  ;;  %vm833_vm8 = vcmp.gt.f32.partialorder %v801_v59, 0.0  ;;  %v799_v17 = vadd.f32 %v1634_v24, %v602_v60 }
 0x119   : > { %1380 = vst [vmem:[%s1651_s17 + $0x68] sm:$0xff] %v1356_v11   ;;  %vm849_vm9 = vcmp.gt.f32.partialorder %v817_v14, 0.0  ;;  %v881_v18 = vmul.f32 0.01, %v817_v14  ;;  %v815_v19 = vadd.f32 %v1634_v24, %v666_v61  ;;  %v802_v20 = vadd.f32 %v1438_v0, %v1634_v24 }
 0x11a   : > { %1371 = vst [vmem:[%s1651_s17 + $0x20] sm:$0xff] %v1311_v15   ;;  %1379 = vst [vmem:[%s1651_s17 + $0x60] sm:$0xff] %v1351_v16   ;;  %v863_v21 = vmul.f32 0.01, %v799_v17  ;;  %v818_v22 = vadd.f32 %v1454_v1, %v1634_v24  ;;  %v800_v23 = vadd.f32 %v1634_v24, %v605_v5  ;;  %v897_v25 = vsel %vm833_vm8, %v801_v59, %v865_v9 }
 0x11b   : > { %vm831_vm10 = vcmp.gt.f32.partialorder %v799_v17, 0.0  ;;  %vm834_vm11 = vcmp.gt.f32.partialorder %v802_v20, 0.0  ;;  %v913_v26 = vsel %vm849_vm9, %v817_v14, %v881_v18  ;;  %v866_v27 = vmul.f32 0.01, %v802_v20 }
 0x11c   : > { %vm850_vm12 = vcmp.gt.f32.partialorder %v818_v22, 0.0  ;;  %v882_v28 = vmul.f32 0.01, %v818_v22  ;;  %vm847_vm13 = vcmp.gt.f32.partialorder %v815_v19, 0.0  ;;  %vm832_vm14 = vcmp.gt.f32.partialorder %v800_v23, 0.0 }
 0x11d   : > { %v864_v29 = vmul.f32 0.01, %v800_v23  ;;  %v816_v30 = vadd.f32 %v1634_v24, %v669_v10  ;;  %v895_v31 = vsel %vm831_vm10, %v799_v17, %v863_v21  ;;  %v879_v32 = vmul.f32 0.01, %v815_v19 }
 0x11e   : > { %v898_v33 = vsel %vm834_vm11, %v802_v20, %v866_v27  ;;  %v914_v34 = vsel %vm850_vm12, %v818_v22, %v882_v28 }
 0x11f   : > { %v1326_v35 = vpack.c.bf16 %v898_v33, %v897_v25  ;;  %v1366_v36 = vpack.c.bf16 %v914_v34, %v913_v26  ;;  %v896_v37 = vsel %vm832_vm14, %v800_v23, %v864_v29  ;;  %vm848_vm15 = vcmp.gt.f32.partialorder %v816_v30, 0.0 }
 0x120   : > { %v1321_v38 = vpack.c.bf16 %v896_v37, %v895_v31  ;;  %v880_v39 = vmul.f32 0.01, %v816_v30  ;;  %v911_v40 = vsel %vm847_vm13, %v815_v19, %v879_v32 }
 0x121   : > { %1374 = vst [vmem:[%s1651_s17 + $0x38] sm:$0xff] %v1326_v35   ;;  %1382 = vst [vmem:[%s1651_s17 + $0x78] sm:$0xff] %v1366_v36  }
 0x122   : > { %1373 = vst [vmem:[%s1651_s17 + $0x30] sm:$0xff] %v1321_v38   ;;  %v912_v41 = vsel %vm848_vm15, %v816_v30, %v880_v39 }
 0x123   : > { %v1361_v42 = vpack.c.bf16 %v912_v41, %v911_v40 }
 0x125   : > { %1381 = vst [vmem:[%s1651_s17 + $0x70] sm:$0xff] %v1361_v42  }
 0x126 PF: > { %s13_s14 = sadd.s32 1, %s1541_s14   ;;  %s1710_s12 = smov %s1537_s13 }
 0x127   : > { %p10_p5 = scmp.ge.s32.totalorder %s13_s14, 4   ;;  %s1711_s13 = smov %s1713_s15 }
 0x129   :  { %12 = sbr.rel (!%p10_p5) target bundleno = 2 (0x2), region = 76 }

// kernel: _lambda_.7
= control target key start
LH: loop header
LB: loop body
LE: loop exit
PB: predicated region body
PF: predicated region fallthrough
CT: control target
= control target key end

     0   :  { %s2537_s15 = smov 0   ;;  %s2539_s16 = smov 0   ;;  %s2869_s0 = inlined_call_operand.vmem [shape: bf16[512,384], index: 0, kind: input, shape index: {}]   ;;  %s2870_s1 = inlined_call_operand.vmem [shape: bf16[384,128], index: 1, kind: input, shape index: {}]   ;;  %s2871_s2 = inlined_call_operand.vmem [shape: f32[1,128], index: 2, kind: input, shape index: {}]   ;;  %s2872_s3 = inlined_call_operand.vmem [shape: bf16[512,128], index: 3, kind: input, shape index: {}]   ;;  %s2873_s4 = inlined_call_operand.vmem [shape: bf16[512,128], index: 4, kind: output, shape index: {}]  }
   0x1   :  { %s2541_s17 = smov 0  }
   0x2 LB: > { %s33_s18 = sadd.s32 1, %s2506_s16  ;;  %p1855_p0 = scmp.ge.s32.totalorder %s2510_s17, 1  ;;  %s2510_s17 = sphi %s2541_s17, %s14_s17   ;;  %s2506_s16 = sphi %s2539_s16, %s2875_s16   ;;  %s2502_s15 = sphi %s2537_s15, %s2874_s15  }
   0x3   : > { %p35_p1 = scmp.ge.s32.totalorder %s33_s18, 2  ;;  %p232_p2 = scmp.lt.s32.totalorder %s2510_s17, 3 }
   0x5   : > { %s2877_s18 = smov (%p35_p1, %s33_s18), 0  ;;  %p233_p3 = pnand %p1855_p0, %p232_p2 }
   0x6   : > { %v2400_v0 = vld [vmem:[%s2870_s1 + $0x40] sm:$0xff] (!%p233_p3)   ;;  %s1856_s21 = sshll.u32 (!%p233_p3), %s2502_s15, 5  ;;  %v2402_v2 = vld [vmem:[%s2870_s1 + $0x48] sm:$0xff] (!%p233_p3)   ;;  %v2404_v4 = vld [vmem:[%s2870_s1 + $0x50] sm:$0xff] (!%p233_p3)  }
   0x7   : > { %236 = sbr.rel (%p233_p3) target bundleno = 360 (0x168), region = 36  ;;  %v2401_v1 = vld [vmem:[%s2870_s1] sm:$0xff] (!%p233_p3)   ;;  %2175 = vmatprep.subr.bf16.mxu0 (!%p233_p3), %v2400_v0  ;;  %2359 = vmatprep.subr.bf16.mxu1 (!%p233_p3), %v2400_v0  ;;  %p287_p4 = scmp.lt.s32.totalorder (!%p233_p3), %s1856_s21, 63  ;;  %v2403_v3 = vld [vmem:[%s2870_s1 + $0x8] sm:$0xff] (!%p233_p3)   ;;  %v2405_v5 = vld [vmem:[%s2870_s1 + $0x10] sm:$0xff] (!%p233_p3)  }
   0x8   : > { %2176 = vmatpush3.bf16.msra.mxu0 (!%p233_p3), %v2401_v1  ;;  %2367 = vmatpush3.bf16.msra.mxu1 (!%p233_p3), %v2401_v1  ;;  %v2406_v6 = vld [vmem:[%s2870_s1 + $0x58] sm:$0xff] (!%p233_p3)   ;;  %v2408_v8 = vld [vmem:[%s2870_s1 + $0x60] sm:$0xff] (!%p233_p3)   ;;  %v2410_v10 = vld [vmem:[%s2870_s1 + $0x68] sm:$0xff] (!%p233_p3)  }
   0x9   : > { %2177 = vmatprep.subr.bf16.mxu0 (!%p233_p3), %v2402_v2  ;;  %2360 = vmatprep.subr.bf16.mxu1 (!%p233_p3), %v2402_v2  ;;  %v2407_v7 = vld [vmem:[%s2870_s1 + $0x18] sm:$0xff] (!%p233_p3)   ;;  %v2409_v9 = vld [vmem:[%s2870_s1 + $0x20] sm:$0xff] (!%p233_p3)   ;;  %v2411_v13 = vld [vmem:[%s2870_s1 + $0x28] sm:$0xff] (!%p233_p3)  }
   0xa   : > { %v2412_v14 = vld [vmem:[%s2870_s1 + $0x70] sm:$0xff] (!%p233_p3)   ;;  %v2414_v16 = vld [vmem:[%s2870_s1 + $0x78] sm:$0xff] (!%p233_p3)   ;;  %v2422_v18 = vld [vmem:[%s2870_s1 + $0x80] sm:$0xff] (!%p233_p3)  }
   0xb   : > { %v2413_v15 = vld [vmem:[%s2870_s1 + $0x30] sm:$0xff] (!%p233_p3)   ;;  %v2415_v17 = vld [vmem:[%s2870_s1 + $0x38] sm:$0xff] (!%p233_p3)   ;;  %v2423_v22 = vld [vmem:[%s2870_s1 + $0x88] sm:$0xff] (!%p233_p3)  }
   0xc   : > { %2178 = vmatpush3.bf16.msra.mxu0 (!%p233_p3), %v2403_v3  ;;  %2368 = vmatpush3.bf16.msra.mxu1 (!%p233_p3), %v2403_v3  ;;  %v2430_v25 = vld [vmem:[%s2870_s1 + $0x90] sm:$0xff] (!%p233_p3)   ;;  %v2431_v27 = vld [vmem:[%s2870_s1 + $0x98] sm:$0xff] (!%p233_p3)   ;;  %v2438_v30 = vld [vmem:[%s2870_s1 + $0xa0] sm:$0xff] (!%p233_p3)  }
   0xd   : > { %2179 = vmatprep.subr.bf16.mxu0 (!%p233_p3), %v2404_v4  ;;  %2361 = vmatprep.subr.bf16.mxu1 (!%p233_p3), %v2404_v4  ;;  %v2439_v33 = vld [vmem:[%s2870_s1 + $0xa8] sm:$0xff] (!%p233_p3)   ;;  %v2446_v36 = vld [vmem:[%s2870_s1 + $0xb0] sm:$0xff] (!%p233_p3)   ;;  %v2447_v40 = vld [vmem:[%s2870_s1 + $0xb8] sm:$0xff] (!%p233_p3)  }
   0xe   : > { %s2879_s21 = smov (!%p287_p4, %s1856_s21), 63 }
   0xf   : > { %s2375_s8 = smul.u32 12, %s2879_s21 }
  0x10   : > { %2180 = vmatpush3.bf16.msra.mxu0 %v2405_v5  ;;  %2369 = vmatpush3.bf16.msra.mxu1 %v2405_v5 }
  0x11   : > { %2181 = vmatprep.subr.bf16.mxu0 %v2406_v6  ;;  %2362 = vmatprep.subr.bf16.mxu1 %v2406_v6  ;;  %s2588_s15 = scalar_lea.vmem %s2869_s0, %s2375_s8 }
  0x12   : > { %v2418_v11 = vld [vmem:[%s2588_s15 + $0x4] ss:$12 sps:$4 sm:$0xff]   ;;  %v2416_v19 = vld [vmem:[%s2588_s15] ss:$12 sps:$4 sm:$0xff]   ;;  %v2424_v21 = vld [vmem:[%s2588_s15 + $0x1c] ss:$12 sps:$4 sm:$0xff]  }
  0x13   : > { %v2421_v12 = vld [vmem:[%s2588_s15 + $0x124] ss:$12 sps:$4 sm:$0xff]   ;;  %940 = vmatprep.mubr.bf16.mxu0 %v2418_v11  ;;  %v2419_v20 = vld [vmem:[%s2588_s15 + $0x120] ss:$12 sps:$4 sm:$0xff]   ;;  %v2426_v23 = vld [vmem:[%s2588_s15 + $0x13c] ss:$12 sps:$4 sm:$0xff]  }
  0x14   : > { %2182 = vmatpush3.bf16.msra.mxu0 %v2407_v7  ;;  %2370 = vmatpush3.bf16.msra.mxu1 %v2407_v7  ;;  %v2428_v24 = vld [vmem:[%s2588_s15 + $0x18] ss:$12 sps:$4 sm:$0xff]   ;;  %v2432_v28 = vld [vmem:[%s2588_s15 + $0x34] ss:$12 sps:$4 sm:$0xff]   ;;  %v2436_v31 = vld [vmem:[%s2588_s15 + $0x30] ss:$12 sps:$4 sm:$0xff]  }
  0x15   : > { %2183 = vmatprep.subr.bf16.mxu0 %v2408_v8  ;;  %2363 = vmatprep.subr.bf16.mxu1 %v2408_v8  ;;  %v2429_v26 = vld [vmem:[%s2588_s15 + $0x138] ss:$12 sps:$4 sm:$0xff]   ;;  %v2434_v29 = vld [vmem:[%s2588_s15 + $0x154] ss:$12 sps:$4 sm:$0xff]   ;;  %v2437_v32 = vld [vmem:[%s2588_s15 + $0x150] ss:$12 sps:$4 sm:$0xff]  }
  0x16   : > { %1036 = vmatprep.mubr.bf16.mxu1 %v2421_v12  ;;  %v2440_v34 = vld [vmem:[%s2588_s15 + $0x4c] ss:$12 sps:$4 sm:$0xff]   ;;  %v2444_v37 = vld [vmem:[%s2588_s15 + $0x48] ss:$12 sps:$4 sm:$0xff]   ;;  %v2448_v39 = vld [vmem:[%s2588_s15 + $0x64] ss:$12 sps:$4 sm:$0xff]  }
  0x17   : > { %v2442_v35 = vld [vmem:[%s2588_s15 + $0x16c] ss:$12 sps:$4 sm:$0xff]   ;;  %v2445_v38 = vld [vmem:[%s2588_s15 + $0x168] ss:$12 sps:$4 sm:$0xff]   ;;  %v2457_v47 = vld [vmem:[%s2588_s15 + $0x50] ss:$12 sps:$4 sm:$0xff]  }
  0x18   : > { %2184 = vmatpush3.bf16.msra.mxu0 %v2409_v9  ;;  %2371 = vmatpush3.bf16.msra.mxu1 %v2409_v9  ;;  %v2450_v41 = vld [vmem:[%s2588_s15 + $0x8] ss:$12 sps:$4 sm:$0xff]   ;;  %v2451_v42 = vld [vmem:[%s2588_s15 + $0x60] ss:$12 sps:$4 sm:$0xff]   ;;  %v2455_v45 = vld [vmem:[%s2588_s15 + $0x38] ss:$12 sps:$4 sm:$0xff]  }
  0x19   : > { %2185 = vmatprep.subr.bf16.mxu0 %v2410_v10  ;;  %2364 = vmatprep.subr.bf16.mxu1 %v2410_v10  ;;  %v2452_v43 = vld [vmem:[%s2588_s15 + $0x20] ss:$12 sps:$4 sm:$0xff]   ;;  %v2453_v44 = vld [vmem:[%s2588_s15 + $0x7c] ss:$12 sps:$4 sm:$0xff]   ;;  %v2456_v46 = vld [vmem:[%s2588_s15 + $0x78] ss:$12 sps:$4 sm:$0xff]  }
  0x1a   : > { %v2458_v48 = vld [vmem:[%s2588_s15 + $0x94] ss:$12 sps:$4 sm:$0xff]   ;;  %v2461_v50 = vld [vmem:[%s2588_s15 + $0x90] ss:$12 sps:$4 sm:$0xff]   ;;  %v2463_v52 = vld [vmem:[%s2588_s15 + $0xac] ss:$12 sps:$4 sm:$0xff]  }
  0x1b   : > { %v2460_v49 = vld [vmem:[%s2588_s15 + $0x68] ss:$12 sps:$4 sm:$0xff]   ;;  %v2462_v51 = vld [vmem:[%s2588_s15 + $0x80] ss:$12 sps:$4 sm:$0xff]   ;;  %v2465_v53 = vld [vmem:[%s2588_s15 + $0x98] ss:$12 sps:$4 sm:$0xff]  }
  0x1c   : > { %2186 = vmatpush3.bf16.msra.mxu0 %v2411_v13  ;;  %2372 = vmatpush3.bf16.msra.mxu1 %v2411_v13  ;;  %v2466_v54 = vld [vmem:[%s2588_s15 + $0xa8] ss:$12 sps:$4 sm:$0xff]   ;;  %v2467_v55 = vld [vmem:[%s2588_s15 + $0xb0] ss:$12 sps:$4 sm:$0xff]   ;;  %v2471_v58 = vld [vmem:[%s2588_s15 + $0xc0] ss:$12 sps:$4 sm:$0xff]  }
  0x1d   : > { %2187 = vmatprep.subr.bf16.mxu0 %v2412_v14  ;;  %2365 = vmatprep.subr.bf16.mxu1 %v2412_v14  ;;  %v2468_v56 = vld [vmem:[%s2588_s15 + $0xc4] ss:$12 sps:$4 sm:$0xff]   ;;  %v2470_v57 = vld [vmem:[%s2588_s15 + $0xc8] ss:$12 sps:$4 sm:$0xff]   ;;  %v2472_v59 = vld [vmem:[%s2588_s15 + $0xe0] ss:$12 sps:$4 sm:$0xff]  }
  0x1e   : > { %v2473_v60 = vld [vmem:[%s2588_s15 + $0xdc] ss:$12 sps:$4 sm:$0xff]   ;;  %v2475_v61 = vld [vmem:[%s2588_s15 + $0xf8] ss:$12 sps:$4 sm:$0xff]   ;;  %v2478_v0 = vld [vmem:[%s2588_s15 + $0xf4] ss:$12 sps:$4 sm:$0xff]  }
  0x1f   : > { %v2476_v62 = vld [vmem:[%s2588_s15 + $0xd8] ss:$12 sps:$4 sm:$0xff]   ;;  %v2477_v63 = vld [vmem:[%s2588_s15 + $0x110] ss:$12 sps:$4 sm:$0xff]   ;;  %v2480_v1 = vld [vmem:[%s2588_s15 + $0x128] ss:$12 sps:$4 sm:$0xff]  }
  0x20   : > { %2188 = vmatpush3.bf16.msra.mxu0 %v2413_v15  ;;  %2373 = vmatpush3.bf16.msra.mxu1 %v2413_v15  ;;  %v2481_v2 = vld [vmem:[%s2588_s15 + $0xf0] ss:$12 sps:$4 sm:$0xff]   ;;  %v2482_v3 = vld [vmem:[%s2588_s15 + $0x140] ss:$12 sps:$4 sm:$0xff]   ;;  %v2485_v5 = vld [vmem:[%s2588_s15 + $0x158] ss:$12 sps:$4 sm:$0xff]  }
  0x21   : > { %2189 = vmatprep.subr.bf16.mxu0 %v2414_v16  ;;  %2366 = vmatprep.subr.bf16.mxu1 %v2414_v16  ;;  %v2483_v4 = vld [vmem:[%s2588_s15 + $0x10c] ss:$12 sps:$4 sm:$0xff]   ;;  %v2486_v6 = vld [vmem:[%s2588_s15 + $0x108] ss:$12 sps:$4 sm:$0xff]   ;;  %v2487_v7 = vld [vmem:[%s2588_s15 + $0x170] ss:$12 sps:$4 sm:$0xff]  }
  0x22   : > { %s1859_s15 = sshll.u32 %s2879_s21, 2 }
  0x23   : > { %s2709_s5 = scalar_lea.vmem %s2872_s3, %s1859_s15  ;;  %s2740_s10 = scalar_lea.vmem %s2873_s4, %s1859_s15 }
  0x24   : > { %2190 = vmatpush3.bf16.msra.mxu0 %v2415_v17  ;;  %2374 = vmatpush3.bf16.msra.mxu1 %v2415_v17 }
  0x25   : > { %2311 = vmatprep.subr.bf16.mxu1 %v2422_v18 }
  0x27   : > { %941 = vmatmul.mubr.bf16.vlgmr.msra.gmra.mrb[0].mxu0 %v2416_v19  ;;  %1037 = vmatmul.mubr.bf16.vlgmr.msra.gmra.mrb[0].mxu1 %v2419_v20 }
  0x28   : > { %2312 = vmatpush3.bf16.msra.mxu1 %v2422_v18  ;;  %948 = vmatprep.mubr.bf16.mxu0 %v2424_v21 }
  0x29   : > { %2313 = vmatprep.subr.bf16.mxu1 %v2423_v22  ;;  %1044 = vmatprep.mubr.bf16.mxu1 %v2426_v23 }
  0x2c   : > { %2314 = vmatpush3.bf16.msra.mxu1 %v2423_v22 }
  0x2d   : > { %2315 = vmatprep.subr.bf16.mxu1 %v2430_v25 }
  0x2f   : > { %949 = vmatmul.mubr.bf16.gmra.mrb[4].mxu0 %v2428_v24  ;;  %1045 = vmatmul.mubr.bf16.gmra.mrb[4].mxu1 %v2429_v26 }
  0x30   : > { %2316 = vmatpush3.bf16.msra.mxu1 %v2430_v25  ;;  %956 = vmatprep.mubr.bf16.mxu0 %v2432_v28 }
  0x31   : > { %2317 = vmatprep.subr.bf16.mxu1 %v2431_v27  ;;  %1052 = vmatprep.mubr.bf16.mxu1 %v2434_v29 }
  0x34   : > { %2318 = vmatpush3.bf16.msra.mxu1 %v2431_v27 }
  0x35   : > { %2319 = vmatprep.subr.bf16.mxu1 %v2438_v30 }
  0x37   : > { %957 = vmatmul.mubr.bf16.gmra.mrb[8].mxu0 %v2436_v31  ;;  %1053 = vmatmul.mubr.bf16.gmra.mrb[8].mxu1 %v2437_v32 }
  0x38   : > { %2320 = vmatpush3.bf16.msra.mxu1 %v2438_v30  ;;  %964 = vmatprep.mubr.bf16.mxu0 %v2440_v34 }
  0x39   : > { %2321 = vmatprep.subr.bf16.mxu1 %v2439_v33  ;;  %1060 = vmatprep.mubr.bf16.mxu1 %v2442_v35 }
  0x3c   : > { %2322 = vmatpush3.bf16.msra.mxu1 %v2439_v33 }
  0x3d   : > { %2323 = vmatprep.subr.bf16.mxu1 %v2446_v36 }
  0x3f   : > { %965 = vmatmul.mubr.bf16.gmra.mrb[12].mxu0 %v2444_v37  ;;  %1061 = vmatmul.mubr.bf16.gmra.mrb[12].mxu1 %v2445_v38 }
  0x40   : > { %2324 = vmatpush3.bf16.msra.mxu1 %v2446_v36  ;;  %972 = vmatprep.mubr.bf16.mxu0 %v2448_v39 }
  0x41   : > { %2325 = vmatprep.subr.bf16.mxu1 %v2447_v40  ;;  %2327 = vmatprep.mubr.bf16.mxu1 %v2450_v41 }
  0x44   : > { %2326 = vmatpush3.bf16.msra.mxu1 %v2447_v40 }
  0x47   : > { %973 = vmatmul.mubr.bf16.gmra.mrb[16].mxu0 %v2451_v42  ;;  %2328 = vmatmul.mubr.bf16.vlgmr.msra.gmra.mrb[16].mxu1 %v2452_v43 }
  0x48   : > { %980 = vmatprep.mubr.bf16.mxu0 %v2453_v44  ;;  %2331 = vmatprep.mubr.bf16.mxu1 %v2455_v45 }
  0x4f   : > { %981 = vmatmul.mubr.bf16.gmra.mrb[20].mxu0 %v2456_v46  ;;  %2332 = vmatmul.mubr.bf16.gmra.mrb[20].mxu1 %v2457_v47 }
  0x50   : > { %988 = vmatprep.mubr.bf16.mxu0 %v2458_v48  ;;  %2335 = vmatprep.mubr.bf16.mxu1 %v2460_v49 }
  0x57   : > { %989 = vmatmul.mubr.bf16.gmra.mrb[24].mxu0 %v2461_v50  ;;  %2336 = vmatmul.mubr.bf16.gmra.mrb[24].mxu1 %v2462_v51 }
  0x58   : > { %996 = vmatprep.mubr.bf16.mxu0 %v2463_v52  ;;  %2339 = vmatprep.mubr.bf16.mxu1 %v2465_v53 }
  0x5f   : > { %997 = vmatmul.mubr.bf16.gmra.mrb[28].mxu0 %v2466_v54  ;;  %2340 = vmatmul.mubr.bf16.gmra.mrb[28].mxu1 %v2467_v55 }
  0x60   : > { %1004 = vmatprep.mubr.bf16.mxu0 %v2468_v56  ;;  %2343 = vmatprep.mubr.bf16.mxu1 %v2470_v57 }
  0x67   : > { %1005 = vmatmul.mubr.bf16.gmra.mrb[32].mxu0 %v2471_v58  ;;  %2344 = vmatmul.mubr.bf16.gmra.mrb[32].mxu1 %v2472_v59  ;;  %v2714_v58 = vld [vmem:[%s2871_s2] ss:$0 sm:$0xff] }
  0x68   : > { %1012 = vmatprep.mubr.bf16.mxu0 %v2473_v60  ;;  %2347 = vmatprep.mubr.bf16.mxu1 %v2475_v61  ;;  %v2145_v60 = vld [vmem:[%s2709_s5 + $0x8] sm:$0xff]  }
  0x6f   : > { %1013 = vmatmul.mubr.bf16.gmra.mrb[36].mxu0 %v2476_v62  ;;  %2348 = vmatmul.mubr.bf16.gmra.mrb[36].mxu1 %v2477_v63 }
  0x70   : > { %1020 = vmatprep.mubr.bf16.mxu0 %v2478_v0  ;;  %2351 = vmatprep.mubr.bf16.mxu1 %v2480_v1  ;;  %v2002_v1 = vld [vmem:[%s2709_s5] sm:$0xff]  }
  0x77   : > { %1021 = vmatmul.mubr.bf16.gmra.mrb[40].mxu0 %v2481_v2  ;;  %2352 = vmatmul.mubr.bf16.gmra.mrb[40].mxu1 %v2482_v3 }
  0x78   : > { %1028 = vmatprep.mubr.bf16.mxu0 %v2483_v4  ;;  %2355 = vmatprep.mubr.bf16.mxu1 %v2485_v5 }
  0x7f   : > { %1029 = vmatmul.mubr.bf16.gmra.mrb[44].mxu0 %v2486_v6  ;;  %2356 = vmatmul.mubr.bf16.gmra.mrb[44].mxu1 %v2487_v7 }
  0xfa   : > { %v2191_v8 = vpop.f32.mrb[0].mxu0  ;;  %v2263_v9 = vpop.f32.mrb[0].mxu1 }
  0xfb   : > { %v2192_v10 = vpop.f32.mrb[1].mxu0  ;;  %v2264_v11 = vpop.f32.mrb[1].mxu1 }
  0xfc   : > { %v2193_v12 = vadd.f32 %v2192_v10, %v2191_v8  ;;  %v2683_v13 = vadd.f32 %v2264_v11, %v2263_v9  ;;  %v2194_v14 = vpop.f32.mrb[2].mxu0  ;;  %v2266_v15 = vpop.f32.mrb[2].mxu1  ;;  %v2007_v8 = vunpack.c.l.bf16 %v2145_v60 }
  0xfd   : > { %v2195_v16 = vpop.f32.mrb[3].mxu0  ;;  %v2267_v17 = vpop.f32.mrb[3].mxu1 }
  0xfe   : > { %v2196_v18 = vadd.f32 %v2195_v16, %v2194_v14  ;;  %v2685_v19 = vadd.f32 %v2267_v17, %v2266_v15  ;;  %v2003_v15 = vunpack.c.l.bf16 %v2002_v1  ;;  %v2726_v16 = vld [vmem:[%s2709_s5 + $0x18] sm:$0xff]  }
 0x102   : > { %v2197_v20 = vpop.f32.mrb[4].mxu0  ;;  %v2269_v21 = vpop.f32.mrb[4].mxu1 }
 0x103   : > { %v2198_v22 = vpop.f32.mrb[5].mxu0  ;;  %v2270_v23 = vpop.f32.mrb[5].mxu1 }
 0x104   : > { %v2199_v24 = vadd.f32 %v2198_v22, %v2197_v20  ;;  %v2687_v25 = vadd.f32 %v2270_v23, %v2269_v21  ;;  %v2200_v26 = vpop.f32.mrb[6].mxu0  ;;  %v2272_v27 = vpop.f32.mrb[6].mxu1  ;;  %v2008_v20 = vunpack.c.h.bf16 %v2145_v60  ;;  %v2730_v22 = vld [vmem:[%s2709_s5 + $0x10] sm:$0xff]  }
 0x105   : > { %v2201_v28 = vpop.f32.mrb[7].mxu0  ;;  %v2273_v29 = vpop.f32.mrb[7].mxu1 }
 0x106   : > { %v2202_v30 = vadd.f32 %v2201_v28, %v2200_v26  ;;  %v2689_v31 = vadd.f32 %v2273_v29, %v2272_v27  ;;  %v2004_v26 = vunpack.c.h.bf16 %v2002_v1  ;;  %v2747_v1 = vld [vmem:[%s2709_s5 + $0x28] sm:$0xff]  }
 0x10a   : > { %v2203_v32 = vpop.f32.mrb[8].mxu0  ;;  %v2275_v33 = vpop.f32.mrb[8].mxu1 }
 0x10b   : > { %v2204_v34 = vpop.f32.mrb[9].mxu0  ;;  %v2276_v35 = vpop.f32.mrb[9].mxu1 }
 0x10c   : > { %v2691_v36 = vadd.f32 %v2204_v34, %v2203_v32  ;;  %v2693_v37 = vadd.f32 %v2276_v35, %v2275_v33  ;;  %v2206_v38 = vpop.f32.mrb[10].mxu0  ;;  %v2278_v39 = vpop.f32.mrb[10].mxu1 }
 0x10d   : > { %v2207_v40 = vpop.f32.mrb[11].mxu0  ;;  %v2279_v41 = vpop.f32.mrb[11].mxu1 }
 0x10e   : > { %v2695_v42 = vadd.f32 %v2207_v40, %v2206_v38  ;;  %v2697_v43 = vadd.f32 %v2279_v41, %v2278_v39  ;;  %v2011_v39 = vunpack.c.l.bf16 %v2730_v22 }
 0x112   : > { %v2209_v44 = vpop.f32.mrb[12].mxu0  ;;  %v2281_v45 = vpop.f32.mrb[12].mxu1 }
 0x113   : > { %v2210_v46 = vpop.f32.mrb[13].mxu0  ;;  %v2282_v47 = vpop.f32.mrb[13].mxu1 }
 0x114   : > { %v2211_v48 = vadd.f32 %v2210_v46, %v2209_v44  ;;  %v2699_v49 = vadd.f32 %v2282_v47, %v2281_v45  ;;  %v2212_v50 = vpop.f32.mrb[14].mxu0  ;;  %v2284_v51 = vpop.f32.mrb[14].mxu1 }
 0x115   : > { %v2213_v52 = vpop.f32.mrb[15].mxu0  ;;  %v2285_v53 = vpop.f32.mrb[15].mxu1 }
 0x116   : > { %v2214_v54 = vadd.f32 %v2213_v52, %v2212_v50  ;;  %v2702_v55 = vadd.f32 %v2285_v53, %v2284_v51 }
 0x11a   : > { %v2215_v56 = vpop.f32.mrb[16].mxu0  ;;  %v2329_v57 = vpop.f32.mrb[16].mxu1 }
 0x11b   : > { %v1112_v59 = vadd.f32 %v2329_v57, %v2199_v24  ;;  %v2216_v61 = vpop.f32.mrb[17].mxu0  ;;  %v1103_v62 = vpop.f32.mrb[17].mxu1 }
 0x11c   : > { %v2717_v63 = vadd.f32 %v2216_v61, %v2215_v56  ;;  %v1104_v0 = vadd.f32 %v2193_v12, %v1103_v62  ;;  %v2218_v2 = vpop.f32.mrb[18].mxu0  ;;  %v2330_v3 = vpop.f32.mrb[18].mxu1 }
 0x11d   : > { %v1338_v4 = vadd.f32 %v2714_v58, %v1112_v59  ;;  %v1115_v5 = vadd.f32 %v2330_v3, %v2202_v30  ;;  %v2219_v6 = vpop.f32.mrb[19].mxu0  ;;  %v1106_v7 = vpop.f32.mrb[19].mxu1  ;;  %v2015_v30 = vunpack.c.l.bf16 %v2726_v16 }
 0x11e   : > { %v1336_v9 = vadd.f32 %v2714_v58, %v1104_v0  ;;  %v2722_v10 = vadd.f32 %v2219_v6, %v2218_v2  ;;  %v1107_v11 = vadd.f32 %v2196_v18, %v1106_v7  ;;  %v2016_v2 = vunpack.c.h.bf16 %v2726_v16 }
 0x11f   : > { %vm1370_vm0 = vcmp.gt.f32.partialorder %v1338_v4, 0.0  ;;  %v1402_v14 = vmul.f32 0.01, %v1338_v4  ;;  %v1339_v12 = vadd.f32 %v2714_v58, %v1115_v5  ;;  %v2012_v6 = vunpack.c.h.bf16 %v2730_v22 }
 0x120   : > { %vm1368_vm1 = vcmp.gt.f32.partialorder %v1336_v9, 0.0  ;;  %v1400_v17 = vmul.f32 0.01, %v1336_v9  ;;  %v1337_v21 = vadd.f32 %v2714_v58, %v1107_v11 }
 0x121   : > { %v1434_v23 = vsel %vm1370_vm0, %v1338_v4, %v1402_v14  ;;  %vm1371_vm2 = vcmp.gt.f32.partialorder %v1339_v12, 0.0  ;;  %v1403_v24 = vmul.f32 0.01, %v1339_v12  ;;  %v2753_v4 = vld [vmem:[%s2709_s5 + $0x20] sm:$0xff]   ;;  %v2023_v14 = vunpack.c.l.bf16 %v2747_v1 }
 0x122   : > { %v1432_v27 = vsel %vm1368_vm1, %v1336_v9, %v1400_v17  ;;  %vm1369_vm3 = vcmp.gt.f32.partialorder %v1337_v21, 0.0  ;;  %v1401_v18 = vmul.f32 0.01, %v1337_v21  ;;  %v2221_v28 = vpop.f32.mrb[20].mxu0  ;;  %v2333_v29 = vpop.f32.mrb[20].mxu1  ;;  %v1530_v32 = vadd.f32 %v2007_v8, %v1434_v23 }
 0x123   : > { %v1435_v33 = vsel %vm1371_vm2, %v1339_v12, %v1403_v24  ;;  %v1128_v34 = vadd.f32 %v2333_v29, %v2211_v48  ;;  %v2222_v35 = vpop.f32.mrb[21].mxu0  ;;  %v1119_v38 = vpop.f32.mrb[21].mxu1  ;;  %v1528_v50 = vadd.f32 %v2003_v15, %v1432_v27 }
 0x124   : > { %v1531_v40 = vadd.f32 %v2008_v20, %v1435_v33  ;;  %v1433_v41 = vsel %vm1369_vm3, %v1337_v21, %v1401_v18  ;;  %v2223_v44 = vadd.f32 %v2222_v35, %v2221_v28  ;;  %v1120_v45 = vadd.f32 %v2691_v36, %v1119_v38  ;;  %v2224_v46 = vpop.f32.mrb[22].mxu0  ;;  %v2334_v47 = vpop.f32.mrb[22].mxu1 }
 0x125   : > { %v1529_v48 = vadd.f32 %v2004_v26, %v1433_v41  ;;  %v1342_v51 = vadd.f32 %v2714_v58, %v1128_v34  ;;  %v1131_v52 = vadd.f32 %v2334_v47, %v2214_v54  ;;  %v2225_v53 = vpop.f32.mrb[23].mxu0  ;;  %v1122_v56 = vpop.f32.mrb[23].mxu1  ;;  %v2019_v21 = vunpack.c.l.bf16 %v2753_v4 }
 0x126   : > { %v2073_v36 = vpack.c.bf16 %v1531_v40, %v1530_v32  ;;  %v1340_v57 = vadd.f32 %v2714_v58, %v1120_v45  ;;  %v2226_v59 = vadd.f32 %v2225_v53, %v2224_v46  ;;  %v1123_v60 = vadd.f32 %v2695_v42, %v1122_v56 }
 0x127   : > { %v2068_v61 = vpack.c.bf16 %v1529_v48, %v1528_v50  ;;  %vm1374_vm4 = vcmp.gt.f32.partialorder %v1342_v51, 0.0  ;;  %v1406_v62 = vmul.f32 0.01, %v1342_v51  ;;  %v1343_v0 = vadd.f32 %v2714_v58, %v1131_v52 }
 0x128   : > { %2160 = vst [vmem:[%s2740_s10 + $0x8] sm:$0xff] %v2073_v36   ;;  %vm1372_vm5 = vcmp.gt.f32.partialorder %v1340_v57, 0.0  ;;  %v1404_v54 = vmul.f32 0.01, %v1340_v57  ;;  %v1341_v3 = vadd.f32 %v2714_v58, %v1123_v60  ;;  %v2024_v46 = vunpack.c.h.bf16 %v2747_v1 }
 0x129   : > { %2069 = vst [vmem:[%s2740_s10] sm:$0xff] %v2068_v61   ;;  %v1438_v5 = vsel %vm1374_vm4, %v1342_v51, %v1406_v62  ;;  %vm1375_vm6 = vcmp.gt.f32.partialorder %v1343_v0, 0.0  ;;  %v1407_v42 = vmul.f32 0.01, %v1343_v0  ;;  %v2020_v51 = vunpack.c.h.bf16 %v2753_v4 }
 0x12a   : > { %v1436_v7 = vsel %vm1372_vm5, %v1340_v57, %v1404_v54  ;;  %vm1373_vm7 = vcmp.gt.f32.partialorder %v1341_v3, 0.0  ;;  %v1405_v8 = vmul.f32 0.01, %v1341_v3  ;;  %v2227_v9 = vpop.f32.mrb[24].mxu0  ;;  %v2337_v11 = vpop.f32.mrb[24].mxu1  ;;  %v1534_v15 = vadd.f32 %v2015_v30, %v1438_v5 }
 0x12b   : > { %v1439_v12 = vsel %vm1375_vm6, %v1343_v0, %v1407_v42  ;;  %v1144_v16 = vadd.f32 %v2337_v11, %v2223_v44  ;;  %v2228_v17 = vpop.f32.mrb[25].mxu0  ;;  %v1135_v20 = vpop.f32.mrb[25].mxu1  ;;  %v1532_v28 = vadd.f32 %v2011_v39, %v1436_v7 }
 0x12c   : > { %v1535_v23 = vadd.f32 %v2016_v2, %v1439_v12  ;;  %v1437_v24 = vsel %vm1373_vm7, %v1341_v3, %v1405_v8  ;;  %v2229_v26 = vadd.f32 %v2228_v17, %v2227_v9  ;;  %v1136_v27 = vadd.f32 %v2717_v63, %v1135_v20  ;;  %v2230_v22 = vpop.f32.mrb[26].mxu0  ;;  %v2338_v18 = vpop.f32.mrb[26].mxu1  ;;  %v2150_v9 = vld [vmem:[%s2709_s5 + $0x30] sm:$0xff]  }
 0x12d   : > { %v1533_v29 = vadd.f32 %v2012_v6, %v1437_v24  ;;  %v1346_v32 = vadd.f32 %v2714_v58, %v1144_v16  ;;  %v1147_v33 = vadd.f32 %v2338_v18, %v2226_v59  ;;  %v2231_v30 = vpop.f32.mrb[27].mxu0  ;;  %v1138_v34 = vpop.f32.mrb[27].mxu1  ;;  %v2151_v16 = vld [vmem:[%s2709_s5 + $0x38] sm:$0xff]   ;;  %v2028_v24 = vunpack.c.h.bf16 %v2150_v9 }
 0x12e   : > { %v2083_v35 = vpack.c.bf16 %v1535_v23, %v1534_v15  ;;  %v1344_v38 = vadd.f32 %v2714_v58, %v1136_v27  ;;  %v2232_v40 = vadd.f32 %v2231_v30, %v2230_v22  ;;  %v1139_v41 = vadd.f32 %v2722_v10, %v1138_v34 }
 0x12f   : > { %v2078_v44 = vpack.c.bf16 %v1533_v29, %v1532_v28  ;;  %vm1378_vm8 = vcmp.gt.f32.partialorder %v1346_v32, 0.0  ;;  %v1410_v63 = vmul.f32 0.01, %v1346_v32  ;;  %v1347_v45 = vadd.f32 %v2714_v58, %v1147_v33 }
 0x130   : > { %2162 = vst [vmem:[%s2740_s10 + $0x18] sm:$0xff] %v2083_v35   ;;  %vm1376_vm9 = vcmp.gt.f32.partialorder %v1344_v38, 0.0  ;;  %v1408_v39 = vmul.f32 0.01, %v1344_v38  ;;  %v1345_v47 = vadd.f32 %v2714_v58, %v1139_v41  ;;  %v2031_v29 = vunpack.c.l.bf16 %v2151_v16 }
 0x131   : > { %2161 = vst [vmem:[%s2740_s10 + $0x10] sm:$0xff] %v2078_v44   ;;  %v1442_v50 = vsel %vm1378_vm8, %v1346_v32, %v1410_v63  ;;  %vm1379_vm10 = vcmp.gt.f32.partialorder %v1347_v45, 0.0  ;;  %v1411_v48 = vmul.f32 0.01, %v1347_v45  ;;  %v2032_v32 = vunpack.c.h.bf16 %v2151_v16 }
 0x132   : > { %v1440_v52 = vsel %vm1376_vm9, %v1344_v38, %v1408_v39  ;;  %vm1377_vm11 = vcmp.gt.f32.partialorder %v1345_v47, 0.0  ;;  %v1409_v10 = vmul.f32 0.01, %v1345_v47  ;;  %v2233_v53 = vpop.f32.mrb[28].mxu0  ;;  %v2341_v56 = vpop.f32.mrb[28].mxu1  ;;  %v1538_v36 = vadd.f32 %v2023_v14, %v1442_v50 }
 0x133   : > { %v1443_v57 = vsel %vm1379_vm10, %v1347_v45, %v1411_v48  ;;  %v2234_v59 = vpop.f32.mrb[29].mxu0  ;;  %v1151_v60 = vpop.f32.mrb[29].mxu1  ;;  %v1536_v3 = vadd.f32 %v2019_v21, %v1440_v52  ;;  %v2027_v21 = vunpack.c.l.bf16 %v2150_v9 }
 0x134   : > { %v1539_v61 = vadd.f32 %v2024_v46, %v1443_v57  ;;  %v1441_v62 = vsel %vm1377_vm11, %v1345_v47, %v1409_v10  ;;  %v2235_v0 = vadd.f32 %v2234_v59, %v2233_v53  ;;  %v1152_v1 = vadd.f32 %v2229_v26, %v1151_v60  ;;  %v2236_v54 = vpop.f32.mrb[30].mxu0  ;;  %v2342_v2 = vpop.f32.mrb[30].mxu1 }
 0x135   : > { %v1537_v4 = vadd.f32 %v2020_v51, %v1441_v62  ;;  %v2237_v5 = vpop.f32.mrb[31].mxu0  ;;  %v1154_v42 = vpop.f32.mrb[31].mxu1 }
 0x136   : > { %v2093_v6 = vpack.c.bf16 %v1539_v61, %v1538_v36  ;;  %v1160_v7 = vadd.f32 %v2341_v56, %v2235_v0  ;;  %v1348_v8 = vadd.f32 %v2714_v58, %v1152_v1  ;;  %v2238_v11 = vadd.f32 %v2237_v5, %v2236_v54  ;;  %v2152_v36 = vld [vmem:[%s2709_s5 + $0x40] sm:$0xff]  }
 0x137   : > { %v2088_v14 = vpack.c.bf16 %v1537_v4, %v1536_v3  ;;  %v1155_v15 = vadd.f32 %v2232_v40, %v1154_v42  ;;  %v2035_v1 = vunpack.c.l.bf16 %v2152_v36  ;;  %v2036_v54 = vunpack.c.h.bf16 %v2152_v36 }
 0x138   : > { %2164 = vst [vmem:[%s2740_s10 + $0x28] sm:$0xff] %v2093_v6   ;;  %v1350_v12 = vadd.f32 %v2714_v58, %v1160_v7  ;;  %vm1380_vm12 = vcmp.gt.f32.partialorder %v1348_v8, 0.0  ;;  %v1412_v17 = vmul.f32 0.01, %v1348_v8  ;;  %v1163_v20 = vadd.f32 %v2342_v2, %v2238_v11  ;;  %v2153_v6 = vld [vmem:[%s2709_s5 + $0x48] sm:$0xff]  }
 0x139   : > { %2163 = vst [vmem:[%s2740_s10 + $0x20] sm:$0xff] %v2088_v14   ;;  %v1349_v23 = vadd.f32 %v2714_v58, %v1155_v15  ;;  %v2788_v14 = vld [vmem:[%s2709_s5 + $0x68] sm:$0xff]  }
 0x13a   : > { %vm1382_vm13 = vcmp.gt.f32.partialorder %v1350_v12, 0.0  ;;  %v1414_v26 = vmul.f32 0.01, %v1350_v12  ;;  %v1444_v27 = vsel %vm1380_vm12, %v1348_v8, %v1412_v17  ;;  %v1351_v22 = vadd.f32 %v2714_v58, %v1163_v20  ;;  %v2239_v18 = vpop.f32.mrb[32].mxu0  ;;  %v2345_v28 = vpop.f32.mrb[32].mxu1  ;;  %v2791_v17 = vld [vmem:[%s2709_s5 + $0x50] sm:$0xff]  }
 0x13b   : > { %vm1381_vm14 = vcmp.gt.f32.partialorder %v1349_v23, 0.0  ;;  %v1413_v33 = vmul.f32 0.01, %v1349_v23  ;;  %v2240_v30 = vpop.f32.mrb[33].mxu0  ;;  %v1167_v34 = vpop.f32.mrb[33].mxu1  ;;  %v1540_v63 = vadd.f32 %v2027_v21, %v1444_v27  ;;  %v2794_v20 = vld [vmem:[%s2709_s5 + $0x60] sm:$0xff]  }
 0x13c   : > { %v1446_v35 = vsel %vm1382_vm13, %v1350_v12, %v1414_v26  ;;  %vm1383_vm15 = vcmp.gt.f32.partialorder %v1351_v22, 0.0  ;;  %v1415_v38 = vmul.f32 0.01, %v1351_v22  ;;  %v2241_v40 = vadd.f32 %v2240_v30, %v2239_v18  ;;  %v2242_v41 = vpop.f32.mrb[34].mxu0  ;;  %v2346_v44 = vpop.f32.mrb[34].mxu1 }
 0x13d   : > { %v1445_v45 = vsel %vm1381_vm14, %v1349_v23, %v1413_v33  ;;  %v2243_v39 = vpop.f32.mrb[35].mxu0  ;;  %v1170_v46 = vpop.f32.mrb[35].mxu1  ;;  %v1542_v52 = vadd.f32 %v2031_v29, %v1446_v35  ;;  %v2055_v18 = vunpack.c.l.bf16 %v2788_v14  ;;  %v2799_v29 = vld [vmem:[%s2709_s5 + $0x78] sm:$0xff]   ;;  %v2043_v33 = vunpack.c.l.bf16 %v2791_v17 }
 0x13e   : > { %v1447_v47 = vsel %vm1383_vm15, %v1351_v22, %v1415_v38  ;;  %v1541_v50 = vadd.f32 %v2028_v24, %v1445_v45  ;;  %v1168_v48 = vadd.f32 %v2241_v40, %v1167_v34  ;;  %v2244_v51 = vadd.f32 %v2243_v39, %v2242_v41 }
 0x13f   : > { %v1543_v10 = vadd.f32 %v2032_v32, %v1447_v47  ;;  %v2039_v24 = vunpack.c.l.bf16 %v2153_v6  ;;  %v2040_v22 = vunpack.c.h.bf16 %v2153_v6  ;;  %v2802_v32 = vld [vmem:[%s2709_s5 + $0x70] sm:$0xff]   ;;  %v2051_v30 = vunpack.c.l.bf16 %v2794_v20 }
 0x140   : > { %v2098_v53 = vpack.c.bf16 %v1541_v50, %v1540_v63  ;;  %v1352_v56 = vadd.f32 %v2714_v58, %v1168_v48  ;;  %v1171_v57 = vadd.f32 %v2244_v51, %v1170_v46  ;;  %v2056_v34 = vunpack.c.h.bf16 %v2788_v14 }
 0x141   : > { %v2103_v59 = vpack.c.bf16 %v1543_v10, %v1542_v52  ;;  %v2044_v46 = vunpack.c.h.bf16 %v2791_v17  ;;  %v2063_v47 = vunpack.c.l.bf16 %v2799_v29  ;;  %v2059_v50 = vunpack.c.l.bf16 %v2802_v32 }
 0x142   : > { %2165 = vst [vmem:[%s2740_s10 + $0x30] sm:$0xff] %v2098_v53   ;;  %vm1384_vm0 = vcmp.gt.f32.partialorder %v1352_v56, 0.0  ;;  %v1416_v60 = vmul.f32 0.01, %v1352_v56  ;;  %v1353_v61 = vadd.f32 %v2714_v58, %v1171_v57  ;;  %v2245_v62 = vpop.f32.mrb[36].mxu0  ;;  %v2781_v0 = vpop.f32.mrb[36].mxu1 }
 0x143   : > { %2166 = vst [vmem:[%s2740_s10 + $0x38] sm:$0xff] %v2103_v59   ;;  %v2246_v2 = vpop.f32.mrb[37].mxu0  ;;  %v1183_v3 = vpop.f32.mrb[37].mxu1 }
 0x144   : > { %v1448_v4 = vsel %vm1384_vm0, %v1352_v56, %v1416_v60  ;;  %vm1385_vm1 = vcmp.gt.f32.partialorder %v1353_v61, 0.0  ;;  %v1417_v5 = vmul.f32 0.01, %v1353_v61  ;;  %v2247_v42 = vadd.f32 %v2246_v2, %v2245_v62  ;;  %v2248_v7 = vpop.f32.mrb[38].mxu0  ;;  %v2785_v8 = vpop.f32.mrb[38].mxu1 }
 0x145   : > { %v2249_v9 = vpop.f32.mrb[39].mxu0  ;;  %v1186_v11 = vpop.f32.mrb[39].mxu1  ;;  %v1544_v21 = vadd.f32 %v2035_v1, %v1448_v4 }
 0x146   : > { %v1449_v15 = vsel %vm1385_vm1, %v1353_v61, %v1417_v5  ;;  %v1176_v12 = vadd.f32 %v2345_v28, %v2247_v42  ;;  %v2250_v16 = vadd.f32 %v2249_v9, %v2248_v7 }
 0x147   : > { %v1545_v23 = vadd.f32 %v2036_v54, %v1449_v15 }
 0x148   : > { %v1354_v26 = vadd.f32 %v2714_v58, %v1176_v12  ;;  %v1179_v27 = vadd.f32 %v2346_v44, %v2250_v16  ;;  %v2052_v44 = vunpack.c.h.bf16 %v2794_v20 }
 0x149   : > { %v2108_v28 = vpack.c.bf16 %v1545_v23, %v1544_v21 }
 0x14a   : > { %vm1386_vm2 = vcmp.gt.f32.partialorder %v1354_v26, 0.0  ;;  %v1418_v35 = vmul.f32 0.01, %v1354_v26  ;;  %v1355_v38 = vadd.f32 %v2714_v58, %v1179_v27  ;;  %v2251_v40 = vpop.f32.mrb[40].mxu0  ;;  %v2353_v41 = vpop.f32.mrb[40].mxu1 }
 0x14b   : > { %2167 = vst [vmem:[%s2740_s10 + $0x40] sm:$0xff] %v2108_v28   ;;  %v1208_v63 = vadd.f32 %v2353_v41, %v2687_v25  ;;  %v2252_v45 = vpop.f32.mrb[41].mxu0  ;;  %v1199_v39 = vpop.f32.mrb[41].mxu1 }
 0x14c   : > { %v1450_v48 = vsel %vm1386_vm2, %v1354_v26, %v1418_v35  ;;  %vm1387_vm3 = vcmp.gt.f32.partialorder %v1355_v38, 0.0  ;;  %v1419_v51 = vmul.f32 0.01, %v1355_v38  ;;  %v2253_v52 = vadd.f32 %v2252_v45, %v2251_v40  ;;  %v2254_v10 = vpop.f32.mrb[42].mxu0  ;;  %v2354_v53 = vpop.f32.mrb[42].mxu1 }
 0x14d   : > { %v1546_v56 = vadd.f32 %v2039_v24, %v1450_v48  ;;  %v1362_v36 = vadd.f32 %v2714_v58, %v1208_v63  ;;  %v1200_v57 = vadd.f32 %v2683_v13, %v1199_v39  ;;  %v1211_v25 = vadd.f32 %v2354_v53, %v2689_v31  ;;  %v2255_v59 = vpop.f32.mrb[43].mxu0  ;;  %v1202_v60 = vpop.f32.mrb[43].mxu1 }
 0x14e   : > { %v1451_v61 = vsel %vm1387_vm3, %v1355_v38, %v1419_v51  ;;  %v1184_v62 = vadd.f32 %v2253_v52, %v1183_v3  ;;  %v2256_v1 = vadd.f32 %v2255_v59, %v2254_v10  ;;  %v1203_v54 = vadd.f32 %v2685_v19, %v1202_v60 }
 0x14f   : > { %v1547_v2 = vadd.f32 %v2040_v22, %v1451_v61  ;;  %vm1394_vm4 = vcmp.gt.f32.partialorder %v1362_v36, 0.0  ;;  %v1426_v4 = vmul.f32 0.01, %v1362_v36  ;;  %v1360_v5 = vadd.f32 %v2714_v58, %v1200_v57 }
 0x150   : > { %v1356_v42 = vadd.f32 %v2714_v58, %v1184_v62  ;;  %v1363_v6 = vadd.f32 %v2714_v58, %v1211_v25  ;;  %v1187_v13 = vadd.f32 %v2256_v1, %v1186_v11  ;;  %v1361_v31 = vadd.f32 %v2714_v58, %v1203_v54 }
 0x151   : > { %v2113_v7 = vpack.c.bf16 %v1547_v2, %v1546_v56  ;;  %v1458_v9 = vsel %vm1394_vm4, %v1362_v36, %v1426_v4  ;;  %vm1392_vm5 = vcmp.gt.f32.partialorder %v1360_v5, 0.0  ;;  %v1424_v3 = vmul.f32 0.01, %v1360_v5 }
 0x152   : > { %v1554_v15 = vadd.f32 %v2055_v18, %v1458_v9  ;;  %vm1388_vm6 = vcmp.gt.f32.partialorder %v1356_v42, 0.0  ;;  %v1420_v19 = vmul.f32 0.01, %v1356_v42  ;;  %vm1395_vm7 = vcmp.gt.f32.partialorder %v1363_v6, 0.0  ;;  %v2257_v12 = vpop.f32.mrb[44].mxu0  ;;  %v2357_v16 = vpop.f32.mrb[44].mxu1 }
 0x153   : > { %2168 = vst [vmem:[%s2740_s10 + $0x48] sm:$0xff] %v2113_v7   ;;  %v1456_v21 = vsel %vm1392_vm5, %v1360_v5, %v1424_v3  ;;  %v1427_v23 = vmul.f32 0.01, %v1363_v6  ;;  %v1357_v24 = vadd.f32 %v2714_v58, %v1187_v13  ;;  %vm1393_vm8 = vcmp.gt.f32.partialorder %v1361_v31, 0.0  ;;  %v2258_v26 = vpop.f32.mrb[45].mxu0  ;;  %v1215_v11 = vpop.f32.mrb[45].mxu1 }
 0x154   : > { %v1452_v27 = vsel %vm1388_vm6, %v1356_v42, %v1420_v19  ;;  %v1552_v22 = vadd.f32 %v2051_v30, %v1456_v21  ;;  %v1425_v28 = vmul.f32 0.01, %v1361_v31  ;;  %v1224_v35 = vadd.f32 %v2357_v16, %v2699_v49  ;;  %v2260_v38 = vpop.f32.mrb[46].mxu0  ;;  %v2358_v18 = vpop.f32.mrb[46].mxu1 }
 0x155   : > { %v1548_v40 = vadd.f32 %v2043_v33, %v1452_v27  ;;  %v1459_v41 = vsel %vm1395_vm7, %v1363_v6, %v1427_v23  ;;  %vm1389_vm9 = vcmp.gt.f32.partialorder %v1357_v24, 0.0  ;;  %v1421_v63 = vmul.f32 0.01, %v1357_v24  ;;  %v2261_v45 = vpop.f32.mrb[47].mxu0  ;;  %v1218_v39 = vpop.f32.mrb[47].mxu1 }
 0x156   : > { %v1555_v48 = vadd.f32 %v2056_v34, %v1459_v41  ;;  %v1457_v30 = vsel %vm1393_vm8, %v1361_v31, %v1425_v28  ;;  %v1366_v51 = vadd.f32 %v2714_v58, %v1224_v35  ;;  %v2259_v49 = vadd.f32 %v2258_v26, %v2257_v12 }
 0x157   : > { %v1453_v52 = vsel %vm1389_vm9, %v1357_v24, %v1421_v63  ;;  %v1553_v33 = vadd.f32 %v2052_v44, %v1457_v30  ;;  %v1216_v10 = vadd.f32 %v2693_v37, %v1215_v11  ;;  %v1227_v53 = vadd.f32 %v2358_v18, %v2702_v55  ;;  %v2155_v37 = vld [vmem:[%s2709_s5 + $0x58] sm:$0xff]  }
 0x158   : > { %v2133_v56 = vpack.c.bf16 %v1555_v48, %v1554_v15  ;;  %v1549_v14 = vadd.f32 %v2044_v46, %v1453_v52  ;;  %vm1398_vm10 = vcmp.gt.f32.partialorder %v1366_v51, 0.0  ;;  %v1430_v34 = vmul.f32 0.01, %v1366_v51 }
 0x159   : > { %v2128_v36 = vpack.c.bf16 %v1553_v33, %v1552_v22  ;;  %v1192_v57 = vadd.f32 %v2781_v0, %v2259_v49  ;;  %v1364_v25 = vadd.f32 %v2714_v58, %v1216_v10  ;;  %v1367_v20 = vadd.f32 %v2714_v58, %v1227_v53 }
 0x15a   : > { %2172 = vst [vmem:[%s2740_s10 + $0x68] sm:$0xff] %v2133_v56   ;;  %v2118_v44 = vpack.c.bf16 %v1549_v14, %v1548_v40  ;;  %v2064_v59 = vunpack.c.h.bf16 %v2799_v29  ;;  %v2262_v55 = vadd.f32 %v2261_v45, %v2260_v38  ;;  %v1219_v60 = vadd.f32 %v2697_v43, %v1218_v39 }
 0x15b   : > { %2171 = vst [vmem:[%s2740_s10 + $0x60] sm:$0xff] %v2128_v36   ;;  %v1462_v17 = vsel %vm1398_vm10, %v1366_v51, %v1430_v34  ;;  %v1358_v46 = vadd.f32 %v2714_v58, %v1192_v57  ;;  %vm1396_vm11 = vcmp.gt.f32.partialorder %v1364_v25, 0.0  ;;  %v1428_v61 = vmul.f32 0.01, %v1364_v25 }
 0x15c   : > { %2169 = vst [vmem:[%s2740_s10 + $0x50] sm:$0xff] %v2118_v44   ;;  %vm1399_vm12 = vcmp.gt.f32.partialorder %v1367_v20, 0.0  ;;  %v1431_v0 = vmul.f32 0.01, %v1367_v20  ;;  %v1195_v62 = vadd.f32 %v2785_v8, %v2262_v55  ;;  %v1365_v1 = vadd.f32 %v2714_v58, %v1219_v60 }
 0x15d   : > { %vm1390_vm13 = vcmp.gt.f32.partialorder %v1358_v46, 0.0  ;;  %v1422_v54 = vmul.f32 0.01, %v1358_v46  ;;  %v2047_v2 = vunpack.c.l.bf16 %v2155_v37  ;;  %v2060_v4 = vunpack.c.h.bf16 %v2802_v32 }
 0x15e   : > { %v1463_v5 = vsel %vm1399_vm12, %v1367_v20, %v1431_v0  ;;  %v1359_v43 = vadd.f32 %v2714_v58, %v1195_v62  ;;  %v2048_v42 = vunpack.c.h.bf16 %v2155_v37  ;;  %vm1397_vm14 = vcmp.gt.f32.partialorder %v1365_v1, 0.0 }
 0x15f   : > { %v1558_v6 = vadd.f32 %v2063_v47, %v1462_v17  ;;  %v1460_v13 = vsel %vm1396_vm11, %v1364_v25, %v1428_v61  ;;  %v1559_v8 = vadd.f32 %v2064_v59, %v1463_v5  ;;  %v1429_v31 = vmul.f32 0.01, %v1365_v1 }
 0x160   : > { %v1454_v7 = vsel %vm1390_vm13, %v1358_v46, %v1422_v54  ;;  %vm1391_vm15 = vcmp.gt.f32.partialorder %v1359_v43, 0.0  ;;  %v1423_v9 = vmul.f32 0.01, %v1359_v43  ;;  %v1556_v58 = vadd.f32 %v2059_v50, %v1460_v13 }
 0x161   : > { %v2143_v3 = vpack.c.bf16 %v1559_v8, %v1558_v6  ;;  %v1461_v15 = vsel %vm1397_vm14, %v1365_v1, %v1429_v31  ;;  %v1550_v16 = vadd.f32 %v2047_v2, %v1454_v7 }
 0x162   : > { %v1455_v19 = vsel %vm1391_vm15, %v1359_v43, %v1423_v9  ;;  %v1557_v12 = vadd.f32 %v2060_v4, %v1461_v15 }
 0x163   : > { %2174 = vst [vmem:[%s2740_s10 + $0x78] sm:$0xff] %v2143_v3   ;;  %v1551_v29 = vadd.f32 %v2048_v42, %v1455_v19 }
 0x164   : > { %v2138_v47 = vpack.c.bf16 %v1557_v12, %v1556_v58 }
 0x165   : > { %v2123_v21 = vpack.c.bf16 %v1551_v29, %v1550_v16 }
 0x166   : > { %2173 = vst [vmem:[%s2740_s10 + $0x70] sm:$0xff] %v2138_v47  }
 0x167   : > { %2170 = vst [vmem:[%s2740_s10 + $0x58] sm:$0xff] %v2123_v21  }
 0x168 PF: > { %s14_s17 = sadd.s32 1, %s2510_s17   ;;  %s2874_s15 = smov %s2506_s16 }
 0x169   : > { %p11_p5 = scmp.ge.s32.totalorder %s14_s17, 4   ;;  %s2875_s16 = smov %s2877_s18 }
 0x16b   :  { %13 = sbr.rel (!%p11_p5) target bundleno = 2 (0x2), region = 83 }

</bundles_post_ra>
